<compile_context>
chip_gen: v7x
topology: tpu7x:2x2x1
jax: 0.10.0
libtpu: 0.0.40
codegen_flags: <defaults>
</compile_context>

<pallas_src>
import jax
import jax.numpy as jnp
from jax import lax
from jax.experimental import pallas as pl
from jax.experimental.pallas import tpu as pltpu

# ---- small config consistent with the module (scaled down) ----
VOCAB = 65            # vocab_size = len(chars)
N_EMBED = 48          # n_embed (scaled down from 384)
N_HEAD = 6            # n_head
HEAD_SIZE = N_EMBED // N_HEAD
N_LAYERS = 2          # n_layers (scaled down from 6)
BLOCK_SIZE = 16       # block_size (scaled down from 256)
FF = 4 * N_EMBED
LN_EPS = 1e-5         # torch.nn.LayerNorm default
VOCAB_PAD = 128       # lane-dense logits: pad 65 -> 128, slice back outside
W_DTYPE = jnp.bfloat16
APPROX_RECIP = True   # exact-softmax debug toggle (set False to use p / sum)


def _layernorm(x, g, b):
    mu = jnp.mean(x, axis=-1, keepdims=True)
    var = jnp.mean((x - mu) ** 2, axis=-1, keepdims=True)
    return (x - mu) * jax.lax.rsqrt(var + LN_EPS) * g + b


# ----------------------------- Pallas kernel -----------------------------

def _make_fwd_kernel(T):
    """Whole forward pass for ONE batch element (all blocks + final LN + lm_head)."""
    scale = float(N_EMBED) ** -0.5   # PyTorch Head uses C**-0.5 with C = n_embed

    def fwd_kernel(x_ref,
                   ln1w, ln1b, wq, wk, wv, wo, bo,
                   ln2w, ln2b, w1, b1, w2, b2,
                   lnfw, lnfb, wlm, blm,
                   o_ref):
        x = x_ref[...]                                        # (T, C) f32 residual

        # Additive causal-mask bias, built once, reused by every layer / head.
        r = lax.broadcasted_iota(jnp.int32, (T, T), 0)
        c = lax.broadcasted_iota(jnp.int32, (T, T), 1)
        mask_bias = jnp.where(c <= r, 0.0, -1e30).astype(jnp.float32)

        def _softmax(s):
            s = s - jnp.max(s, axis=-1, keepdims=True)
            p = jnp.exp(s)
            d = jnp.sum(p, axis=-1, keepdims=True)
            if APPROX_RECIP:
                return p * pl.reciprocal(d, approx=True)
            return p / d

        for l in range(N_LAYERS):
            # --- multi-head causal self-attention on ln1(x) ---
            h = _layernorm(x, ln1w[l], ln1b[l]).astype(W_DTYPE)       # (T, C) bf16
            sa = jnp.zeros((T, N_EMBED), jnp.float32)
            for hd in range(N_HEAD):
                # Per-head projections straight from the MXU (head-major packed
                # weights): no lane slices, no stacks, no (H, T, hs) relayouts.
                q = jnp.dot(h, wq[l, hd], preferred_element_type=jnp.float32)   # (T, hs)
                k = jnp.dot(h, wk[l, hd], preferred_element_type=jnp.float32)
                v = jnp.dot(h, wv[l, hd],
                            preferred_element_type=jnp.float32).astype(W_DTYPE)
                # scores: q @ k^T via "NT" dot_general (no materialized transpose)
                s = lax.dot_general(q.astype(W_DTYPE), k.astype(W_DTYPE),
                                    (((1,), (1,)), ((), ())),
                                    preferred_element_type=jnp.float32)         # (T, T)
                p = _softmax(s * scale + mask_bias)
                att = jnp.dot(p.astype(W_DTYPE), v,
                              preferred_element_type=jnp.float32)               # (T, hs)
                # Fold Wo per head: accumulate a lane-dense (T, C) contribution
                # (replaces the 6-way 8-lane concatenate + single Wo matmul).
                sa = sa + jnp.dot(att.astype(W_DTYPE), wo[l, hd],
                                  preferred_element_type=jnp.float32)
            x = x + sa + bo[l]

            # --- feed-forward on ln2(x) ---
            h2 = _layernorm(x, ln2w[l], ln2b[l]).astype(W_DTYPE)
            f = jnp.maximum(
                jnp.dot(h2, w1[l], preferred_element_type=jnp.float32) + b1[l], 0.0)
            x = x + jnp.dot(f.astype(W_DTYPE), w2[l],
                            preferred_element_type=jnp.float32) + b2[l]

        # --- final LayerNorm + lm_head (lane-padded to VOCAB_PAD) ---
        hf = _layernorm(x, lnfw[...], lnfb[...]).astype(W_DTYPE)
        o_ref[...] = jnp.dot(hf, wlm[...], preferred_element_type=jnp.float32) + blm[...]

    return fwd_kernel


# ----------------------------- weight packing (done ONCE) -----------------------------

def pack_params(params):
    """Stack per-layer weights, repack q/k/v/wo head-major, cast matmul weights to bf16."""
    blk = params["blocks"]
    L, H, hs, C = N_LAYERS, N_HEAD, HEAD_SIZE, N_EMBED

    def stack(key, dtype=jnp.float32):
        return jnp.stack([b[key] for b in blk]).astype(dtype)

    def per_head_cols(key):
        # (L, C, C) with head-concatenated columns -> (L, H, C, hs) bf16
        w = jnp.stack([b[key] for b in blk])                        # (L, C, C)
        return jnp.transpose(w.reshape(L, C, H, hs), (0, 2, 1, 3)).astype(W_DTYPE)

    wo = jnp.stack([b["wo"] for b in blk]).reshape(L, H, hs, C).astype(W_DTYPE)
    wlm = jnp.zeros((C, VOCAB_PAD), jnp.float32).at[:, :VOCAB].set(params["wlm"]).astype(W_DTYPE)
    blm = jnp.zeros((1, VOCAB_PAD), jnp.float32).at[:, :VOCAB].set(params["blm"])

    return dict(
        tok_emb=params["tok_emb"], pos_emb=params["pos_emb"],
        ln1w=stack("ln1w"), ln1b=stack("ln1b"),
        wq=per_head_cols("wq"), wk=per_head_cols("wk"), wv=per_head_cols("wv"),
        wo=wo, bo=stack("bo"),
        ln2w=stack("ln2w"), ln2b=stack("ln2b"),
        w1=stack("w1", W_DTYPE), b1=stack("b1"),
        w2=stack("w2", W_DTYPE), b2=stack("b2"),
        lnfw=params["lnfw"], lnfb=params["lnfb"],
        wlm=wlm, blm=blm,
    )


_WEIGHT_ORDER = ["ln1w", "ln1b", "wq", "wk", "wv", "wo", "bo",
                 "ln2w", "ln2b", "w1", "b1", "w2", "b2",
                 "lnfw", "lnfb", "wlm", "blm"]


# ----------------------------- wrapper (jitted) -----------------------------

def forward(packed, idx):
    """Equivalent of BigramLanguageModel.forward(idx, targets=None) -> logits."""
    B, T = idx.shape
    C = N_EMBED
    # embedding gather + positional add (XLA-side glue)
    x = jnp.take(packed["tok_emb"], idx, axis=0) + packed["pos_emb"][:T][None]   # (B, T, C)

    weights = [packed[n] for n in _WEIGHT_ORDER]

    def full_spec(a):
        nd = a.ndim
        return pl.BlockSpec(a.shape, lambda b, _nd=nd: (0,) * _nd)   # constant block

    in_specs = ([pl.BlockSpec((None, T, C), lambda b: (b, 0, 0))]
                + [full_spec(w) for w in weights])
    out_spec = pl.BlockSpec((None, T, VOCAB_PAD), lambda b: (b, 0, 0))

    flops = B * (N_LAYERS * (2 * T * C * 3 * C                       # qkv projections
                             + 2 * 2 * N_HEAD * T * T * HEAD_SIZE    # scores + AV
                             + 2 * T * C * C                         # folded Wo
                             + 2 * 2 * T * C * FF)                   # FFN
                 + 2 * T * C * VOCAB_PAD)                            # lm_head
    transc = B * N_LAYERS * N_HEAD * T * T
    bytes_accessed = (x.size * x.dtype.itemsize
                      + sum(w.size * w.dtype.itemsize for w in weights)
                      + B * T * VOCAB_PAD * 4)

    logits_p = pl.pallas_call(
        _make_fwd_kernel(T),
        grid=(B,),                                   # one batch element per step;
        in_specs=in_specs,                           # shards across v7x's 2 TCs
        out_specs=out_spec,
        out_shape=jax.ShapeDtypeStruct((B, T, VOCAB_PAD), jnp.float32),
        compiler_params=pltpu.CompilerParams(dimension_semantics=("parallel",)),
        cost_estimate=pl.CostEstimate(flops=flops, transcendentals=transc,
                                      bytes_accessed=bytes_accessed),
    )(x, *weights)

    # TODO(synk): targets-not-None branch (F.cross_entropy) and generate()'s
    # torch.multinomial sampling loop are host-side glue, not implemented in-kernel.
    return logits_p[:, :, :VOCAB]


# ----------------------------- params & reference -----------------------------

def init_params(key):
    keys = iter(jax.random.split(key, 64))

    def nrm(shape, scale=0.02):
        return (scale * jax.random.normal(next(keys), shape)).astype(jnp.float32)

    params = {
        "tok_emb": nrm((VOCAB, N_EMBED)),
        "pos_emb": nrm((BLOCK_SIZE, N_EMBED)),
        "lnfw": jnp.ones((1, N_EMBED), jnp.float32),
        "lnfb": jnp.zeros((1, N_EMBED), jnp.float32),
        "wlm": nrm((N_EMBED, VOCAB)),
        "blm": jnp.zeros((1, VOCAB), jnp.float32),
        "blocks": [],
    }
    for _ in range(N_LAYERS):
        params["blocks"].append(dict(
            ln1w=jnp.ones((1, N_EMBED), jnp.float32),
            ln1b=jnp.zeros((1, N_EMBED), jnp.float32),
            wq=nrm((N_EMBED, N_EMBED)),
            wk=nrm((N_EMBED, N_EMBED)),
            wv=nrm((N_EMBED, N_EMBED)),
            wo=nrm((N_EMBED, N_EMBED)),
            bo=jnp.zeros((1, N_EMBED), jnp.float32),
            ln2w=jnp.ones((1, N_EMBED), jnp.float32),
            ln2b=jnp.zeros((1, N_EMBED), jnp.float32),
            w1=nrm((N_EMBED, FF)),
            b1=jnp.zeros((1, FF), jnp.float32),
            w2=nrm((FF, N_EMBED)),
            b2=jnp.zeros((1, N_EMBED), jnp.float32),
        ))
    return params


def reference_forward(params, idx):
    """Pure-JAX f32 reference mirroring the PyTorch forward semantics."""
    B, T = idx.shape
    x = jnp.take(params["tok_emb"], idx, axis=0) + params["pos_emb"][:T][None]
    row = jnp.arange(T)[:, None]
    col = jnp.arange(T)[None, :]
    causal = col <= row
    scale = float(N_EMBED) ** -0.5
    for p in params["blocks"]:
        h = _layernorm(x, p["ln1w"], p["ln1b"])
        q = h @ p["wq"]; k = h @ p["wk"]; v = h @ p["wv"]
        outs = []
        for hd in range(N_HEAD):
            s = hd * HEAD_SIZE
            qh, kh, vh = q[..., s:s+HEAD_SIZE], k[..., s:s+HEAD_SIZE], v[..., s:s+HEAD_SIZE]
            wei = jnp.einsum("btd,bsd->bts", qh, kh) * scale
            wei = jnp.where(causal[None], wei, -jnp.inf)
            wei = jax.nn.softmax(wei, axis=-1)
            outs.append(jnp.einsum("bts,bsd->btd", wei, vh))
        x = x + (jnp.concatenate(outs, axis=-1) @ p["wo"] + p["bo"])
        h2 = _layernorm(x, p["ln2w"], p["ln2b"])
        x = x + (jnp.maximum(h2 @ p["w1"] + p["b1"], 0.0) @ p["w2"] + p["b2"])
    h = _layernorm(x, params["lnfw"], params["lnfb"])
    return h @ params["wlm"] + params["blm"]


# ----------------------------- main -----------------------------

if __name__ == "__main__":
    key = jax.random.PRNGKey(0)
    pkey, ikey = jax.random.split(key)
    params = init_params(pkey)
    packed = pack_params(params)        # weight packing hoisted out of forward()

    B, T = 2, BLOCK_SIZE
    idx = jax.random.randint(ikey, (B, T), 0, VOCAB, dtype=jnp.int32)

    fwd = jax.jit(forward)
    logits = jax.block_until_ready(fwd(packed, idx))
    assert logits.shape == (B, T, VOCAB), logits.shape

    ref = reference_forward(params, idx)
    err = float(jnp.max(jnp.abs(logits - ref)))
    assert jnp.allclose(logits, ref, atol=2e-2, rtol=2e-2), f"max abs err {err}"

    print("KERNEL_OK")
</pallas_src>

<mosaic_0001>
module attributes {stable_mosaic.version = 11 : i64} {
  func.func @fwd_kernel(%arg0: i32, %arg1: memref<1x16x48xf32, #tpu.memory_space<vmem>>, %arg2: memref<2x1x48xf32, #tpu.memory_space<vmem>>, %arg3: memref<2x1x48xf32, #tpu.memory_space<vmem>>, %arg4: memref<2x6x48x8xbf16, #tpu.memory_space<vmem>>, %arg5: memref<2x6x48x8xbf16, #tpu.memory_space<vmem>>, %arg6: memref<2x6x48x8xbf16, #tpu.memory_space<vmem>>, %arg7: memref<2x6x8x48xbf16, #tpu.memory_space<vmem>>, %arg8: memref<2x1x48xf32, #tpu.memory_space<vmem>>, %arg9: memref<2x1x48xf32, #tpu.memory_space<vmem>>, %arg10: memref<2x1x48xf32, #tpu.memory_space<vmem>>, %arg11: memref<2x48x192xbf16, #tpu.memory_space<vmem>>, %arg12: memref<2x1x192xf32, #tpu.memory_space<vmem>>, %arg13: memref<2x192x48xbf16, #tpu.memory_space<vmem>>, %arg14: memref<2x1x48xf32, #tpu.memory_space<vmem>>, %arg15: memref<1x48xf32, #tpu.memory_space<vmem>>, %arg16: memref<1x48xf32, #tpu.memory_space<vmem>>, %arg17: memref<48x128xbf16, #tpu.memory_space<vmem>>, %arg18: memref<1x128xf32, #tpu.memory_space<vmem>>, %arg19: memref<1x16x128xf32, #tpu.memory_space<vmem>>) attributes {dimension_semantics = [#tpu.dimension_semantics<parallel>], iteration_bounds = array<i64: 2>, scalar_prefetch = 0 : i64, scratch_operands = 0 : i64, tpu.core_type = #tpu.core_type<tc>, window_params = [{transform_indices = @transform_0, window_bounds = array<i64: 1, 16, 48>}, {pipeline_mode = #tpu.pipeline_mode<synchronous>, transform_indices = @transform_1, window_bounds = array<i64: 2, 1, 48>}, {pipeline_mode = #tpu.pipeline_mode<synchronous>, transform_indices = @transform_2, window_bounds = array<i64: 2, 1, 48>}, {pipeline_mode = #tpu.pipeline_mode<synchronous>, transform_indices = @transform_3, window_bounds = array<i64: 2, 6, 48, 8>}, {pipeline_mode = #tpu.pipeline_mode<synchronous>, transform_indices = @transform_4, window_bounds = array<i64: 2, 6, 48, 8>}, {pipeline_mode = #tpu.pipeline_mode<synchronous>, transform_indices = @transform_5, window_bounds = array<i64: 2, 6, 48, 8>}, {pipeline_mode = #tpu.pipeline_mode<synchronous>, transform_indices = @transform_6, window_bounds = array<i64: 2, 6, 8, 48>}, {pipeline_mode = #tpu.pipeline_mode<synchronous>, transform_indices = @transform_7, window_bounds = array<i64: 2, 1, 48>}, {pipeline_mode = #tpu.pipeline_mode<synchronous>, transform_indices = @transform_8, window_bounds = array<i64: 2, 1, 48>}, {pipeline_mode = #tpu.pipeline_mode<synchronous>, transform_indices = @transform_9, window_bounds = array<i64: 2, 1, 48>}, {pipeline_mode = #tpu.pipeline_mode<synchronous>, transform_indices = @transform_10, window_bounds = array<i64: 2, 48, 192>}, {pipeline_mode = #tpu.pipeline_mode<synchronous>, transform_indices = @transform_11, window_bounds = array<i64: 2, 1, 192>}, {pipeline_mode = #tpu.pipeline_mode<synchronous>, transform_indices = @transform_12, window_bounds = array<i64: 2, 192, 48>}, {pipeline_mode = #tpu.pipeline_mode<synchronous>, transform_indices = @transform_13, window_bounds = array<i64: 2, 1, 48>}, {pipeline_mode = #tpu.pipeline_mode<synchronous>, transform_indices = @transform_14, window_bounds = array<i64: 1, 48>}, {pipeline_mode = #tpu.pipeline_mode<synchronous>, transform_indices = @transform_15, window_bounds = array<i64: 1, 48>}, {pipeline_mode = #tpu.pipeline_mode<synchronous>, transform_indices = @transform_16, window_bounds = array<i64: 48, 128>}, {pipeline_mode = #tpu.pipeline_mode<synchronous>, transform_indices = @transform_17, window_bounds = array<i64: 1, 128>}, {transform_indices = @transform_18, window_bounds = array<i64: 1, 16, 128>}]} {
    %c0 = arith.constant 0 : index
    %c0_0 = arith.constant 0 : index
    %c0_1 = arith.constant 0 : index
    %0 = vector.load %arg1[%c0, %c0_0, %c0_1] : memref<1x16x48xf32, #tpu.memory_space<vmem>>, vector<1x16x48xf32>
    %1 = vector.shape_cast %0 : vector<1x16x48xf32> to vector<16x48xf32>
    %2 = tpu.iota {dimensions = array<i32: 0>} : vector<16x16xi32>
    %3 = tpu.iota {dimensions = array<i32: 1>} : vector<16x16xi32>
    %4 = arith.cmpi sle, %3, %2 : vector<16x16xi32>
    %cst = arith.constant 0.000000e+00 : f32
    %cst_2 = arith.constant -1.000000e+30 : f32
    %5 = vector.broadcast %cst : f32 to vector<16x16xf32>
    %6 = vector.broadcast %cst_2 : f32 to vector<16x16xf32>
    %7 = arith.select %4, %5, %6 : vector<16x16xi1>, vector<16x16xf32>
    %c0_3 = arith.constant 0 : index
    %c0_4 = arith.constant 0 : index
    %c0_5 = arith.constant 0 : index
    %8 = vector.load %arg2[%c0_3, %c0_4, %c0_5] : memref<2x1x48xf32, #tpu.memory_space<vmem>>, vector<1x1x48xf32>
    %9 = vector.shape_cast %8 : vector<1x1x48xf32> to vector<1x48xf32>
    %c0_6 = arith.constant 0 : index
    %c0_7 = arith.constant 0 : index
    %c0_8 = arith.constant 0 : index
    %10 = vector.load %arg3[%c0_6, %c0_7, %c0_8] : memref<2x1x48xf32, #tpu.memory_space<vmem>>, vector<1x1x48xf32>
    %11 = vector.shape_cast %10 : vector<1x1x48xf32> to vector<1x48xf32>
    %cst_9 = arith.constant dense<0.000000e+00> : vector<16xf32>
    %12 = vector.multi_reduction <add>, %1, %cst_9 [1] : vector<16x48xf32> to vector<16xf32>
    %13 = vector.shape_cast %12 : vector<16xf32> to vector<16x1xf32>
    %cst_10 = arith.constant 4.800000e+01 : f32
    %14 = vector.broadcast %cst_10 : f32 to vector<16x1xf32>
    %15 = arith.divf %13, %14 : vector<16x1xf32>
    %16 = vector.broadcast %15 : vector<16x1xf32> to vector<16x48xf32>
    %17 = arith.subf %1, %16 : vector<16x48xf32>
    %18 = arith.mulf %17, %17 : vector<16x48xf32>
    %cst_11 = arith.constant dense<0.000000e+00> : vector<16xf32>
    %19 = vector.multi_reduction <add>, %18, %cst_11 [1] : vector<16x48xf32> to vector<16xf32>
    %20 = vector.shape_cast %19 : vector<16xf32> to vector<16x1xf32>
    %cst_12 = arith.constant 4.800000e+01 : f32
    %21 = vector.broadcast %cst_12 : f32 to vector<16x1xf32>
    %22 = arith.divf %20, %21 : vector<16x1xf32>
    %23 = vector.broadcast %15 : vector<16x1xf32> to vector<16x48xf32>
    %24 = arith.subf %1, %23 : vector<16x48xf32>
    %cst_13 = arith.constant 9.99999974E-6 : f32
    %25 = vector.broadcast %cst_13 : f32 to vector<16x1xf32>
    %26 = arith.addf %22, %25 : vector<16x1xf32>
    %27 = math.rsqrt %26 : vector<16x1xf32>
    %28 = vector.broadcast %27 : vector<16x1xf32> to vector<16x48xf32>
    %29 = arith.mulf %24, %28 : vector<16x48xf32>
    %30 = vector.broadcast %9 : vector<1x48xf32> to vector<16x48xf32>
    %31 = arith.mulf %29, %30 : vector<16x48xf32>
    %32 = vector.broadcast %11 : vector<1x48xf32> to vector<16x48xf32>
    %33 = arith.addf %31, %32 : vector<16x48xf32>
    %34 = arith.truncf %33 : vector<16x48xf32> to vector<16x48xbf16>
    %cst_14 = arith.constant 0.000000e+00 : f32
    %35 = vector.broadcast %cst_14 : f32 to vector<16x48xf32>
    %c0_15 = arith.constant 0 : index
    %c0_16 = arith.constant 0 : index
    %c0_17 = arith.constant 0 : index
    %c0_18 = arith.constant 0 : index
    %36 = vector.load %arg4[%c0_15, %c0_16, %c0_17, %c0_18] : memref<2x6x48x8xbf16, #tpu.memory_space<vmem>>, vector<1x1x48x8xbf16>
    %37 = vector.shape_cast %36 : vector<1x1x48x8xbf16> to vector<48x8xbf16>
    %cst_19 = arith.constant dense<0.000000e+00> : vector<16x8xf32>
    %38 = tpu.matmul %34, %37, %cst_19 {dimension_numbers = #tpu.dot_dimension_numbers<[1], [0], [0], [1], [0, 0, 1, 1], [], []>} : vector<16x48xbf16>, vector<48x8xbf16>, vector<16x8xf32> -> vector<16x8xf32>
    %c0_20 = arith.constant 0 : index
    %c0_21 = arith.constant 0 : index
    %c0_22 = arith.constant 0 : index
    %c0_23 = arith.constant 0 : index
    %39 = vector.load %arg5[%c0_20, %c0_21, %c0_22, %c0_23] : memref<2x6x48x8xbf16, #tpu.memory_space<vmem>>, vector<1x1x48x8xbf16>
    %40 = vector.shape_cast %39 : vector<1x1x48x8xbf16> to vector<48x8xbf16>
    %cst_24 = arith.constant dense<0.000000e+00> : vector<16x8xf32>
    %41 = tpu.matmul %34, %40, %cst_24 {dimension_numbers = #tpu.dot_dimension_numbers<[1], [0], [0], [1], [0, 0, 1, 1], [], []>} : vector<16x48xbf16>, vector<48x8xbf16>, vector<16x8xf32> -> vector<16x8xf32>
    %c0_25 = arith.constant 0 : index
    %c0_26 = arith.constant 0 : index
    %c0_27 = arith.constant 0 : index
    %c0_28 = arith.constant 0 : index
    %42 = vector.load %arg6[%c0_25, %c0_26, %c0_27, %c0_28] : memref<2x6x48x8xbf16, #tpu.memory_space<vmem>>, vector<1x1x48x8xbf16>
    %43 = vector.shape_cast %42 : vector<1x1x48x8xbf16> to vector<48x8xbf16>
    %cst_29 = arith.constant dense<0.000000e+00> : vector<16x8xf32>
    %44 = tpu.matmul %34, %43, %cst_29 {dimension_numbers = #tpu.dot_dimension_numbers<[1], [0], [0], [1], [0, 0, 1, 1], [], []>} : vector<16x48xbf16>, vector<48x8xbf16>, vector<16x8xf32> -> vector<16x8xf32>
    %45 = arith.truncf %44 : vector<16x8xf32> to vector<16x8xbf16>
    %46 = arith.truncf %38 : vector<16x8xf32> to vector<16x8xbf16>
    %47 = arith.truncf %41 : vector<16x8xf32> to vector<16x8xbf16>
    %cst_30 = arith.constant dense<0.000000e+00> : vector<16x16xf32>
    %48 = tpu.matmul %46, %47, %cst_30 {dimension_numbers = #tpu.dot_dimension_numbers<[1], [1], [0], [0], [0, 0, 1, 0], [], []>} : vector<16x8xbf16>, vector<16x8xbf16>, vector<16x16xf32> -> vector<16x16xf32>
    %cst_31 = arith.constant 0.144337565 : f32
    %49 = vector.broadcast %cst_31 : f32 to vector<16x16xf32>
    %50 = arith.mulf %48, %49 : vector<16x16xf32>
    %51 = arith.addf %50, %7 : vector<16x16xf32>
    %cst_32 = arith.constant dense<0xFF800000> : vector<16xf32>
    %52 = vector.multi_reduction <maximumf>, %51, %cst_32 [1] : vector<16x16xf32> to vector<16xf32>
    %53 = vector.shape_cast %52 : vector<16xf32> to vector<16x1xf32>
    %54 = vector.broadcast %53 : vector<16x1xf32> to vector<16x16xf32>
    %55 = arith.subf %51, %54 : vector<16x16xf32>
    %56 = math.exp %55 : vector<16x16xf32>
    %cst_33 = arith.constant dense<0.000000e+00> : vector<16xf32>
    %57 = vector.multi_reduction <add>, %56, %cst_33 [1] : vector<16x16xf32> to vector<16xf32>
    %58 = vector.shape_cast %57 : vector<16xf32> to vector<16x1xf32>
    %59 = tpu.reciprocal %58 {approx = true} : vector<16x1xf32> -> vector<16x1xf32>
    %60 = vector.broadcast %59 : vector<16x1xf32> to vector<16x16xf32>
    %61 = arith.mulf %56, %60 : vector<16x16xf32>
    %62 = arith.truncf %61 : vector<16x16xf32> to vector<16x16xbf16>
    %cst_34 = arith.constant dense<0.000000e+00> : vector<16x8xf32>
    %63 = tpu.matmul %62, %45, %cst_34 {dimension_numbers = #tpu.dot_dimension_numbers<[1], [0], [0], [1], [0, 0, 1, 1], [], []>} : vector<16x16xbf16>, vector<16x8xbf16>, vector<16x8xf32> -> vector<16x8xf32>
    %64 = arith.truncf %63 : vector<16x8xf32> to vector<16x8xbf16>
    %c0_35 = arith.constant 0 : index
    %c0_36 = arith.constant 0 : index
    %c0_37 = arith.constant 0 : index
    %c0_38 = arith.constant 0 : index
    %65 = vector.load %arg7[%c0_35, %c0_36, %c0_37, %c0_38] : memref<2x6x8x48xbf16, #tpu.memory_space<vmem>>, vector<1x1x8x48xbf16>
    %66 = vector.shape_cast %65 : vector<1x1x8x48xbf16> to vector<8x48xbf16>
    %cst_39 = arith.constant dense<0.000000e+00> : vector<16x48xf32>
    %67 = tpu.matmul %64, %66, %cst_39 {dimension_numbers = #tpu.dot_dimension_numbers<[1], [0], [0], [1], [0, 0, 1, 1], [], []>} : vector<16x8xbf16>, vector<8x48xbf16>, vector<16x48xf32> -> vector<16x48xf32>
    %68 = arith.addf %35, %67 : vector<16x48xf32>
    %c0_40 = arith.constant 0 : index
    %c1 = arith.constant 1 : index
    %c0_41 = arith.constant 0 : index
    %c0_42 = arith.constant 0 : index
    %69 = vector.load %arg4[%c0_40, %c1, %c0_41, %c0_42] : memref<2x6x48x8xbf16, #tpu.memory_space<vmem>>, vector<1x1x48x8xbf16>
    %70 = vector.shape_cast %69 : vector<1x1x48x8xbf16> to vector<48x8xbf16>
    %cst_43 = arith.constant dense<0.000000e+00> : vector<16x8xf32>
    %71 = tpu.matmul %34, %70, %cst_43 {dimension_numbers = #tpu.dot_dimension_numbers<[1], [0], [0], [1], [0, 0, 1, 1], [], []>} : vector<16x48xbf16>, vector<48x8xbf16>, vector<16x8xf32> -> vector<16x8xf32>
    %c0_44 = arith.constant 0 : index
    %c1_45 = arith.constant 1 : index
    %c0_46 = arith.constant 0 : index
    %c0_47 = arith.constant 0 : index
    %72 = vector.load %arg5[%c0_44, %c1_45, %c0_46, %c0_47] : memref<2x6x48x8xbf16, #tpu.memory_space<vmem>>, vector<1x1x48x8xbf16>
    %73 = vector.shape_cast %72 : vector<1x1x48x8xbf16> to vector<48x8xbf16>
    %cst_48 = arith.constant dense<0.000000e+00> : vector<16x8xf32>
    %74 = tpu.matmul %34, %73, %cst_48 {dimension_numbers = #tpu.dot_dimension_numbers<[1], [0], [0], [1], [0, 0, 1, 1], [], []>} : vector<16x48xbf16>, vector<48x8xbf16>, vector<16x8xf32> -> vector<16x8xf32>
    %c0_49 = arith.constant 0 : index
    %c1_50 = arith.constant 1 : index
    %c0_51 = arith.constant 0 : index
    %c0_52 = arith.constant 0 : index
    %75 = vector.load %arg6[%c0_49, %c1_50, %c0_51, %c0_52] : memref<2x6x48x8xbf16, #tpu.memory_space<vmem>>, vector<1x1x48x8xbf16>
    %76 = vector.shape_cast %75 : vector<1x1x48x8xbf16> to vector<48x8xbf16>
    %cst_53 = arith.constant dense<0.000000e+00> : vector<16x8xf32>
    %77 = tpu.matmul %34, %76, %cst_53 {dimension_numbers = #tpu.dot_dimension_numbers<[1], [0], [0], [1], [0, 0, 1, 1], [], []>} : vector<16x48xbf16>, vector<48x8xbf16>, vector<16x8xf32> -> vector<16x8xf32>
    %78 = arith.truncf %77 : vector<16x8xf32> to vector<16x8xbf16>
    %79 = arith.truncf %71 : vector<16x8xf32> to vector<16x8xbf16>
    %80 = arith.truncf %74 : vector<16x8xf32> to vector<16x8xbf16>
    %cst_54 = arith.constant dense<0.000000e+00> : vector<16x16xf32>
    %81 = tpu.matmul %79, %80, %cst_54 {dimension_numbers = #tpu.dot_dimension_numbers<[1], [1], [0], [0], [0, 0, 1, 0], [], []>} : vector<16x8xbf16>, vector<16x8xbf16>, vector<16x16xf32> -> vector<16x16xf32>
    %cst_55 = arith.constant 0.144337565 : f32
    %82 = vector.broadcast %cst_55 : f32 to vector<16x16xf32>
    %83 = arith.mulf %81, %82 : vector<16x16xf32>
    %84 = arith.addf %83, %7 : vector<16x16xf32>
    %cst_56 = arith.constant dense<0xFF800000> : vector<16xf32>
    %85 = vector.multi_reduction <maximumf>, %84, %cst_56 [1] : vector<16x16xf32> to vector<16xf32>
    %86 = vector.shape_cast %85 : vector<16xf32> to vector<16x1xf32>
    %87 = vector.broadcast %86 : vector<16x1xf32> to vector<16x16xf32>
    %88 = arith.subf %84, %87 : vector<16x16xf32>
    %89 = math.exp %88 : vector<16x16xf32>
    %cst_57 = arith.constant dense<0.000000e+00> : vector<16xf32>
    %90 = vector.multi_reduction <add>, %89, %cst_57 [1] : vector<16x16xf32> to vector<16xf32>
    %91 = vector.shape_cast %90 : vector<16xf32> to vector<16x1xf32>
    %92 = tpu.reciprocal %91 {approx = true} : vector<16x1xf32> -> vector<16x1xf32>
    %93 = vector.broadcast %92 : vector<16x1xf32> to vector<16x16xf32>
    %94 = arith.mulf %89, %93 : vector<16x16xf32>
    %95 = arith.truncf %94 : vector<16x16xf32> to vector<16x16xbf16>
    %cst_58 = arith.constant dense<0.000000e+00> : vector<16x8xf32>
    %96 = tpu.matmul %95, %78, %cst_58 {dimension_numbers = #tpu.dot_dimension_numbers<[1], [0], [0], [1], [0, 0, 1, 1], [], []>} : vector<16x16xbf16>, vector<16x8xbf16>, vector<16x8xf32> -> vector<16x8xf32>
    %97 = arith.truncf %96 : vector<16x8xf32> to vector<16x8xbf16>
    %c0_59 = arith.constant 0 : index
    %c1_60 = arith.constant 1 : index
    %c0_61 = arith.constant 0 : index
    %c0_62 = arith.constant 0 : index
    %98 = vector.load %arg7[%c0_59, %c1_60, %c0_61, %c0_62] : memref<2x6x8x48xbf16, #tpu.memory_space<vmem>>, vector<1x1x8x48xbf16>
    %99 = vector.shape_cast %98 : vector<1x1x8x48xbf16> to vector<8x48xbf16>
    %cst_63 = arith.constant dense<0.000000e+00> : vector<16x48xf32>
    %100 = tpu.matmul %97, %99, %cst_63 {dimension_numbers = #tpu.dot_dimension_numbers<[1], [0], [0], [1], [0, 0, 1, 1], [], []>} : vector<16x8xbf16>, vector<8x48xbf16>, vector<16x48xf32> -> vector<16x48xf32>
    %101 = arith.addf %68, %100 : vector<16x48xf32>
    %c0_64 = arith.constant 0 : index
    %c2 = arith.constant 2 : index
    %c0_65 = arith.constant 0 : index
    %c0_66 = arith.constant 0 : index
    %102 = vector.load %arg4[%c0_64, %c2, %c0_65, %c0_66] : memref<2x6x48x8xbf16, #tpu.memory_space<vmem>>, vector<1x1x48x8xbf16>
    %103 = vector.shape_cast %102 : vector<1x1x48x8xbf16> to vector<48x8xbf16>
    %cst_67 = arith.constant dense<0.000000e+00> : vector<16x8xf32>
    %104 = tpu.matmul %34, %103, %cst_67 {dimension_numbers = #tpu.dot_dimension_numbers<[1], [0], [0], [1], [0, 0, 1, 1], [], []>} : vector<16x48xbf16>, vector<48x8xbf16>, vector<16x8xf32> -> vector<16x8xf32>
    %c0_68 = arith.constant 0 : index
    %c2_69 = arith.constant 2 : index
    %c0_70 = arith.constant 0 : index
    %c0_71 = arith.constant 0 : index
    %105 = vector.load %arg5[%c0_68, %c2_69, %c0_70, %c0_71] : memref<2x6x48x8xbf16, #tpu.memory_space<vmem>>, vector<1x1x48x8xbf16>
    %106 = vector.shape_cast %105 : vector<1x1x48x8xbf16> to vector<48x8xbf16>
    %cst_72 = arith.constant dense<0.000000e+00> : vector<16x8xf32>
    %107 = tpu.matmul %34, %106, %cst_72 {dimension_numbers = #tpu.dot_dimension_numbers<[1], [0], [0], [1], [0, 0, 1, 1], [], []>} : vector<16x48xbf16>, vector<48x8xbf16>, vector<16x8xf32> -> vector<16x8xf32>
    %c0_73 = arith.constant 0 : index
    %c2_74 = arith.constant 2 : index
    %c0_75 = arith.constant 0 : index
    %c0_76 = arith.constant 0 : index
    %108 = vector.load %arg6[%c0_73, %c2_74, %c0_75, %c0_76] : memref<2x6x48x8xbf16, #tpu.memory_space<vmem>>, vector<1x1x48x8xbf16>
    %109 = vector.shape_cast %108 : vector<1x1x48x8xbf16> to vector<48x8xbf16>
    %cst_77 = arith.constant dense<0.000000e+00> : vector<16x8xf32>
    %110 = tpu.matmul %34, %109, %cst_77 {dimension_numbers = #tpu.dot_dimension_numbers<[1], [0], [0], [1], [0, 0, 1, 1], [], []>} : vector<16x48xbf16>, vector<48x8xbf16>, vector<16x8xf32> -> vector<16x8xf32>
    %111 = arith.truncf %110 : vector<16x8xf32> to vector<16x8xbf16>
    %112 = arith.truncf %104 : vector<16x8xf32> to vector<16x8xbf16>
    %113 = arith.truncf %107 : vector<16x8xf32> to vector<16x8xbf16>
    %cst_78 = arith.constant dense<0.000000e+00> : vector<16x16xf32>
    %114 = tpu.matmul %112, %113, %cst_78 {dimension_numbers = #tpu.dot_dimension_numbers<[1], [1], [0], [0], [0, 0, 1, 0], [], []>} : vector<16x8xbf16>, vector<16x8xbf16>, vector<16x16xf32> -> vector<16x16xf32>
    %cst_79 = arith.constant 0.144337565 : f32
    %115 = vector.broadcast %cst_79 : f32 to vector<16x16xf32>
    %116 = arith.mulf %114, %115 : vector<16x16xf32>
    %117 = arith.addf %116, %7 : vector<16x16xf32>
    %cst_80 = arith.constant dense<0xFF800000> : vector<16xf32>
    %118 = vector.multi_reduction <maximumf>, %117, %cst_80 [1] : vector<16x16xf32> to vector<16xf32>
    %119 = vector.shape_cast %118 : vector<16xf32> to vector<16x1xf32>
    %120 = vector.broadcast %119 : vector<16x1xf32> to vector<16x16xf32>
    %121 = arith.subf %117, %120 : vector<16x16xf32>
    %122 = math.exp %121 : vector<16x16xf32>
    %cst_81 = arith.constant dense<0.000000e+00> : vector<16xf32>
    %123 = vector.multi_reduction <add>, %122, %cst_81 [1] : vector<16x16xf32> to vector<16xf32>
    %124 = vector.shape_cast %123 : vector<16xf32> to vector<16x1xf32>
    %125 = tpu.reciprocal %124 {approx = true} : vector<16x1xf32> -> vector<16x1xf32>
    %126 = vector.broadcast %125 : vector<16x1xf32> to vector<16x16xf32>
    %127 = arith.mulf %122, %126 : vector<16x16xf32>
    %128 = arith.truncf %127 : vector<16x16xf32> to vector<16x16xbf16>
    %cst_82 = arith.constant dense<0.000000e+00> : vector<16x8xf32>
    %129 = tpu.matmul %128, %111, %cst_82 {dimension_numbers = #tpu.dot_dimension_numbers<[1], [0], [0], [1], [0, 0, 1, 1], [], []>} : vector<16x16xbf16>, vector<16x8xbf16>, vector<16x8xf32> -> vector<16x8xf32>
    %130 = arith.truncf %129 : vector<16x8xf32> to vector<16x8xbf16>
    %c0_83 = arith.constant 0 : index
    %c2_84 = arith.constant 2 : index
    %c0_85 = arith.constant 0 : index
    %c0_86 = arith.constant 0 : index
    %131 = vector.load %arg7[%c0_83, %c2_84, %c0_85, %c0_86] : memref<2x6x8x48xbf16, #tpu.memory_space<vmem>>, vector<1x1x8x48xbf16>
    %132 = vector.shape_cast %131 : vector<1x1x8x48xbf16> to vector<8x48xbf16>
    %cst_87 = arith.constant dense<0.000000e+00> : vector<16x48xf32>
    %133 = tpu.matmul %130, %132, %cst_87 {dimension_numbers = #tpu.dot_dimension_numbers<[1], [0], [0], [1], [0, 0, 1, 1], [], []>} : vector<16x8xbf16>, vector<8x48xbf16>, vector<16x48xf32> -> vector<16x48xf32>
    %134 = arith.addf %101, %133 : vector<16x48xf32>
    %c0_88 = arith.constant 0 : index
    %c3 = arith.constant 3 : index
    %c0_89 = arith.constant 0 : index
    %c0_90 = arith.constant 0 : index
    %135 = vector.load %arg4[%c0_88, %c3, %c0_89, %c0_90] : memref<2x6x48x8xbf16, #tpu.memory_space<vmem>>, vector<1x1x48x8xbf16>
    %136 = vector.shape_cast %135 : vector<1x1x48x8xbf16> to vector<48x8xbf16>
    %cst_91 = arith.constant dense<0.000000e+00> : vector<16x8xf32>
    %137 = tpu.matmul %34, %136, %cst_91 {dimension_numbers = #tpu.dot_dimension_numbers<[1], [0], [0], [1], [0, 0, 1, 1], [], []>} : vector<16x48xbf16>, vector<48x8xbf16>, vector<16x8xf32> -> vector<16x8xf32>
    %c0_92 = arith.constant 0 : index
    %c3_93 = arith.constant 3 : index
    %c0_94 = arith.constant 0 : index
    %c0_95 = arith.constant 0 : index
    %138 = vector.load %arg5[%c0_92, %c3_93, %c0_94, %c0_95] : memref<2x6x48x8xbf16, #tpu.memory_space<vmem>>, vector<1x1x48x8xbf16>
    %139 = vector.shape_cast %138 : vector<1x1x48x8xbf16> to vector<48x8xbf16>
    %cst_96 = arith.constant dense<0.000000e+00> : vector<16x8xf32>
    %140 = tpu.matmul %34, %139, %cst_96 {dimension_numbers = #tpu.dot_dimension_numbers<[1], [0], [0], [1], [0, 0, 1, 1], [], []>} : vector<16x48xbf16>, vector<48x8xbf16>, vector<16x8xf32> -> vector<16x8xf32>
    %c0_97 = arith.constant 0 : index
    %c3_98 = arith.constant 3 : index
    %c0_99 = arith.constant 0 : index
    %c0_100 = arith.constant 0 : index
    %141 = vector.load %arg6[%c0_97, %c3_98, %c0_99, %c0_100] : memref<2x6x48x8xbf16, #tpu.memory_space<vmem>>, vector<1x1x48x8xbf16>
    %142 = vector.shape_cast %141 : vector<1x1x48x8xbf16> to vector<48x8xbf16>
    %cst_101 = arith.constant dense<0.000000e+00> : vector<16x8xf32>
    %143 = tpu.matmul %34, %142, %cst_101 {dimension_numbers = #tpu.dot_dimension_numbers<[1], [0], [0], [1], [0, 0, 1, 1], [], []>} : vector<16x48xbf16>, vector<48x8xbf16>, vector<16x8xf32> -> vector<16x8xf32>
    %144 = arith.truncf %143 : vector<16x8xf32> to vector<16x8xbf16>
    %145 = arith.truncf %137 : vector<16x8xf32> to vector<16x8xbf16>
    %146 = arith.truncf %140 : vector<16x8xf32> to vector<16x8xbf16>
    %cst_102 = arith.constant dense<0.000000e+00> : vector<16x16xf32>
    %147 = tpu.matmul %145, %146, %cst_102 {dimension_numbers = #tpu.dot_dimension_numbers<[1], [1], [0], [0], [0, 0, 1, 0], [], []>} : vector<16x8xbf16>, vector<16x8xbf16>, vector<16x16xf32> -> vector<16x16xf32>
    %cst_103 = arith.constant 0.144337565 : f32
    %148 = vector.broadcast %cst_103 : f32 to vector<16x16xf32>
    %149 = arith.mulf %147, %148 : vector<16x16xf32>
    %150 = arith.addf %149, %7 : vector<16x16xf32>
    %cst_104 = arith.constant dense<0xFF800000> : vector<16xf32>
    %151 = vector.multi_reduction <maximumf>, %150, %cst_104 [1] : vector<16x16xf32> to vector<16xf32>
    %152 = vector.shape_cast %151 : vector<16xf32> to vector<16x1xf32>
    %153 = vector.broadcast %152 : vector<16x1xf32> to vector<16x16xf32>
    %154 = arith.subf %150, %153 : vector<16x16xf32>
    %155 = math.exp %154 : vector<16x16xf32>
    %cst_105 = arith.constant dense<0.000000e+00> : vector<16xf32>
    %156 = vector.multi_reduction <add>, %155, %cst_105 [1] : vector<16x16xf32> to vector<16xf32>
    %157 = vector.shape_cast %156 : vector<16xf32> to vector<16x1xf32>
    %158 = tpu.reciprocal %157 {approx = true} : vector<16x1xf32> -> vector<16x1xf32>
    %159 = vector.broadcast %158 : vector<16x1xf32> to vector<16x16xf32>
    %160 = arith.mulf %155, %159 : vector<16x16xf32>
    %161 = arith.truncf %160 : vector<16x16xf32> to vector<16x16xbf16>
    %cst_106 = arith.constant dense<0.000000e+00> : vector<16x8xf32>
    %162 = tpu.matmul %161, %144, %cst_106 {dimension_numbers = #tpu.dot_dimension_numbers<[1], [0], [0], [1], [0, 0, 1, 1], [], []>} : vector<16x16xbf16>, vector<16x8xbf16>, vector<16x8xf32> -> vector<16x8xf32>
    %163 = arith.truncf %162 : vector<16x8xf32> to vector<16x8xbf16>
    %c0_107 = arith.constant 0 : index
    %c3_108 = arith.constant 3 : index
    %c0_109 = arith.constant 0 : index
    %c0_110 = arith.constant 0 : index
    %164 = vector.load %arg7[%c0_107, %c3_108, %c0_109, %c0_110] : memref<2x6x8x48xbf16, #tpu.memory_space<vmem>>, vector<1x1x8x48xbf16>
    %165 = vector.shape_cast %164 : vector<1x1x8x48xbf16> to vector<8x48xbf16>
    %cst_111 = arith.constant dense<0.000000e+00> : vector<16x48xf32>
    %166 = tpu.matmul %163, %165, %cst_111 {dimension_numbers = #tpu.dot_dimension_numbers<[1], [0], [0], [1], [0, 0, 1, 1], [], []>} : vector<16x8xbf16>, vector<8x48xbf16>, vector<16x48xf32> -> vector<16x48xf32>
    %167 = arith.addf %134, %166 : vector<16x48xf32>
    %c0_112 = arith.constant 0 : index
    %c4 = arith.constant 4 : index
    %c0_113 = arith.constant 0 : index
    %c0_114 = arith.constant 0 : index
    %168 = vector.load %arg4[%c0_112, %c4, %c0_113, %c0_114] : memref<2x6x48x8xbf16, #tpu.memory_space<vmem>>, vector<1x1x48x8xbf16>
    %169 = vector.shape_cast %168 : vector<1x1x48x8xbf16> to vector<48x8xbf16>
    %cst_115 = arith.constant dense<0.000000e+00> : vector<16x8xf32>
    %170 = tpu.matmul %34, %169, %cst_115 {dimension_numbers = #tpu.dot_dimension_numbers<[1], [0], [0], [1], [0, 0, 1, 1], [], []>} : vector<16x48xbf16>, vector<48x8xbf16>, vector<16x8xf32> -> vector<16x8xf32>
    %c0_116 = arith.constant 0 : index
    %c4_117 = arith.constant 4 : index
    %c0_118 = arith.constant 0 : index
    %c0_119 = arith.constant 0 : index
    %171 = vector.load %arg5[%c0_116, %c4_117, %c0_118, %c0_119] : memref<2x6x48x8xbf16, #tpu.memory_space<vmem>>, vector<1x1x48x8xbf16>
    %172 = vector.shape_cast %171 : vector<1x1x48x8xbf16> to vector<48x8xbf16>
    %cst_120 = arith.constant dense<0.000000e+00> : vector<16x8xf32>
    %173 = tpu.matmul %34, %172, %cst_120 {dimension_numbers = #tpu.dot_dimension_numbers<[1], [0], [0], [1], [0, 0, 1, 1], [], []>} : vector<16x48xbf16>, vector<48x8xbf16>, vector<16x8xf32> -> vector<16x8xf32>
    %c0_121 = arith.constant 0 : index
    %c4_122 = arith.constant 4 : index
    %c0_123 = arith.constant 0 : index
    %c0_124 = arith.constant 0 : index
    %174 = vector.load %arg6[%c0_121, %c4_122, %c0_123, %c0_124] : memref<2x6x48x8xbf16, #tpu.memory_space<vmem>>, vector<1x1x48x8xbf16>
    %175 = vector.shape_cast %174 : vector<1x1x48x8xbf16> to vector<48x8xbf16>
    %cst_125 = arith.constant dense<0.000000e+00> : vector<16x8xf32>
    %176 = tpu.matmul %34, %175, %cst_125 {dimension_numbers = #tpu.dot_dimension_numbers<[1], [0], [0], [1], [0, 0, 1, 1], [], []>} : vector<16x48xbf16>, vector<48x8xbf16>, vector<16x8xf32> -> vector<16x8xf32>
    %177 = arith.truncf %176 : vector<16x8xf32> to vector<16x8xbf16>
    %178 = arith.truncf %170 : vector<16x8xf32> to vector<16x8xbf16>
    %179 = arith.truncf %173 : vector<16x8xf32> to vector<16x8xbf16>
    %cst_126 = arith.constant dense<0.000000e+00> : vector<16x16xf32>
    %180 = tpu.matmul %178, %179, %cst_126 {dimension_numbers = #tpu.dot_dimension_numbers<[1], [1], [0], [0], [0, 0, 1, 0], [], []>} : vector<16x8xbf16>, vector<16x8xbf16>, vector<16x16xf32> -> vector<16x16xf32>
    %cst_127 = arith.constant 0.144337565 : f32
    %181 = vector.broadcast %cst_127 : f32 to vector<16x16xf32>
    %182 = arith.mulf %180, %181 : vector<16x16xf32>
    %183 = arith.addf %182, %7 : vector<16x16xf32>
    %cst_128 = arith.constant dense<0xFF800000> : vector<16xf32>
    %184 = vector.multi_reduction <maximumf>, %183, %cst_128 [1] : vector<16x16xf32> to vector<16xf32>
    %185 = vector.shape_cast %184 : vector<16xf32> to vector<16x1xf32>
    %186 = vector.broadcast %185 : vector<16x1xf32> to vector<16x16xf32>
    %187 = arith.subf %183, %186 : vector<16x16xf32>
    %188 = math.exp %187 : vector<16x16xf32>
    %cst_129 = arith.constant dense<0.000000e+00> : vector<16xf32>
    %189 = vector.multi_reduction <add>, %188, %cst_129 [1] : vector<16x16xf32> to vector<16xf32>
    %190 = vector.shape_cast %189 : vector<16xf32> to vector<16x1xf32>
    %191 = tpu.reciprocal %190 {approx = true} : vector<16x1xf32> -> vector<16x1xf32>
    %192 = vector.broadcast %191 : vector<16x1xf32> to vector<16x16xf32>
    %193 = arith.mulf %188, %192 : vector<16x16xf32>
    %194 = arith.truncf %193 : vector<16x16xf32> to vector<16x16xbf16>
    %cst_130 = arith.constant dense<0.000000e+00> : vector<16x8xf32>
    %195 = tpu.matmul %194, %177, %cst_130 {dimension_numbers = #tpu.dot_dimension_numbers<[1], [0], [0], [1], [0, 0, 1, 1], [], []>} : vector<16x16xbf16>, vector<16x8xbf16>, vector<16x8xf32> -> vector<16x8xf32>
    %196 = arith.truncf %195 : vector<16x8xf32> to vector<16x8xbf16>
    %c0_131 = arith.constant 0 : index
    %c4_132 = arith.constant 4 : index
    %c0_133 = arith.constant 0 : index
    %c0_134 = arith.constant 0 : index
    %197 = vector.load %arg7[%c0_131, %c4_132, %c0_133, %c0_134] : memref<2x6x8x48xbf16, #tpu.memory_space<vmem>>, vector<1x1x8x48xbf16>
    %198 = vector.shape_cast %197 : vector<1x1x8x48xbf16> to vector<8x48xbf16>
    %cst_135 = arith.constant dense<0.000000e+00> : vector<16x48xf32>
    %199 = tpu.matmul %196, %198, %cst_135 {dimension_numbers = #tpu.dot_dimension_numbers<[1], [0], [0], [1], [0, 0, 1, 1], [], []>} : vector<16x8xbf16>, vector<8x48xbf16>, vector<16x48xf32> -> vector<16x48xf32>
    %200 = arith.addf %167, %199 : vector<16x48xf32>
    %c0_136 = arith.constant 0 : index
    %c5 = arith.constant 5 : index
    %c0_137 = arith.constant 0 : index
    %c0_138 = arith.constant 0 : index
    %201 = vector.load %arg4[%c0_136, %c5, %c0_137, %c0_138] : memref<2x6x48x8xbf16, #tpu.memory_space<vmem>>, vector<1x1x48x8xbf16>
    %202 = vector.shape_cast %201 : vector<1x1x48x8xbf16> to vector<48x8xbf16>
    %cst_139 = arith.constant dense<0.000000e+00> : vector<16x8xf32>
    %203 = tpu.matmul %34, %202, %cst_139 {dimension_numbers = #tpu.dot_dimension_numbers<[1], [0], [0], [1], [0, 0, 1, 1], [], []>} : vector<16x48xbf16>, vector<48x8xbf16>, vector<16x8xf32> -> vector<16x8xf32>
    %c0_140 = arith.constant 0 : index
    %c5_141 = arith.constant 5 : index
    %c0_142 = arith.constant 0 : index
    %c0_143 = arith.constant 0 : index
    %204 = vector.load %arg5[%c0_140, %c5_141, %c0_142, %c0_143] : memref<2x6x48x8xbf16, #tpu.memory_space<vmem>>, vector<1x1x48x8xbf16>
    %205 = vector.shape_cast %204 : vector<1x1x48x8xbf16> to vector<48x8xbf16>
    %cst_144 = arith.constant dense<0.000000e+00> : vector<16x8xf32>
    %206 = tpu.matmul %34, %205, %cst_144 {dimension_numbers = #tpu.dot_dimension_numbers<[1], [0], [0], [1], [0, 0, 1, 1], [], []>} : vector<16x48xbf16>, vector<48x8xbf16>, vector<16x8xf32> -> vector<16x8xf32>
    %c0_145 = arith.constant 0 : index
    %c5_146 = arith.constant 5 : index
    %c0_147 = arith.constant 0 : index
    %c0_148 = arith.constant 0 : index
    %207 = vector.load %arg6[%c0_145, %c5_146, %c0_147, %c0_148] : memref<2x6x48x8xbf16, #tpu.memory_space<vmem>>, vector<1x1x48x8xbf16>
    %208 = vector.shape_cast %207 : vector<1x1x48x8xbf16> to vector<48x8xbf16>
    %cst_149 = arith.constant dense<0.000000e+00> : vector<16x8xf32>
    %209 = tpu.matmul %34, %208, %cst_149 {dimension_numbers = #tpu.dot_dimension_numbers<[1], [0], [0], [1], [0, 0, 1, 1], [], []>} : vector<16x48xbf16>, vector<48x8xbf16>, vector<16x8xf32> -> vector<16x8xf32>
    %210 = arith.truncf %209 : vector<16x8xf32> to vector<16x8xbf16>
    %211 = arith.truncf %203 : vector<16x8xf32> to vector<16x8xbf16>
    %212 = arith.truncf %206 : vector<16x8xf32> to vector<16x8xbf16>
    %cst_150 = arith.constant dense<0.000000e+00> : vector<16x16xf32>
    %213 = tpu.matmul %211, %212, %cst_150 {dimension_numbers = #tpu.dot_dimension_numbers<[1], [1], [0], [0], [0, 0, 1, 0], [], []>} : vector<16x8xbf16>, vector<16x8xbf16>, vector<16x16xf32> -> vector<16x16xf32>
    %cst_151 = arith.constant 0.144337565 : f32
    %214 = vector.broadcast %cst_151 : f32 to vector<16x16xf32>
    %215 = arith.mulf %213, %214 : vector<16x16xf32>
    %216 = arith.addf %215, %7 : vector<16x16xf32>
    %cst_152 = arith.constant dense<0xFF800000> : vector<16xf32>
    %217 = vector.multi_reduction <maximumf>, %216, %cst_152 [1] : vector<16x16xf32> to vector<16xf32>
    %218 = vector.shape_cast %217 : vector<16xf32> to vector<16x1xf32>
    %219 = vector.broadcast %218 : vector<16x1xf32> to vector<16x16xf32>
    %220 = arith.subf %216, %219 : vector<16x16xf32>
    %221 = math.exp %220 : vector<16x16xf32>
    %cst_153 = arith.constant dense<0.000000e+00> : vector<16xf32>
    %222 = vector.multi_reduction <add>, %221, %cst_153 [1] : vector<16x16xf32> to vector<16xf32>
    %223 = vector.shape_cast %222 : vector<16xf32> to vector<16x1xf32>
    %224 = tpu.reciprocal %223 {approx = true} : vector<16x1xf32> -> vector<16x1xf32>
    %225 = vector.broadcast %224 : vector<16x1xf32> to vector<16x16xf32>
    %226 = arith.mulf %221, %225 : vector<16x16xf32>
    %227 = arith.truncf %226 : vector<16x16xf32> to vector<16x16xbf16>
    %cst_154 = arith.constant dense<0.000000e+00> : vector<16x8xf32>
    %228 = tpu.matmul %227, %210, %cst_154 {dimension_numbers = #tpu.dot_dimension_numbers<[1], [0], [0], [1], [0, 0, 1, 1], [], []>} : vector<16x16xbf16>, vector<16x8xbf16>, vector<16x8xf32> -> vector<16x8xf32>
    %229 = arith.truncf %228 : vector<16x8xf32> to vector<16x8xbf16>
    %c0_155 = arith.constant 0 : index
    %c5_156 = arith.constant 5 : index
    %c0_157 = arith.constant 0 : index
    %c0_158 = arith.constant 0 : index
    %230 = vector.load %arg7[%c0_155, %c5_156, %c0_157, %c0_158] : memref<2x6x8x48xbf16, #tpu.memory_space<vmem>>, vector<1x1x8x48xbf16>
    %231 = vector.shape_cast %230 : vector<1x1x8x48xbf16> to vector<8x48xbf16>
    %cst_159 = arith.constant dense<0.000000e+00> : vector<16x48xf32>
    %232 = tpu.matmul %229, %231, %cst_159 {dimension_numbers = #tpu.dot_dimension_numbers<[1], [0], [0], [1], [0, 0, 1, 1], [], []>} : vector<16x8xbf16>, vector<8x48xbf16>, vector<16x48xf32> -> vector<16x48xf32>
    %233 = arith.addf %200, %232 : vector<16x48xf32>
    %234 = arith.addf %1, %233 : vector<16x48xf32>
    %c0_160 = arith.constant 0 : index
    %c0_161 = arith.constant 0 : index
    %c0_162 = arith.constant 0 : index
    %235 = vector.load %arg8[%c0_160, %c0_161, %c0_162] : memref<2x1x48xf32, #tpu.memory_space<vmem>>, vector<1x1x48xf32>
    %236 = vector.shape_cast %235 : vector<1x1x48xf32> to vector<1x48xf32>
    %237 = vector.broadcast %236 : vector<1x48xf32> to vector<16x48xf32>
    %238 = arith.addf %234, %237 : vector<16x48xf32>
    %c0_163 = arith.constant 0 : index
    %c0_164 = arith.constant 0 : index
    %c0_165 = arith.constant 0 : index
    %239 = vector.load %arg9[%c0_163, %c0_164, %c0_165] : memref<2x1x48xf32, #tpu.memory_space<vmem>>, vector<1x1x48xf32>
    %240 = vector.shape_cast %239 : vector<1x1x48xf32> to vector<1x48xf32>
    %c0_166 = arith.constant 0 : index
    %c0_167 = arith.constant 0 : index
    %c0_168 = arith.constant 0 : index
    %241 = vector.load %arg10[%c0_166, %c0_167, %c0_168] : memref<2x1x48xf32, #tpu.memory_space<vmem>>, vector<1x1x48xf32>
    %242 = vector.shape_cast %241 : vector<1x1x48xf32> to vector<1x48xf32>
    %cst_169 = arith.constant dense<0.000000e+00> : vector<16xf32>
    %243 = vector.multi_reduction <add>, %238, %cst_169 [1] : vector<16x48xf32> to vector<16xf32>
    %244 = vector.shape_cast %243 : vector<16xf32> to vector<16x1xf32>
    %cst_170 = arith.constant 4.800000e+01 : f32
    %245 = vector.broadcast %cst_170 : f32 to vector<16x1xf32>
    %246 = arith.divf %244, %245 : vector<16x1xf32>
    %247 = vector.broadcast %246 : vector<16x1xf32> to vector<16x48xf32>
    %248 = arith.subf %238, %247 : vector<16x48xf32>
    %249 = arith.mulf %248, %248 : vector<16x48xf32>
    %cst_171 = arith.constant dense<0.000000e+00> : vector<16xf32>
    %250 = vector.multi_reduction <add>, %249, %cst_171 [1] : vector<16x48xf32> to vector<16xf32>
    %251 = vector.shape_cast %250 : vector<16xf32> to vector<16x1xf32>
    %cst_172 = arith.constant 4.800000e+01 : f32
    %252 = vector.broadcast %cst_172 : f32 to vector<16x1xf32>
    %253 = arith.divf %251, %252 : vector<16x1xf32>
    %254 = vector.broadcast %246 : vector<16x1xf32> to vector<16x48xf32>
    %255 = arith.subf %238, %254 : vector<16x48xf32>
    %cst_173 = arith.constant 9.99999974E-6 : f32
    %256 = vector.broadcast %cst_173 : f32 to vector<16x1xf32>
    %257 = arith.addf %253, %256 : vector<16x1xf32>
    %258 = math.rsqrt %257 : vector<16x1xf32>
    %259 = vector.broadcast %258 : vector<16x1xf32> to vector<16x48xf32>
    %260 = arith.mulf %255, %259 : vector<16x48xf32>
    %261 = vector.broadcast %240 : vector<1x48xf32> to vector<16x48xf32>
    %262 = arith.mulf %260, %261 : vector<16x48xf32>
    %263 = vector.broadcast %242 : vector<1x48xf32> to vector<16x48xf32>
    %264 = arith.addf %262, %263 : vector<16x48xf32>
    %265 = arith.truncf %264 : vector<16x48xf32> to vector<16x48xbf16>
    %c0_174 = arith.constant 0 : index
    %c0_175 = arith.constant 0 : index
    %c0_176 = arith.constant 0 : index
    %266 = vector.load %arg11[%c0_174, %c0_175, %c0_176] : memref<2x48x192xbf16, #tpu.memory_space<vmem>>, vector<1x48x192xbf16>
    %267 = vector.shape_cast %266 : vector<1x48x192xbf16> to vector<48x192xbf16>
    %cst_177 = arith.constant dense<0.000000e+00> : vector<16x192xf32>
    %268 = tpu.matmul %265, %267, %cst_177 {dimension_numbers = #tpu.dot_dimension_numbers<[1], [0], [0], [1], [0, 0, 1, 1], [], []>} : vector<16x48xbf16>, vector<48x192xbf16>, vector<16x192xf32> -> vector<16x192xf32>
    %c0_178 = arith.constant 0 : index
    %c0_179 = arith.constant 0 : index
    %c0_180 = arith.constant 0 : index
    %269 = vector.load %arg12[%c0_178, %c0_179, %c0_180] : memref<2x1x192xf32, #tpu.memory_space<vmem>>, vector<1x1x192xf32>
    %270 = vector.shape_cast %269 : vector<1x1x192xf32> to vector<1x192xf32>
    %271 = vector.broadcast %270 : vector<1x192xf32> to vector<16x192xf32>
    %272 = arith.addf %268, %271 : vector<16x192xf32>
    %cst_181 = arith.constant 0.000000e+00 : f32
    %273 = vector.broadcast %cst_181 : f32 to vector<16x192xf32>
    %274 = arith.maximumf %272, %273 : vector<16x192xf32>
    %275 = arith.truncf %274 : vector<16x192xf32> to vector<16x192xbf16>
    %c0_182 = arith.constant 0 : index
    %c0_183 = arith.constant 0 : index
    %c0_184 = arith.constant 0 : index
    %276 = vector.load %arg13[%c0_182, %c0_183, %c0_184] : memref<2x192x48xbf16, #tpu.memory_space<vmem>>, vector<1x192x48xbf16>
    %277 = vector.shape_cast %276 : vector<1x192x48xbf16> to vector<192x48xbf16>
    %cst_185 = arith.constant dense<0.000000e+00> : vector<16x48xf32>
    %278 = tpu.matmul %275, %277, %cst_185 {dimension_numbers = #tpu.dot_dimension_numbers<[1], [0], [0], [1], [0, 0, 1, 1], [], []>} : vector<16x192xbf16>, vector<192x48xbf16>, vector<16x48xf32> -> vector<16x48xf32>
    %279 = arith.addf %238, %278 : vector<16x48xf32>
    %c0_186 = arith.constant 0 : index
    %c0_187 = arith.constant 0 : index
    %c0_188 = arith.constant 0 : index
    %280 = vector.load %arg14[%c0_186, %c0_187, %c0_188] : memref<2x1x48xf32, #tpu.memory_space<vmem>>, vector<1x1x48xf32>
    %281 = vector.shape_cast %280 : vector<1x1x48xf32> to vector<1x48xf32>
    %282 = vector.broadcast %281 : vector<1x48xf32> to vector<16x48xf32>
    %283 = arith.addf %279, %282 : vector<16x48xf32>
    %c1_189 = arith.constant 1 : index
    %c0_190 = arith.constant 0 : index
    %c0_191 = arith.constant 0 : index
    %284 = vector.load %arg2[%c1_189, %c0_190, %c0_191] : memref<2x1x48xf32, #tpu.memory_space<vmem>>, vector<1x1x48xf32>
    %285 = vector.shape_cast %284 : vector<1x1x48xf32> to vector<1x48xf32>
    %c1_192 = arith.constant 1 : index
    %c0_193 = arith.constant 0 : index
    %c0_194 = arith.constant 0 : index
    %286 = vector.load %arg3[%c1_192, %c0_193, %c0_194] : memref<2x1x48xf32, #tpu.memory_space<vmem>>, vector<1x1x48xf32>
    %287 = vector.shape_cast %286 : vector<1x1x48xf32> to vector<1x48xf32>
    %cst_195 = arith.constant dense<0.000000e+00> : vector<16xf32>
    %288 = vector.multi_reduction <add>, %283, %cst_195 [1] : vector<16x48xf32> to vector<16xf32>
    %289 = vector.shape_cast %288 : vector<16xf32> to vector<16x1xf32>
    %cst_196 = arith.constant 4.800000e+01 : f32
    %290 = vector.broadcast %cst_196 : f32 to vector<16x1xf32>
    %291 = arith.divf %289, %290 : vector<16x1xf32>
    %292 = vector.broadcast %291 : vector<16x1xf32> to vector<16x48xf32>
    %293 = arith.subf %283, %292 : vector<16x48xf32>
    %294 = arith.mulf %293, %293 : vector<16x48xf32>
    %cst_197 = arith.constant dense<0.000000e+00> : vector<16xf32>
    %295 = vector.multi_reduction <add>, %294, %cst_197 [1] : vector<16x48xf32> to vector<16xf32>
    %296 = vector.shape_cast %295 : vector<16xf32> to vector<16x1xf32>
    %cst_198 = arith.constant 4.800000e+01 : f32
    %297 = vector.broadcast %cst_198 : f32 to vector<16x1xf32>
    %298 = arith.divf %296, %297 : vector<16x1xf32>
    %299 = vector.broadcast %291 : vector<16x1xf32> to vector<16x48xf32>
    %300 = arith.subf %283, %299 : vector<16x48xf32>
    %cst_199 = arith.constant 9.99999974E-6 : f32
    %301 = vector.broadcast %cst_199 : f32 to vector<16x1xf32>
    %302 = arith.addf %298, %301 : vector<16x1xf32>
    %303 = math.rsqrt %302 : vector<16x1xf32>
    %304 = vector.broadcast %303 : vector<16x1xf32> to vector<16x48xf32>
    %305 = arith.mulf %300, %304 : vector<16x48xf32>
    %306 = vector.broadcast %285 : vector<1x48xf32> to vector<16x48xf32>
    %307 = arith.mulf %305, %306 : vector<16x48xf32>
    %308 = vector.broadcast %287 : vector<1x48xf32> to vector<16x48xf32>
    %309 = arith.addf %307, %308 : vector<16x48xf32>
    %310 = arith.truncf %309 : vector<16x48xf32> to vector<16x48xbf16>
    %cst_200 = arith.constant 0.000000e+00 : f32
    %311 = vector.broadcast %cst_200 : f32 to vector<16x48xf32>
    %c1_201 = arith.constant 1 : index
    %c0_202 = arith.constant 0 : index
    %c0_203 = arith.constant 0 : index
    %c0_204 = arith.constant 0 : index
    %312 = vector.load %arg4[%c1_201, %c0_202, %c0_203, %c0_204] : memref<2x6x48x8xbf16, #tpu.memory_space<vmem>>, vector<1x1x48x8xbf16>
    %313 = vector.shape_cast %312 : vector<1x1x48x8xbf16> to vector<48x8xbf16>
    %cst_205 = arith.constant dense<0.000000e+00> : vector<16x8xf32>
    %314 = tpu.matmul %310, %313, %cst_205 {dimension_numbers = #tpu.dot_dimension_numbers<[1], [0], [0], [1], [0, 0, 1, 1], [], []>} : vector<16x48xbf16>, vector<48x8xbf16>, vector<16x8xf32> -> vector<16x8xf32>
    %c1_206 = arith.constant 1 : index
    %c0_207 = arith.constant 0 : index
    %c0_208 = arith.constant 0 : index
    %c0_209 = arith.constant 0 : index
    %315 = vector.load %arg5[%c1_206, %c0_207, %c0_208, %c0_209] : memref<2x6x48x8xbf16, #tpu.memory_space<vmem>>, vector<1x1x48x8xbf16>
    %316 = vector.shape_cast %315 : vector<1x1x48x8xbf16> to vector<48x8xbf16>
    %cst_210 = arith.constant dense<0.000000e+00> : vector<16x8xf32>
    %317 = tpu.matmul %310, %316, %cst_210 {dimension_numbers = #tpu.dot_dimension_numbers<[1], [0], [0], [1], [0, 0, 1, 1], [], []>} : vector<16x48xbf16>, vector<48x8xbf16>, vector<16x8xf32> -> vector<16x8xf32>
    %c1_211 = arith.constant 1 : index
    %c0_212 = arith.constant 0 : index
    %c0_213 = arith.constant 0 : index
    %c0_214 = arith.constant 0 : index
    %318 = vector.load %arg6[%c1_211, %c0_212, %c0_213, %c0_214] : memref<2x6x48x8xbf16, #tpu.memory_space<vmem>>, vector<1x1x48x8xbf16>
    %319 = vector.shape_cast %318 : vector<1x1x48x8xbf16> to vector<48x8xbf16>
    %cst_215 = arith.constant dense<0.000000e+00> : vector<16x8xf32>
    %320 = tpu.matmul %310, %319, %cst_215 {dimension_numbers = #tpu.dot_dimension_numbers<[1], [0], [0], [1], [0, 0, 1, 1], [], []>} : vector<16x48xbf16>, vector<48x8xbf16>, vector<16x8xf32> -> vector<16x8xf32>
    %321 = arith.truncf %320 : vector<16x8xf32> to vector<16x8xbf16>
    %322 = arith.truncf %314 : vector<16x8xf32> to vector<16x8xbf16>
    %323 = arith.truncf %317 : vector<16x8xf32> to vector<16x8xbf16>
    %cst_216 = arith.constant dense<0.000000e+00> : vector<16x16xf32>
    %324 = tpu.matmul %322, %323, %cst_216 {dimension_numbers = #tpu.dot_dimension_numbers<[1], [1], [0], [0], [0, 0, 1, 0], [], []>} : vector<16x8xbf16>, vector<16x8xbf16>, vector<16x16xf32> -> vector<16x16xf32>
    %cst_217 = arith.constant 0.144337565 : f32
    %325 = vector.broadcast %cst_217 : f32 to vector<16x16xf32>
    %326 = arith.mulf %324, %325 : vector<16x16xf32>
    %327 = arith.addf %326, %7 : vector<16x16xf32>
    %cst_218 = arith.constant dense<0xFF800000> : vector<16xf32>
    %328 = vector.multi_reduction <maximumf>, %327, %cst_218 [1] : vector<16x16xf32> to vector<16xf32>
    %329 = vector.shape_cast %328 : vector<16xf32> to vector<16x1xf32>
    %330 = vector.broadcast %329 : vector<16x1xf32> to vector<16x16xf32>
    %331 = arith.subf %327, %330 : vector<16x16xf32>
    %332 = math.exp %331 : vector<16x16xf32>
    %cst_219 = arith.constant dense<0.000000e+00> : vector<16xf32>
    %333 = vector.multi_reduction <add>, %332, %cst_219 [1] : vector<16x16xf32> to vector<16xf32>
    %334 = vector.shape_cast %333 : vector<16xf32> to vector<16x1xf32>
    %335 = tpu.reciprocal %334 {approx = true} : vector<16x1xf32> -> vector<16x1xf32>
    %336 = vector.broadcast %335 : vector<16x1xf32> to vector<16x16xf32>
    %337 = arith.mulf %332, %336 : vector<16x16xf32>
    %338 = arith.truncf %337 : vector<16x16xf32> to vector<16x16xbf16>
    %cst_220 = arith.constant dense<0.000000e+00> : vector<16x8xf32>
    %339 = tpu.matmul %338, %321, %cst_220 {dimension_numbers = #tpu.dot_dimension_numbers<[1], [0], [0], [1], [0, 0, 1, 1], [], []>} : vector<16x16xbf16>, vector<16x8xbf16>, vector<16x8xf32> -> vector<16x8xf32>
    %340 = arith.truncf %339 : vector<16x8xf32> to vector<16x8xbf16>
    %c1_221 = arith.constant 1 : index
    %c0_222 = arith.constant 0 : index
    %c0_223 = arith.constant 0 : index
    %c0_224 = arith.constant 0 : index
    %341 = vector.load %arg7[%c1_221, %c0_222, %c0_223, %c0_224] : memref<2x6x8x48xbf16, #tpu.memory_space<vmem>>, vector<1x1x8x48xbf16>
    %342 = vector.shape_cast %341 : vector<1x1x8x48xbf16> to vector<8x48xbf16>
    %cst_225 = arith.constant dense<0.000000e+00> : vector<16x48xf32>
    %343 = tpu.matmul %340, %342, %cst_225 {dimension_numbers = #tpu.dot_dimension_numbers<[1], [0], [0], [1], [0, 0, 1, 1], [], []>} : vector<16x8xbf16>, vector<8x48xbf16>, vector<16x48xf32> -> vector<16x48xf32>
    %344 = arith.addf %311, %343 : vector<16x48xf32>
    %c1_226 = arith.constant 1 : index
    %c1_227 = arith.constant 1 : index
    %c0_228 = arith.constant 0 : index
    %c0_229 = arith.constant 0 : index
    %345 = vector.load %arg4[%c1_226, %c1_227, %c0_228, %c0_229] : memref<2x6x48x8xbf16, #tpu.memory_space<vmem>>, vector<1x1x48x8xbf16>
    %346 = vector.shape_cast %345 : vector<1x1x48x8xbf16> to vector<48x8xbf16>
    %cst_230 = arith.constant dense<0.000000e+00> : vector<16x8xf32>
    %347 = tpu.matmul %310, %346, %cst_230 {dimension_numbers = #tpu.dot_dimension_numbers<[1], [0], [0], [1], [0, 0, 1, 1], [], []>} : vector<16x48xbf16>, vector<48x8xbf16>, vector<16x8xf32> -> vector<16x8xf32>
    %c1_231 = arith.constant 1 : index
    %c1_232 = arith.constant 1 : index
    %c0_233 = arith.constant 0 : index
    %c0_234 = arith.constant 0 : index
    %348 = vector.load %arg5[%c1_231, %c1_232, %c0_233, %c0_234] : memref<2x6x48x8xbf16, #tpu.memory_space<vmem>>, vector<1x1x48x8xbf16>
    %349 = vector.shape_cast %348 : vector<1x1x48x8xbf16> to vector<48x8xbf16>
    %cst_235 = arith.constant dense<0.000000e+00> : vector<16x8xf32>
    %350 = tpu.matmul %310, %349, %cst_235 {dimension_numbers = #tpu.dot_dimension_numbers<[1], [0], [0], [1], [0, 0, 1, 1], [], []>} : vector<16x48xbf16>, vector<48x8xbf16>, vector<16x8xf32> -> vector<16x8xf32>
    %c1_236 = arith.constant 1 : index
    %c1_237 = arith.constant 1 : index
    %c0_238 = arith.constant 0 : index
    %c0_239 = arith.constant 0 : index
    %351 = vector.load %arg6[%c1_236, %c1_237, %c0_238, %c0_239] : memref<2x6x48x8xbf16, #tpu.memory_space<vmem>>, vector<1x1x48x8xbf16>
    %352 = vector.shape_cast %351 : vector<1x1x48x8xbf16> to vector<48x8xbf16>
    %cst_240 = arith.constant dense<0.000000e+00> : vector<16x8xf32>
    %353 = tpu.matmul %310, %352, %cst_240 {dimension_numbers = #tpu.dot_dimension_numbers<[1], [0], [0], [1], [0, 0, 1, 1], [], []>} : vector<16x48xbf16>, vector<48x8xbf16>, vector<16x8xf32> -> vector<16x8xf32>
    %354 = arith.truncf %353 : vector<16x8xf32> to vector<16x8xbf16>
    %355 = arith.truncf %347 : vector<16x8xf32> to vector<16x8xbf16>
    %356 = arith.truncf %350 : vector<16x8xf32> to vector<16x8xbf16>
    %cst_241 = arith.constant dense<0.000000e+00> : vector<16x16xf32>
    %357 = tpu.matmul %355, %356, %cst_241 {dimension_numbers = #tpu.dot_dimension_numbers<[1], [1], [0], [0], [0, 0, 1, 0], [], []>} : vector<16x8xbf16>, vector<16x8xbf16>, vector<16x16xf32> -> vector<16x16xf32>
    %cst_242 = arith.constant 0.144337565 : f32
    %358 = vector.broadcast %cst_242 : f32 to vector<16x16xf32>
    %359 = arith.mulf %357, %358 : vector<16x16xf32>
    %360 = arith.addf %359, %7 : vector<16x16xf32>
    %cst_243 = arith.constant dense<0xFF800000> : vector<16xf32>
    %361 = vector.multi_reduction <maximumf>, %360, %cst_243 [1] : vector<16x16xf32> to vector<16xf32>
    %362 = vector.shape_cast %361 : vector<16xf32> to vector<16x1xf32>
    %363 = vector.broadcast %362 : vector<16x1xf32> to vector<16x16xf32>
    %364 = arith.subf %360, %363 : vector<16x16xf32>
    %365 = math.exp %364 : vector<16x16xf32>
    %cst_244 = arith.constant dense<0.000000e+00> : vector<16xf32>
    %366 = vector.multi_reduction <add>, %365, %cst_244 [1] : vector<16x16xf32> to vector<16xf32>
    %367 = vector.shape_cast %366 : vector<16xf32> to vector<16x1xf32>
    %368 = tpu.reciprocal %367 {approx = true} : vector<16x1xf32> -> vector<16x1xf32>
    %369 = vector.broadcast %368 : vector<16x1xf32> to vector<16x16xf32>
    %370 = arith.mulf %365, %369 : vector<16x16xf32>
    %371 = arith.truncf %370 : vector<16x16xf32> to vector<16x16xbf16>
    %cst_245 = arith.constant dense<0.000000e+00> : vector<16x8xf32>
    %372 = tpu.matmul %371, %354, %cst_245 {dimension_numbers = #tpu.dot_dimension_numbers<[1], [0], [0], [1], [0, 0, 1, 1], [], []>} : vector<16x16xbf16>, vector<16x8xbf16>, vector<16x8xf32> -> vector<16x8xf32>
    %373 = arith.truncf %372 : vector<16x8xf32> to vector<16x8xbf16>
    %c1_246 = arith.constant 1 : index
    %c1_247 = arith.constant 1 : index
    %c0_248 = arith.constant 0 : index
    %c0_249 = arith.constant 0 : index
    %374 = vector.load %arg7[%c1_246, %c1_247, %c0_248, %c0_249] : memref<2x6x8x48xbf16, #tpu.memory_space<vmem>>, vector<1x1x8x48xbf16>
    %375 = vector.shape_cast %374 : vector<1x1x8x48xbf16> to vector<8x48xbf16>
    %cst_250 = arith.constant dense<0.000000e+00> : vector<16x48xf32>
    %376 = tpu.matmul %373, %375, %cst_250 {dimension_numbers = #tpu.dot_dimension_numbers<[1], [0], [0], [1], [0, 0, 1, 1], [], []>} : vector<16x8xbf16>, vector<8x48xbf16>, vector<16x48xf32> -> vector<16x48xf32>
    %377 = arith.addf %344, %376 : vector<16x48xf32>
    %c1_251 = arith.constant 1 : index
    %c2_252 = arith.constant 2 : index
    %c0_253 = arith.constant 0 : index
    %c0_254 = arith.constant 0 : index
    %378 = vector.load %arg4[%c1_251, %c2_252, %c0_253, %c0_254] : memref<2x6x48x8xbf16, #tpu.memory_space<vmem>>, vector<1x1x48x8xbf16>
    %379 = vector.shape_cast %378 : vector<1x1x48x8xbf16> to vector<48x8xbf16>
    %cst_255 = arith.constant dense<0.000000e+00> : vector<16x8xf32>
    %380 = tpu.matmul %310, %379, %cst_255 {dimension_numbers = #tpu.dot_dimension_numbers<[1], [0], [0], [1], [0, 0, 1, 1], [], []>} : vector<16x48xbf16>, vector<48x8xbf16>, vector<16x8xf32> -> vector<16x8xf32>
    %c1_256 = arith.constant 1 : index
    %c2_257 = arith.constant 2 : index
    %c0_258 = arith.constant 0 : index
    %c0_259 = arith.constant 0 : index
    %381 = vector.load %arg5[%c1_256, %c2_257, %c0_258, %c0_259] : memref<2x6x48x8xbf16, #tpu.memory_space<vmem>>, vector<1x1x48x8xbf16>
    %382 = vector.shape_cast %381 : vector<1x1x48x8xbf16> to vector<48x8xbf16>
    %cst_260 = arith.constant dense<0.000000e+00> : vector<16x8xf32>
    %383 = tpu.matmul %310, %382, %cst_260 {dimension_numbers = #tpu.dot_dimension_numbers<[1], [0], [0], [1], [0, 0, 1, 1], [], []>} : vector<16x48xbf16>, vector<48x8xbf16>, vector<16x8xf32> -> vector<16x8xf32>
    %c1_261 = arith.constant 1 : index
    %c2_262 = arith.constant 2 : index
    %c0_263 = arith.constant 0 : index
    %c0_264 = arith.constant 0 : index
    %384 = vector.load %arg6[%c1_261, %c2_262, %c0_263, %c0_264] : memref<2x6x48x8xbf16, #tpu.memory_space<vmem>>, vector<1x1x48x8xbf16>
    %385 = vector.shape_cast %384 : vector<1x1x48x8xbf16> to vector<48x8xbf16>
    %cst_265 = arith.constant dense<0.000000e+00> : vector<16x8xf32>
    %386 = tpu.matmul %310, %385, %cst_265 {dimension_numbers = #tpu.dot_dimension_numbers<[1], [0], [0], [1], [0, 0, 1, 1], [], []>} : vector<16x48xbf16>, vector<48x8xbf16>, vector<16x8xf32> -> vector<16x8xf32>
    %387 = arith.truncf %386 : vector<16x8xf32> to vector<16x8xbf16>
    %388 = arith.truncf %380 : vector<16x8xf32> to vector<16x8xbf16>
    %389 = arith.truncf %383 : vector<16x8xf32> to vector<16x8xbf16>
    %cst_266 = arith.constant dense<0.000000e+00> : vector<16x16xf32>
    %390 = tpu.matmul %388, %389, %cst_266 {dimension_numbers = #tpu.dot_dimension_numbers<[1], [1], [0], [0], [0, 0, 1, 0], [], []>} : vector<16x8xbf16>, vector<16x8xbf16>, vector<16x16xf32> -> vector<16x16xf32>
    %cst_267 = arith.constant 0.144337565 : f32
    %391 = vector.broadcast %cst_267 : f32 to vector<16x16xf32>
    %392 = arith.mulf %390, %391 : vector<16x16xf32>
    %393 = arith.addf %392, %7 : vector<16x16xf32>
    %cst_268 = arith.constant dense<0xFF800000> : vector<16xf32>
    %394 = vector.multi_reduction <maximumf>, %393, %cst_268 [1] : vector<16x16xf32> to vector<16xf32>
    %395 = vector.shape_cast %394 : vector<16xf32> to vector<16x1xf32>
    %396 = vector.broadcast %395 : vector<16x1xf32> to vector<16x16xf32>
    %397 = arith.subf %393, %396 : vector<16x16xf32>
    %398 = math.exp %397 : vector<16x16xf32>
    %cst_269 = arith.constant dense<0.000000e+00> : vector<16xf32>
    %399 = vector.multi_reduction <add>, %398, %cst_269 [1] : vector<16x16xf32> to vector<16xf32>
    %400 = vector.shape_cast %399 : vector<16xf32> to vector<16x1xf32>
    %401 = tpu.reciprocal %400 {approx = true} : vector<16x1xf32> -> vector<16x1xf32>
    %402 = vector.broadcast %401 : vector<16x1xf32> to vector<16x16xf32>
    %403 = arith.mulf %398, %402 : vector<16x16xf32>
    %404 = arith.truncf %403 : vector<16x16xf32> to vector<16x16xbf16>
    %cst_270 = arith.constant dense<0.000000e+00> : vector<16x8xf32>
    %405 = tpu.matmul %404, %387, %cst_270 {dimension_numbers = #tpu.dot_dimension_numbers<[1], [0], [0], [1], [0, 0, 1, 1], [], []>} : vector<16x16xbf16>, vector<16x8xbf16>, vector<16x8xf32> -> vector<16x8xf32>
    %406 = arith.truncf %405 : vector<16x8xf32> to vector<16x8xbf16>
    %c1_271 = arith.constant 1 : index
    %c2_272 = arith.constant 2 : index
    %c0_273 = arith.constant 0 : index
    %c0_274 = arith.constant 0 : index
    %407 = vector.load %arg7[%c1_271, %c2_272, %c0_273, %c0_274] : memref<2x6x8x48xbf16, #tpu.memory_space<vmem>>, vector<1x1x8x48xbf16>
    %408 = vector.shape_cast %407 : vector<1x1x8x48xbf16> to vector<8x48xbf16>
    %cst_275 = arith.constant dense<0.000000e+00> : vector<16x48xf32>
    %409 = tpu.matmul %406, %408, %cst_275 {dimension_numbers = #tpu.dot_dimension_numbers<[1], [0], [0], [1], [0, 0, 1, 1], [], []>} : vector<16x8xbf16>, vector<8x48xbf16>, vector<16x48xf32> -> vector<16x48xf32>
    %410 = arith.addf %377, %409 : vector<16x48xf32>
    %c1_276 = arith.constant 1 : index
    %c3_277 = arith.constant 3 : index
    %c0_278 = arith.constant 0 : index
    %c0_279 = arith.constant 0 : index
    %411 = vector.load %arg4[%c1_276, %c3_277, %c0_278, %c0_279] : memref<2x6x48x8xbf16, #tpu.memory_space<vmem>>, vector<1x1x48x8xbf16>
    %412 = vector.shape_cast %411 : vector<1x1x48x8xbf16> to vector<48x8xbf16>
    %cst_280 = arith.constant dense<0.000000e+00> : vector<16x8xf32>
    %413 = tpu.matmul %310, %412, %cst_280 {dimension_numbers = #tpu.dot_dimension_numbers<[1], [0], [0], [1], [0, 0, 1, 1], [], []>} : vector<16x48xbf16>, vector<48x8xbf16>, vector<16x8xf32> -> vector<16x8xf32>
    %c1_281 = arith.constant 1 : index
    %c3_282 = arith.constant 3 : index
    %c0_283 = arith.constant 0 : index
    %c0_284 = arith.constant 0 : index
    %414 = vector.load %arg5[%c1_281, %c3_282, %c0_283, %c0_284] : memref<2x6x48x8xbf16, #tpu.memory_space<vmem>>, vector<1x1x48x8xbf16>
    %415 = vector.shape_cast %414 : vector<1x1x48x8xbf16> to vector<48x8xbf16>
    %cst_285 = arith.constant dense<0.000000e+00> : vector<16x8xf32>
    %416 = tpu.matmul %310, %415, %cst_285 {dimension_numbers = #tpu.dot_dimension_numbers<[1], [0], [0], [1], [0, 0, 1, 1], [], []>} : vector<16x48xbf16>, vector<48x8xbf16>, vector<16x8xf32> -> vector<16x8xf32>
    %c1_286 = arith.constant 1 : index
    %c3_287 = arith.constant 3 : index
    %c0_288 = arith.constant 0 : index
    %c0_289 = arith.constant 0 : index
    %417 = vector.load %arg6[%c1_286, %c3_287, %c0_288, %c0_289] : memref<2x6x48x8xbf16, #tpu.memory_space<vmem>>, vector<1x1x48x8xbf16>
    %418 = vector.shape_cast %417 : vector<1x1x48x8xbf16> to vector<48x8xbf16>
    %cst_290 = arith.constant dense<0.000000e+00> : vector<16x8xf32>
    %419 = tpu.matmul %310, %418, %cst_290 {dimension_numbers = #tpu.dot_dimension_numbers<[1], [0], [0], [1], [0, 0, 1, 1], [], []>} : vector<16x48xbf16>, vector<48x8xbf16>, vector<16x8xf32> -> vector<16x8xf32>
    %420 = arith.truncf %419 : vector<16x8xf32> to vector<16x8xbf16>
    %421 = arith.truncf %413 : vector<16x8xf32> to vector<16x8xbf16>
    %422 = arith.truncf %416 : vector<16x8xf32> to vector<16x8xbf16>
    %cst_291 = arith.constant dense<0.000000e+00> : vector<16x16xf32>
    %423 = tpu.matmul %421, %422, %cst_291 {dimension_numbers = #tpu.dot_dimension_numbers<[1], [1], [0], [0], [0, 0, 1, 0], [], []>} : vector<16x8xbf16>, vector<16x8xbf16>, vector<16x16xf32> -> vector<16x16xf32>
    %cst_292 = arith.constant 0.144337565 : f32
    %424 = vector.broadcast %cst_292 : f32 to vector<16x16xf32>
    %425 = arith.mulf %423, %424 : vector<16x16xf32>
    %426 = arith.addf %425, %7 : vector<16x16xf32>
    %cst_293 = arith.constant dense<0xFF800000> : vector<16xf32>
    %427 = vector.multi_reduction <maximumf>, %426, %cst_293 [1] : vector<16x16xf32> to vector<16xf32>
    %428 = vector.shape_cast %427 : vector<16xf32> to vector<16x1xf32>
    %429 = vector.broadcast %428 : vector<16x1xf32> to vector<16x16xf32>
    %430 = arith.subf %426, %429 : vector<16x16xf32>
    %431 = math.exp %430 : vector<16x16xf32>
    %cst_294 = arith.constant dense<0.000000e+00> : vector<16xf32>
    %432 = vector.multi_reduction <add>, %431, %cst_294 [1] : vector<16x16xf32> to vector<16xf32>
    %433 = vector.shape_cast %432 : vector<16xf32> to vector<16x1xf32>
    %434 = tpu.reciprocal %433 {approx = true} : vector<16x1xf32> -> vector<16x1xf32>
    %435 = vector.broadcast %434 : vector<16x1xf32> to vector<16x16xf32>
    %436 = arith.mulf %431, %435 : vector<16x16xf32>
    %437 = arith.truncf %436 : vector<16x16xf32> to vector<16x16xbf16>
    %cst_295 = arith.constant dense<0.000000e+00> : vector<16x8xf32>
    %438 = tpu.matmul %437, %420, %cst_295 {dimension_numbers = #tpu.dot_dimension_numbers<[1], [0], [0], [1], [0, 0, 1, 1], [], []>} : vector<16x16xbf16>, vector<16x8xbf16>, vector<16x8xf32> -> vector<16x8xf32>
    %439 = arith.truncf %438 : vector<16x8xf32> to vector<16x8xbf16>
    %c1_296 = arith.constant 1 : index
    %c3_297 = arith.constant 3 : index
    %c0_298 = arith.constant 0 : index
    %c0_299 = arith.constant 0 : index
    %440 = vector.load %arg7[%c1_296, %c3_297, %c0_298, %c0_299] : memref<2x6x8x48xbf16, #tpu.memory_space<vmem>>, vector<1x1x8x48xbf16>
    %441 = vector.shape_cast %440 : vector<1x1x8x48xbf16> to vector<8x48xbf16>
    %cst_300 = arith.constant dense<0.000000e+00> : vector<16x48xf32>
    %442 = tpu.matmul %439, %441, %cst_300 {dimension_numbers = #tpu.dot_dimension_numbers<[1], [0], [0], [1], [0, 0, 1, 1], [], []>} : vector<16x8xbf16>, vector<8x48xbf16>, vector<16x48xf32> -> vector<16x48xf32>
    %443 = arith.addf %410, %442 : vector<16x48xf32>
    %c1_301 = arith.constant 1 : index
    %c4_302 = arith.constant 4 : index
    %c0_303 = arith.constant 0 : index
    %c0_304 = arith.constant 0 : index
    %444 = vector.load %arg4[%c1_301, %c4_302, %c0_303, %c0_304] : memref<2x6x48x8xbf16, #tpu.memory_space<vmem>>, vector<1x1x48x8xbf16>
    %445 = vector.shape_cast %444 : vector<1x1x48x8xbf16> to vector<48x8xbf16>
    %cst_305 = arith.constant dense<0.000000e+00> : vector<16x8xf32>
    %446 = tpu.matmul %310, %445, %cst_305 {dimension_numbers = #tpu.dot_dimension_numbers<[1], [0], [0], [1], [0, 0, 1, 1], [], []>} : vector<16x48xbf16>, vector<48x8xbf16>, vector<16x8xf32> -> vector<16x8xf32>
    %c1_306 = arith.constant 1 : index
    %c4_307 = arith.constant 4 : index
    %c0_308 = arith.constant 0 : index
    %c0_309 = arith.constant 0 : index
    %447 = vector.load %arg5[%c1_306, %c4_307, %c0_308, %c0_309] : memref<2x6x48x8xbf16, #tpu.memory_space<vmem>>, vector<1x1x48x8xbf16>
    %448 = vector.shape_cast %447 : vector<1x1x48x8xbf16> to vector<48x8xbf16>
    %cst_310 = arith.constant dense<0.000000e+00> : vector<16x8xf32>
    %449 = tpu.matmul %310, %448, %cst_310 {dimension_numbers = #tpu.dot_dimension_numbers<[1], [0], [0], [1], [0, 0, 1, 1], [], []>} : vector<16x48xbf16>, vector<48x8xbf16>, vector<16x8xf32> -> vector<16x8xf32>
    %c1_311 = arith.constant 1 : index
    %c4_312 = arith.constant 4 : index
    %c0_313 = arith.constant 0 : index
    %c0_314 = arith.constant 0 : index
    %450 = vector.load %arg6[%c1_311, %c4_312, %c0_313, %c0_314] : memref<2x6x48x8xbf16, #tpu.memory_space<vmem>>, vector<1x1x48x8xbf16>
    %451 = vector.shape_cast %450 : vector<1x1x48x8xbf16> to vector<48x8xbf16>
    %cst_315 = arith.constant dense<0.000000e+00> : vector<16x8xf32>
    %452 = tpu.matmul %310, %451, %cst_315 {dimension_numbers = #tpu.dot_dimension_numbers<[1], [0], [0], [1], [0, 0, 1, 1], [], []>} : vector<16x48xbf16>, vector<48x8xbf16>, vector<16x8xf32> -> vector<16x8xf32>
    %453 = arith.truncf %452 : vector<16x8xf32> to vector<16x8xbf16>
    %454 = arith.truncf %446 : vector<16x8xf32> to vector<16x8xbf16>
    %455 = arith.truncf %449 : vector<16x8xf32> to vector<16x8xbf16>
    %cst_316 = arith.constant dense<0.000000e+00> : vector<16x16xf32>
    %456 = tpu.matmul %454, %455, %cst_316 {dimension_numbers = #tpu.dot_dimension_numbers<[1], [1], [0], [0], [0, 0, 1, 0], [], []>} : vector<16x8xbf16>, vector<16x8xbf16>, vector<16x16xf32> -> vector<16x16xf32>
    %cst_317 = arith.constant 0.144337565 : f32
    %457 = vector.broadcast %cst_317 : f32 to vector<16x16xf32>
    %458 = arith.mulf %456, %457 : vector<16x16xf32>
    %459 = arith.addf %458, %7 : vector<16x16xf32>
    %cst_318 = arith.constant dense<0xFF800000> : vector<16xf32>
    %460 = vector.multi_reduction <maximumf>, %459, %cst_318 [1] : vector<16x16xf32> to vector<16xf32>
    %461 = vector.shape_cast %460 : vector<16xf32> to vector<16x1xf32>
    %462 = vector.broadcast %461 : vector<16x1xf32> to vector<16x16xf32>
    %463 = arith.subf %459, %462 : vector<16x16xf32>
    %464 = math.exp %463 : vector<16x16xf32>
    %cst_319 = arith.constant dense<0.000000e+00> : vector<16xf32>
    %465 = vector.multi_reduction <add>, %464, %cst_319 [1] : vector<16x16xf32> to vector<16xf32>
    %466 = vector.shape_cast %465 : vector<16xf32> to vector<16x1xf32>
    %467 = tpu.reciprocal %466 {approx = true} : vector<16x1xf32> -> vector<16x1xf32>
    %468 = vector.broadcast %467 : vector<16x1xf32> to vector<16x16xf32>
    %469 = arith.mulf %464, %468 : vector<16x16xf32>
    %470 = arith.truncf %469 : vector<16x16xf32> to vector<16x16xbf16>
    %cst_320 = arith.constant dense<0.000000e+00> : vector<16x8xf32>
    %471 = tpu.matmul %470, %453, %cst_320 {dimension_numbers = #tpu.dot_dimension_numbers<[1], [0], [0], [1], [0, 0, 1, 1], [], []>} : vector<16x16xbf16>, vector<16x8xbf16>, vector<16x8xf32> -> vector<16x8xf32>
    %472 = arith.truncf %471 : vector<16x8xf32> to vector<16x8xbf16>
    %c1_321 = arith.constant 1 : index
    %c4_322 = arith.constant 4 : index
    %c0_323 = arith.constant 0 : index
    %c0_324 = arith.constant 0 : index
    %473 = vector.load %arg7[%c1_321, %c4_322, %c0_323, %c0_324] : memref<2x6x8x48xbf16, #tpu.memory_space<vmem>>, vector<1x1x8x48xbf16>
    %474 = vector.shape_cast %473 : vector<1x1x8x48xbf16> to vector<8x48xbf16>
    %cst_325 = arith.constant dense<0.000000e+00> : vector<16x48xf32>
    %475 = tpu.matmul %472, %474, %cst_325 {dimension_numbers = #tpu.dot_dimension_numbers<[1], [0], [0], [1], [0, 0, 1, 1], [], []>} : vector<16x8xbf16>, vector<8x48xbf16>, vector<16x48xf32> -> vector<16x48xf32>
    %476 = arith.addf %443, %475 : vector<16x48xf32>
    %c1_326 = arith.constant 1 : index
    %c5_327 = arith.constant 5 : index
    %c0_328 = arith.constant 0 : index
    %c0_329 = arith.constant 0 : index
    %477 = vector.load %arg4[%c1_326, %c5_327, %c0_328, %c0_329] : memref<2x6x48x8xbf16, #tpu.memory_space<vmem>>, vector<1x1x48x8xbf16>
    %478 = vector.shape_cast %477 : vector<1x1x48x8xbf16> to vector<48x8xbf16>
    %cst_330 = arith.constant dense<0.000000e+00> : vector<16x8xf32>
    %479 = tpu.matmul %310, %478, %cst_330 {dimension_numbers = #tpu.dot_dimension_numbers<[1], [0], [0], [1], [0, 0, 1, 1], [], []>} : vector<16x48xbf16>, vector<48x8xbf16>, vector<16x8xf32> -> vector<16x8xf32>
    %c1_331 = arith.constant 1 : index
    %c5_332 = arith.constant 5 : index
    %c0_333 = arith.constant 0 : index
    %c0_334 = arith.constant 0 : index
    %480 = vector.load %arg5[%c1_331, %c5_332, %c0_333, %c0_334] : memref<2x6x48x8xbf16, #tpu.memory_space<vmem>>, vector<1x1x48x8xbf16>
    %481 = vector.shape_cast %480 : vector<1x1x48x8xbf16> to vector<48x8xbf16>
    %cst_335 = arith.constant dense<0.000000e+00> : vector<16x8xf32>
    %482 = tpu.matmul %310, %481, %cst_335 {dimension_numbers = #tpu.dot_dimension_numbers<[1], [0], [0], [1], [0, 0, 1, 1], [], []>} : vector<16x48xbf16>, vector<48x8xbf16>, vector<16x8xf32> -> vector<16x8xf32>
    %c1_336 = arith.constant 1 : index
    %c5_337 = arith.constant 5 : index
    %c0_338 = arith.constant 0 : index
    %c0_339 = arith.constant 0 : index
    %483 = vector.load %arg6[%c1_336, %c5_337, %c0_338, %c0_339] : memref<2x6x48x8xbf16, #tpu.memory_space<vmem>>, vector<1x1x48x8xbf16>
    %484 = vector.shape_cast %483 : vector<1x1x48x8xbf16> to vector<48x8xbf16>
    %cst_340 = arith.constant dense<0.000000e+00> : vector<16x8xf32>
    %485 = tpu.matmul %310, %484, %cst_340 {dimension_numbers = #tpu.dot_dimension_numbers<[1], [0], [0], [1], [0, 0, 1, 1], [], []>} : vector<16x48xbf16>, vector<48x8xbf16>, vector<16x8xf32> -> vector<16x8xf32>
    %486 = arith.truncf %485 : vector<16x8xf32> to vector<16x8xbf16>
    %487 = arith.truncf %479 : vector<16x8xf32> to vector<16x8xbf16>
    %488 = arith.truncf %482 : vector<16x8xf32> to vector<16x8xbf16>
    %cst_341 = arith.constant dense<0.000000e+00> : vector<16x16xf32>
    %489 = tpu.matmul %487, %488, %cst_341 {dimension_numbers = #tpu.dot_dimension_numbers<[1], [1], [0], [0], [0, 0, 1, 0], [], []>} : vector<16x8xbf16>, vector<16x8xbf16>, vector<16x16xf32> -> vector<16x16xf32>
    %cst_342 = arith.constant 0.144337565 : f32
    %490 = vector.broadcast %cst_342 : f32 to vector<16x16xf32>
    %491 = arith.mulf %489, %490 : vector<16x16xf32>
    %492 = arith.addf %491, %7 : vector<16x16xf32>
    %cst_343 = arith.constant dense<0xFF800000> : vector<16xf32>
    %493 = vector.multi_reduction <maximumf>, %492, %cst_343 [1] : vector<16x16xf32> to vector<16xf32>
    %494 = vector.shape_cast %493 : vector<16xf32> to vector<16x1xf32>
    %495 = vector.broadcast %494 : vector<16x1xf32> to vector<16x16xf32>
    %496 = arith.subf %492, %495 : vector<16x16xf32>
    %497 = math.exp %496 : vector<16x16xf32>
    %cst_344 = arith.constant dense<0.000000e+00> : vector<16xf32>
    %498 = vector.multi_reduction <add>, %497, %cst_344 [1] : vector<16x16xf32> to vector<16xf32>
    %499 = vector.shape_cast %498 : vector<16xf32> to vector<16x1xf32>
    %500 = tpu.reciprocal %499 {approx = true} : vector<16x1xf32> -> vector<16x1xf32>
    %501 = vector.broadcast %500 : vector<16x1xf32> to vector<16x16xf32>
    %502 = arith.mulf %497, %501 : vector<16x16xf32>
    %503 = arith.truncf %502 : vector<16x16xf32> to vector<16x16xbf16>
    %cst_345 = arith.constant dense<0.000000e+00> : vector<16x8xf32>
    %504 = tpu.matmul %503, %486, %cst_345 {dimension_numbers = #tpu.dot_dimension_numbers<[1], [0], [0], [1], [0, 0, 1, 1], [], []>} : vector<16x16xbf16>, vector<16x8xbf16>, vector<16x8xf32> -> vector<16x8xf32>
    %505 = arith.truncf %504 : vector<16x8xf32> to vector<16x8xbf16>
    %c1_346 = arith.constant 1 : index
    %c5_347 = arith.constant 5 : index
    %c0_348 = arith.constant 0 : index
    %c0_349 = arith.constant 0 : index
    %506 = vector.load %arg7[%c1_346, %c5_347, %c0_348, %c0_349] : memref<2x6x8x48xbf16, #tpu.memory_space<vmem>>, vector<1x1x8x48xbf16>
    %507 = vector.shape_cast %506 : vector<1x1x8x48xbf16> to vector<8x48xbf16>
    %cst_350 = arith.constant dense<0.000000e+00> : vector<16x48xf32>
    %508 = tpu.matmul %505, %507, %cst_350 {dimension_numbers = #tpu.dot_dimension_numbers<[1], [0], [0], [1], [0, 0, 1, 1], [], []>} : vector<16x8xbf16>, vector<8x48xbf16>, vector<16x48xf32> -> vector<16x48xf32>
    %509 = arith.addf %476, %508 : vector<16x48xf32>
    %510 = arith.addf %283, %509 : vector<16x48xf32>
    %c1_351 = arith.constant 1 : index
    %c0_352 = arith.constant 0 : index
    %c0_353 = arith.constant 0 : index
    %511 = vector.load %arg8[%c1_351, %c0_352, %c0_353] : memref<2x1x48xf32, #tpu.memory_space<vmem>>, vector<1x1x48xf32>
    %512 = vector.shape_cast %511 : vector<1x1x48xf32> to vector<1x48xf32>
    %513 = vector.broadcast %512 : vector<1x48xf32> to vector<16x48xf32>
    %514 = arith.addf %510, %513 : vector<16x48xf32>
    %c1_354 = arith.constant 1 : index
    %c0_355 = arith.constant 0 : index
    %c0_356 = arith.constant 0 : index
    %515 = vector.load %arg9[%c1_354, %c0_355, %c0_356] : memref<2x1x48xf32, #tpu.memory_space<vmem>>, vector<1x1x48xf32>
    %516 = vector.shape_cast %515 : vector<1x1x48xf32> to vector<1x48xf32>
    %c1_357 = arith.constant 1 : index
    %c0_358 = arith.constant 0 : index
    %c0_359 = arith.constant 0 : index
    %517 = vector.load %arg10[%c1_357, %c0_358, %c0_359] : memref<2x1x48xf32, #tpu.memory_space<vmem>>, vector<1x1x48xf32>
    %518 = vector.shape_cast %517 : vector<1x1x48xf32> to vector<1x48xf32>
    %cst_360 = arith.constant dense<0.000000e+00> : vector<16xf32>
    %519 = vector.multi_reduction <add>, %514, %cst_360 [1] : vector<16x48xf32> to vector<16xf32>
    %520 = vector.shape_cast %519 : vector<16xf32> to vector<16x1xf32>
    %cst_361 = arith.constant 4.800000e+01 : f32
    %521 = vector.broadcast %cst_361 : f32 to vector<16x1xf32>
    %522 = arith.divf %520, %521 : vector<16x1xf32>
    %523 = vector.broadcast %522 : vector<16x1xf32> to vector<16x48xf32>
    %524 = arith.subf %514, %523 : vector<16x48xf32>
    %525 = arith.mulf %524, %524 : vector<16x48xf32>
    %cst_362 = arith.constant dense<0.000000e+00> : vector<16xf32>
    %526 = vector.multi_reduction <add>, %525, %cst_362 [1] : vector<16x48xf32> to vector<16xf32>
    %527 = vector.shape_cast %526 : vector<16xf32> to vector<16x1xf32>
    %cst_363 = arith.constant 4.800000e+01 : f32
    %528 = vector.broadcast %cst_363 : f32 to vector<16x1xf32>
    %529 = arith.divf %527, %528 : vector<16x1xf32>
    %530 = vector.broadcast %522 : vector<16x1xf32> to vector<16x48xf32>
    %531 = arith.subf %514, %530 : vector<16x48xf32>
    %cst_364 = arith.constant 9.99999974E-6 : f32
    %532 = vector.broadcast %cst_364 : f32 to vector<16x1xf32>
    %533 = arith.addf %529, %532 : vector<16x1xf32>
    %534 = math.rsqrt %533 : vector<16x1xf32>
    %535 = vector.broadcast %534 : vector<16x1xf32> to vector<16x48xf32>
    %536 = arith.mulf %531, %535 : vector<16x48xf32>
    %537 = vector.broadcast %516 : vector<1x48xf32> to vector<16x48xf32>
    %538 = arith.mulf %536, %537 : vector<16x48xf32>
    %539 = vector.broadcast %518 : vector<1x48xf32> to vector<16x48xf32>
    %540 = arith.addf %538, %539 : vector<16x48xf32>
    %541 = arith.truncf %540 : vector<16x48xf32> to vector<16x48xbf16>
    %c1_365 = arith.constant 1 : index
    %c0_366 = arith.constant 0 : index
    %c0_367 = arith.constant 0 : index
    %542 = vector.load %arg11[%c1_365, %c0_366, %c0_367] : memref<2x48x192xbf16, #tpu.memory_space<vmem>>, vector<1x48x192xbf16>
    %543 = vector.shape_cast %542 : vector<1x48x192xbf16> to vector<48x192xbf16>
    %cst_368 = arith.constant dense<0.000000e+00> : vector<16x192xf32>
    %544 = tpu.matmul %541, %543, %cst_368 {dimension_numbers = #tpu.dot_dimension_numbers<[1], [0], [0], [1], [0, 0, 1, 1], [], []>} : vector<16x48xbf16>, vector<48x192xbf16>, vector<16x192xf32> -> vector<16x192xf32>
    %c1_369 = arith.constant 1 : index
    %c0_370 = arith.constant 0 : index
    %c0_371 = arith.constant 0 : index
    %545 = vector.load %arg12[%c1_369, %c0_370, %c0_371] : memref<2x1x192xf32, #tpu.memory_space<vmem>>, vector<1x1x192xf32>
    %546 = vector.shape_cast %545 : vector<1x1x192xf32> to vector<1x192xf32>
    %547 = vector.broadcast %546 : vector<1x192xf32> to vector<16x192xf32>
    %548 = arith.addf %544, %547 : vector<16x192xf32>
    %cst_372 = arith.constant 0.000000e+00 : f32
    %549 = vector.broadcast %cst_372 : f32 to vector<16x192xf32>
    %550 = arith.maximumf %548, %549 : vector<16x192xf32>
    %551 = arith.truncf %550 : vector<16x192xf32> to vector<16x192xbf16>
    %c1_373 = arith.constant 1 : index
    %c0_374 = arith.constant 0 : index
    %c0_375 = arith.constant 0 : index
    %552 = vector.load %arg13[%c1_373, %c0_374, %c0_375] : memref<2x192x48xbf16, #tpu.memory_space<vmem>>, vector<1x192x48xbf16>
    %553 = vector.shape_cast %552 : vector<1x192x48xbf16> to vector<192x48xbf16>
    %cst_376 = arith.constant dense<0.000000e+00> : vector<16x48xf32>
    %554 = tpu.matmul %551, %553, %cst_376 {dimension_numbers = #tpu.dot_dimension_numbers<[1], [0], [0], [1], [0, 0, 1, 1], [], []>} : vector<16x192xbf16>, vector<192x48xbf16>, vector<16x48xf32> -> vector<16x48xf32>
    %555 = arith.addf %514, %554 : vector<16x48xf32>
    %c1_377 = arith.constant 1 : index
    %c0_378 = arith.constant 0 : index
    %c0_379 = arith.constant 0 : index
    %556 = vector.load %arg14[%c1_377, %c0_378, %c0_379] : memref<2x1x48xf32, #tpu.memory_space<vmem>>, vector<1x1x48xf32>
    %557 = vector.shape_cast %556 : vector<1x1x48xf32> to vector<1x48xf32>
    %558 = vector.broadcast %557 : vector<1x48xf32> to vector<16x48xf32>
    %559 = arith.addf %555, %558 : vector<16x48xf32>
    %c0_380 = arith.constant 0 : index
    %c0_381 = arith.constant 0 : index
    %560 = vector.load %arg15[%c0_380, %c0_381] : memref<1x48xf32, #tpu.memory_space<vmem>>, vector<1x48xf32>
    %c0_382 = arith.constant 0 : index
    %c0_383 = arith.constant 0 : index
    %561 = vector.load %arg16[%c0_382, %c0_383] : memref<1x48xf32, #tpu.memory_space<vmem>>, vector<1x48xf32>
    %cst_384 = arith.constant dense<0.000000e+00> : vector<16xf32>
    %562 = vector.multi_reduction <add>, %559, %cst_384 [1] : vector<16x48xf32> to vector<16xf32>
    %563 = vector.shape_cast %562 : vector<16xf32> to vector<16x1xf32>
    %cst_385 = arith.constant 4.800000e+01 : f32
    %564 = vector.broadcast %cst_385 : f32 to vector<16x1xf32>
    %565 = arith.divf %563, %564 : vector<16x1xf32>
    %566 = vector.broadcast %565 : vector<16x1xf32> to vector<16x48xf32>
    %567 = arith.subf %559, %566 : vector<16x48xf32>
    %568 = arith.mulf %567, %567 : vector<16x48xf32>
    %cst_386 = arith.constant dense<0.000000e+00> : vector<16xf32>
    %569 = vector.multi_reduction <add>, %568, %cst_386 [1] : vector<16x48xf32> to vector<16xf32>
    %570 = vector.shape_cast %569 : vector<16xf32> to vector<16x1xf32>
    %cst_387 = arith.constant 4.800000e+01 : f32
    %571 = vector.broadcast %cst_387 : f32 to vector<16x1xf32>
    %572 = arith.divf %570, %571 : vector<16x1xf32>
    %573 = vector.broadcast %565 : vector<16x1xf32> to vector<16x48xf32>
    %574 = arith.subf %559, %573 : vector<16x48xf32>
    %cst_388 = arith.constant 9.99999974E-6 : f32
    %575 = vector.broadcast %cst_388 : f32 to vector<16x1xf32>
    %576 = arith.addf %572, %575 : vector<16x1xf32>
    %577 = math.rsqrt %576 : vector<16x1xf32>
    %578 = vector.broadcast %577 : vector<16x1xf32> to vector<16x48xf32>
    %579 = arith.mulf %574, %578 : vector<16x48xf32>
    %580 = vector.broadcast %560 : vector<1x48xf32> to vector<16x48xf32>
    %581 = arith.mulf %579, %580 : vector<16x48xf32>
    %582 = vector.broadcast %561 : vector<1x48xf32> to vector<16x48xf32>
    %583 = arith.addf %581, %582 : vector<16x48xf32>
    %584 = arith.truncf %583 : vector<16x48xf32> to vector<16x48xbf16>
    %c0_389 = arith.constant 0 : index
    %c0_390 = arith.constant 0 : index
    %585 = vector.load %arg17[%c0_389, %c0_390] : memref<48x128xbf16, #tpu.memory_space<vmem>>, vector<48x128xbf16>
    %cst_391 = arith.constant dense<0.000000e+00> : vector<16x128xf32>
    %586 = tpu.matmul %584, %585, %cst_391 {dimension_numbers = #tpu.dot_dimension_numbers<[1], [0], [0], [1], [0, 0, 1, 1], [], []>} : vector<16x48xbf16>, vector<48x128xbf16>, vector<16x128xf32> -> vector<16x128xf32>
    %c0_392 = arith.constant 0 : index
    %c0_393 = arith.constant 0 : index
    %587 = vector.load %arg18[%c0_392, %c0_393] : memref<1x128xf32, #tpu.memory_space<vmem>>, vector<1x128xf32>
    %588 = vector.broadcast %587 : vector<1x128xf32> to vector<16x128xf32>
    %589 = arith.addf %586, %588 : vector<16x128xf32>
    %c0_394 = arith.constant 0 : index
    %c0_395 = arith.constant 0 : index
    %c0_396 = arith.constant 0 : index
    %590 = vector.load %arg19[%c0_394, %c0_395, %c0_396] : memref<1x16x128xf32, #tpu.memory_space<vmem>>, vector<1x16x128xf32>
    %591 = vector.shape_cast %590 : vector<1x16x128xf32> to vector<16x128xf32>
    %592 = vector.shape_cast %589 : vector<16x128xf32> to vector<1x16x128xf32>
    tpu.vector_store %arg19[%c0_394, %c0_395, %c0_396], %592 {strides = array<i32>} : memref<1x16x128xf32, #tpu.memory_space<vmem>>, vector<1x16x128xf32>,
    return
  }
  func.func @transform_0(%arg0: i32) -> (i32, i32, i32) {
    %c0_i32 = arith.constant 0 : i32
    %c0_i32_0 = arith.constant 0 : i32
    %c0_i32_1 = arith.constant 0 : i32
    return %arg0, %c0_i32, %c0_i32_0 : i32, i32, i32
  }
  func.func @transform_1(%arg0: i32) -> (i32, i32, i32) {
    %c0_i32 = arith.constant 0 : i32
    %c0_i32_0 = arith.constant 0 : i32
    %c0_i32_1 = arith.constant 0 : i32
    %c0_i32_2 = arith.constant 0 : i32
    return %c0_i32, %c0_i32_0, %c0_i32_1 : i32, i32, i32
  }
  func.func @transform_2(%arg0: i32) -> (i32, i32, i32) {
    %c0_i32 = arith.constant 0 : i32
    %c0_i32_0 = arith.constant 0 : i32
    %c0_i32_1 = arith.constant 0 : i32
    %c0_i32_2 = arith.constant 0 : i32
    return %c0_i32, %c0_i32_0, %c0_i32_1 : i32, i32, i32
  }
  func.func @transform_3(%arg0: i32) -> (i32, i32, i32, i32) {
    %c0_i32 = arith.constant 0 : i32
    %c0_i32_0 = arith.constant 0 : i32
    %c0_i32_1 = arith.constant 0 : i32
    %c0_i32_2 = arith.constant 0 : i32
    %c0_i32_3 = arith.constant 0 : i32
    return %c0_i32, %c0_i32_0, %c0_i32_1, %c0_i32_2 : i32, i32, i32, i32
  }
  func.func @transform_4(%arg0: i32) -> (i32, i32, i32, i32) {
    %c0_i32 = arith.constant 0 : i32
    %c0_i32_0 = arith.constant 0 : i32
    %c0_i32_1 = arith.constant 0 : i32
    %c0_i32_2 = arith.constant 0 : i32
    %c0_i32_3 = arith.constant 0 : i32
    return %c0_i32, %c0_i32_0, %c0_i32_1, %c0_i32_2 : i32, i32, i32, i32
  }
  func.func @transform_5(%arg0: i32) -> (i32, i32, i32, i32) {
    %c0_i32 = arith.constant 0 : i32
    %c0_i32_0 = arith.constant 0 : i32
    %c0_i32_1 = arith.constant 0 : i32
    %c0_i32_2 = arith.constant 0 : i32
    %c0_i32_3 = arith.constant 0 : i32
    return %c0_i32, %c0_i32_0, %c0_i32_1, %c0_i32_2 : i32, i32, i32, i32
  }
  func.func @transform_6(%arg0: i32) -> (i32, i32, i32, i32) {
    %c0_i32 = arith.constant 0 : i32
    %c0_i32_0 = arith.constant 0 : i32
    %c0_i32_1 = arith.constant 0 : i32
    %c0_i32_2 = arith.constant 0 : i32
    %c0_i32_3 = arith.constant 0 : i32
    return %c0_i32, %c0_i32_0, %c0_i32_1, %c0_i32_2 : i32, i32, i32, i32
  }
  func.func @transform_7(%arg0: i32) -> (i32, i32, i32) {
    %c0_i32 = arith.constant 0 : i32
    %c0_i32_0 = arith.constant 0 : i32
    %c0_i32_1 = arith.constant 0 : i32
    %c0_i32_2 = arith.constant 0 : i32
    return %c0_i32, %c0_i32_0, %c0_i32_1 : i32, i32, i32
  }
  func.func @transform_8(%arg0: i32) -> (i32, i32, i32) {
    %c0_i32 = arith.constant 0 : i32
    %c0_i32_0 = arith.constant 0 : i32
    %c0_i32_1 = arith.constant 0 : i32
    %c0_i32_2 = arith.constant 0 : i32
    return %c0_i32, %c0_i32_0, %c0_i32_1 : i32, i32, i32
  }
  func.func @transform_9(%arg0: i32) -> (i32, i32, i32) {
    %c0_i32 = arith.constant 0 : i32
    %c0_i32_0 = arith.constant 0 : i32
    %c0_i32_1 = arith.constant 0 : i32
    %c0_i32_2 = arith.constant 0 : i32
    return %c0_i32, %c0_i32_0, %c0_i32_1 : i32, i32, i32
  }
  func.func @transform_10(%arg0: i32) -> (i32, i32, i32) {
    %c0_i32 = arith.constant 0 : i32
    %c0_i32_0 = arith.constant 0 : i32
    %c0_i32_1 = arith.constant 0 : i32
    %c0_i32_2 = arith.constant 0 : i32
    return %c0_i32, %c0_i32_0, %c0_i32_1 : i32, i32, i32
  }
  func.func @transform_11(%arg0: i32) -> (i32, i32, i32) {
    %c0_i32 = arith.constant 0 : i32
    %c0_i32_0 = arith.constant 0 : i32
    %c0_i32_1 = arith.constant 0 : i32
    %c0_i32_2 = arith.constant 0 : i32
    return %c0_i32, %c0_i32_0, %c0_i32_1 : i32, i32, i32
  }
  func.func @transform_12(%arg0: i32) -> (i32, i32, i32) {
    %c0_i32 = arith.constant 0 : i32
    %c0_i32_0 = arith.constant 0 : i32
    %c0_i32_1 = arith.constant 0 : i32
    %c0_i32_2 = arith.constant 0 : i32
    return %c0_i32, %c0_i32_0, %c0_i32_1 : i32, i32, i32
  }
  func.func @transform_13(%arg0: i32) -> (i32, i32, i32) {
    %c0_i32 = arith.constant 0 : i32
    %c0_i32_0 = arith.constant 0 : i32
    %c0_i32_1 = arith.constant 0 : i32
    %c0_i32_2 = arith.constant 0 : i32
    return %c0_i32, %c0_i32_0, %c0_i32_1 : i32, i32, i32
  }
  func.func @transform_14(%arg0: i32) -> (i32, i32) {
    %c0_i32 = arith.constant 0 : i32
    %c0_i32_0 = arith.constant 0 : i32
    %c0_i32_1 = arith.constant 0 : i32
    return %c0_i32, %c0_i32_0 : i32, i32
  }
  func.func @transform_15(%arg0: i32) -> (i32, i32) {
    %c0_i32 = arith.constant 0 : i32
    %c0_i32_0 = arith.constant 0 : i32
    %c0_i32_1 = arith.constant 0 : i32
    return %c0_i32, %c0_i32_0 : i32, i32
  }
  func.func @transform_16(%arg0: i32) -> (i32, i32) {
    %c0_i32 = arith.constant 0 : i32
    %c0_i32_0 = arith.constant 0 : i32
    %c0_i32_1 = arith.constant 0 : i32
    return %c0_i32, %c0_i32_0 : i32, i32
  }
  func.func @transform_17(%arg0: i32) -> (i32, i32) {
    %c0_i32 = arith.constant 0 : i32
    %c0_i32_0 = arith.constant 0 : i32
    %c0_i32_1 = arith.constant 0 : i32
    return %c0_i32, %c0_i32_0 : i32, i32
  }
  func.func @transform_18(%arg0: i32) -> (i32, i32, i32) {
    %c0_i32 = arith.constant 0 : i32
    %c0_i32_0 = arith.constant 0 : i32
    %c0_i32_1 = arith.constant 0 : i32
    return %arg0, %c0_i32, %c0_i32_0 : i32, i32, i32
  }
}

</mosaic_0001>

<bundles_post_ra>
// kernel: forward.1
= control target key start
LH: loop header
LB: loop body
LE: loop exit
PB: predicated region body
PF: predicated region fallthrough
CT: control target
= control target key end

     0   :  { %s9038_s0 = inlined_call_operand.vmem [shape: f32[2,16,48], index: 0, kind: input, shape index: {}]   ;;  %s9039_s1 = inlined_call_operand.vmem [shape: f32[2,1,48], index: 1, kind: input, shape index: {}]   ;;  %s9040_s2 = inlined_call_operand.vmem [shape: f32[2,1,48], index: 2, kind: input, shape index: {}]   ;;  %s9041_s3 = inlined_call_operand.vmem [shape: bf16[2,6,48,8], index: 3, kind: input, shape index: {}]   ;;  %s9042_s4 = inlined_call_operand.vmem [shape: bf16[2,6,48,8], index: 4, kind: input, shape index: {}]   ;;  %s9043_s5 = inlined_call_operand.vmem [shape: bf16[2,6,48,8], index: 5, kind: input, shape index: {}]   ;;  %s9044_s6 = inlined_call_operand.vmem [shape: bf16[2,6,8,48], index: 6, kind: input, shape index: {}]   ;;  %s9045_s7 = inlined_call_operand.vmem [shape: f32[2,1,48], index: 7, kind: input, shape index: {}]   ;;  %s9046_s8 = inlined_call_operand.vmem [shape: f32[2,1,48], index: 8, kind: input, shape index: {}]   ;;  %s9047_s9 = inlined_call_operand.vmem [shape: f32[2,1,48], index: 9, kind: input, shape index: {}]   ;;  %s9048_s10 = inlined_call_operand.vmem [shape: bf16[2,48,192], index: 10, kind: input, shape index: {}]   ;;  %s9049_s11 = inlined_call_operand.vmem [shape: f32[2,1,192], index: 11, kind: input, shape index: {}]   ;;  %s9050_s12 = inlined_call_operand.vmem [shape: bf16[2,192,48], index: 12, kind: input, shape index: {}]   ;;  %s9051_s13 = inlined_call_operand.vmem [shape: f32[2,1,48], index: 13, kind: input, shape index: {}]   ;;  %s9052_s14 = inlined_call_operand.vmem [shape: f32[1,48], index: 14, kind: input, shape index: {}]   ;;  %s9053_s15 = inlined_call_operand.vmem [shape: f32[1,48], index: 15, kind: input, shape index: {}]   ;;  %s9054_s16 = inlined_call_operand.vmem [shape: bf16[48,128], index: 16, kind: input, shape index: {}]   ;;  %s9055_s17 = inlined_call_operand.vmem [shape: f32[1,128], index: 17, kind: input, shape index: {}]   ;;  %s9056_s18 = inlined_call_operand.hbm [shape: f32[2,16,128], index: 18, kind: output, shape index: {}]  }
   0x1   :  { %9065 = sst [smem:[#allocation11_spill]] %s9038_s0 }
   0x2   :  { %9066 = sst [smem:[#allocation12_spill]] %s9039_s1 }
   0x3   :  { %9067 = sst [smem:[#allocation13_spill]] %s9040_s2 }
   0x4   :  { %9068 = sst [smem:[#allocation14_spill]] %s9041_s3 }
   0x5   :  { %23 = vsyncpa [#allocation3], 0 }
   0x6   :  { %25 = vsyncpa [#allocation3 + $0x1], 0  ;;  %s7736_s27 = smov 0   ;;  %s7738_s28 = smov 0  }
   0x7   :  { %s7740_s29 = smov 0   ;;  %s7742_s30 = smov 0  }
   0x8 LB: > { %9069 = sst [smem:[#allocation5_spill]] %s7620_s27  ;;  %s7757_s0 = sadd.s32 4294967295, %s7632_s30   ;;  %s7632_s30 = sphi %s7742_s30, %s9084_s30   ;;  %s7628_s29 = sphi %s7740_s29, %s9086_s29   ;;  %s7624_s28 = sphi %s7738_s28, %s9088_s28   ;;  %s7620_s27 = sphi %s7736_s27, %s9087_s27  }
   0x9   : > { %9070 = sst [smem:[#allocation6_spill]] %s7628_s29  ;;  %s5949_s19 = sadd.s32 4294967294, %s7632_s30  }
   0xa   : > { %9071 = sst [smem:[#allocation7_spill]] %s7632_s30  ;;  %s7761_s1 = sadd.s32 1, %s7632_s30  }
   0xb   : > { %9072 = sst [smem:[#allocation8_spill]] %s7761_s1  ;;  %s421_s20 = sadd.s32 1, %s7628_s29 }
   0xc   : > { %s418_s21 = ssub.s32 %s7632_s30, %s7761_s1  ;;  %p431_p0 = scmp.ne.s32.totalorder %s7628_s29, %s7624_s28 }
   0xd   : > { %p419_p1 = scmp.eq.s32.totalorder %s418_s21, 0  ;;  %p432_p2 = scmp.eq.s32.totalorder %s7757_s0, 1 }
   0xe   : > { %p437_p3 = scmp.ne.s32.totalorder %s7624_s28, %s7620_s27  ;;  %p438_p4 = scmp.eq.s32.totalorder %s5949_s19, 1 }
   0xf   : > { %s7772_s22 = scalar_select %p419_p1, %s7628_s29, %s421_s20  }
  0x10   : > { %p7774_p5 = por %p432_p2, %p431_p0  ;;  %p7778_p6 = por %p438_p4, %p437_p3 }
  0x11   : > { %9073 = sst [smem:[#allocation9_spill]] %s7772_s22  ;;  %p5952_p7 = scmp.ge.s32.totalorder %s7632_s30, 1 }
  0x12   : > { %s9075_s23 = scalar_select %p7778_p6, 1, 0 }
  0x13   : > { %p515_p8 = scmp.lt.s32.totalorder %s7632_s30, 3 }
  0x14   : > { %9076 = sst [smem:[#allocation10_spill]] %s9075_s23 }
  0x15   : > { %p516_p9 = pnand %p5952_p7, %p515_p8 }
  0x16   : > { %p569_p10 = scmp.lt.s32.totalorder (!%p516_p9), %s7757_s0, 1  ;;  %vm588_vm0 = vcmask (!%p516_p9), 392192   ;;  %s9077_s20 = sld [smem:[#allocation11_spill]] (!%p516_p9)  ;;  %v7300_v15 = vld [vmem:[%s9043_s5] sm:$0xff] (!%p516_p9)   ;;  %v7634_v16 = vmov (!%p516_p9), 0.0   ;;  %v7302_v18 = vld [vmem:[%s9043_s5 + $0x8] sm:$0xff] (!%p516_p9)  }
  0x17   : > { %519 = sbr.rel (%p516_p9) target bundleno = 14549 (0x38d5), region = 92  ;;  %s9078_s3 = sld [smem:[#allocation14_spill]] (!%p516_p9)  ;;  %6668 = vmatprep.subr.bf16.mxu1 (!%p516_p9), %v7634_v16  ;;  %6688 = vmatprep.subr.bf16.mxu0 (!%p516_p9), %v7634_v16  ;;  %v7304_v20 = vld [vmem:[%s9043_s5 + $0x10] sm:$0xff] (!%p516_p9)   ;;  %vm7635_vm1 = vmmov (!%p516_p9), 0   ;;  %v7305_v37 = vld [vmem:[%s9042_s4] sm:$0xff] (!%p516_p9)   ;;  %v7307_v40 = vld [vmem:[%s9042_s4 + $0x8] sm:$0xff] (!%p516_p9)  }
  0x18   : > { %6689 = vmatpush3.bf16.msra.mxu0 (!%p516_p9), %v7300_v15  ;;  %6674 = vmatprep.mubr.msk.bf16.mxu1 (!%p516_p9), %vm7635_vm1, %v7634_v16  ;;  %s9079_s22 = sld [smem:[#allocation12_spill]] (!%p516_p9)  ;;  %v7309_v42 = vld [vmem:[%s9042_s4 + $0x10] sm:$0xff] (!%p516_p9)   ;;  %v7311_v44 = vld [vmem:[%s9043_s5 + $0x18] sm:$0xff] (!%p516_p9)   ;;  %v7312_v45 = vld [vmem:[%s9043_s5 + $0x20] sm:$0xff] (!%p516_p9)   ;;  %vm834_vm2 = vcmask (!%p516_p9), 64512   ;;  %vm886_vm5 = vcmask (!%p516_p9), 130048  }
  0x19   : > { %6690 = vmatprep.subr.bf16.mxu0 (!%p516_p9), %v7634_v16  ;;  %6694 = vmatprep.mubr.msk.bf16.mxu0 (!%p516_p9), %vm7635_vm1, %v7634_v16  ;;  %v7313_v46 = vld [vmem:[%s9043_s5 + $0x28] sm:$0xff] (!%p516_p9)   ;;  %vm1281_vm6 = vcmask (!%p516_p9), 1043456   ;;  %vm3109_vm7 = vcmask (!%p516_p9), 523264   ;;  %s566_s30 = sand.u32 (!%p516_p9), 1, %s7624_s28   ;;  %s7638_s26 = smov (!%p516_p9), [#allocation2]  }
  0x1a   : > { %s5953_s23 = sshll.u32 (!%p516_p9), %s566_s30, 4  ;;  %s7574_s19 = sshll.u32 (!%p516_p9), %s7638_s26, 4  ;;  %s7575_s19 = int_to_ptr.vmem [resolvable:$false] %s7574_s19 }
  0x1b   : > { %s568_s29 = scalar_lea.vmem (!%p516_p9), [#allocation2], %s5953_s23  ;;  %s8997_s23 = scalar_lea.sflag (!%p516_p9), [#allocation3], %s566_s30 }
  0x1c   : > { %6691 = vmatpush3.bf16.msra.mxu0 (!%p516_p9), %v7302_v18  ;;  %s5887_s1 = sshll.u32 (!%p516_p9), %s568_s29, 4  ;;  %s8990_s1 = int_to_ptr.vmem [resolvable:$true] %s5887_s1 }
  0x1d   : > { %v7299_v14 = vld [vmem:[%s9078_s3] sm:$0xff] (!%p516_p9)   ;;  %v7301_v17 = vld [vmem:[%s9078_s3 + $0x8] sm:$0xff] (!%p516_p9)   ;;  %6692 = vmatprep.subr.bf16.mxu0 (!%p516_p9), %v7634_v16  ;;  %v7303_v19 = vld [vmem:[%s9078_s3 + $0x10] sm:$0xff] (!%p516_p9)   ;;  %p7577_p0 = scmp.lt.s32.totalorder (!%p516_p9), %s8990_s1, %s7575_s19 }
  0x1e   : > { %s570_s24 = scalar_select %p569_p10, %s7757_s0, 1  ;;  %6669 = vmatpush3.bf16.msra.mxu1 %v7299_v14  ;;  %v5956_v29 = vld [vmem:[%s9079_s22] ss:$0 sm:$0xff]  ;;  %v7306_v38 = vld [vmem:[%s9078_s3 + $0x18] sm:$0xff]   ;;  %v7310_v43 = vld [vmem:[%s9078_s3 + $0x28] sm:$0xff]  }
  0x1f   : > { %6670 = vmatprep.subr.bf16.mxu1 %v7634_v16  ;;  %v7308_v41 = vld [vmem:[%s9078_s3 + $0x20] sm:$0xff]   ;;  %v7636_v14 = vmov -1e+30  }
  0x20   : > { %s6446_s25 = sshll.u32 %s570_s24, 4  ;;  %6693 = vmatpush3.bf16.msra.mxu0 %v7304_v20 }
  0x21   : > { %s7789_s21 = scalar_lea.vmem %s9077_s20, %s6446_s25  ;;  %6710 = vmatprep.subr.bf16.mxu0 %v7634_v16  ;;  %s9080_s25 = sld [smem:[#allocation13_spill]] }
  0x22   : > { %v575_v0 = vld [vmem:[%s7789_s21] sm:$0xff]  ;;  %v576_v1 = vld [vmem:[%s7789_s21 + $0x8] sm:$0xff]  ;;  %6671 = vmatpush3.bf16.msra.mxu1 %v7301_v17 }
  0x23   : > { %v589_v2 = vsel %vm588_vm0, %v575_v0, 0.0  ;;  %v592_v3 = vsel %vm588_vm0, %v576_v1, 0.0  ;;  %6672 = vmatprep.subr.bf16.mxu1 %v7634_v16 }
  0x24   : > { %590 = vadd.xlane.f32.xlu0 %v589_v2 }
  0x26   : > { %6673 = vmatpush3.bf16.msra.mxu1 %v7303_v19 }
  0x27   : > { %6678 = vmatprep.subr.bf16.mxu1 %v7634_v16  ;;  %v5957_v33 = vld [vmem:[%s9080_s25] ss:$0 sm:$0xff] }
  0x28   : > { %593 = vadd.xlane.f32.xlu0 %v592_v3 }
  0xb1   : > { %v591_v4 = vpop.xlane.xlu0 %590 }
  0xb2   : > { %v596_v5 = vmul.f32 0.020833334, %v591_v4 }
  0xb4   : > { %v598_v6 = vsub.f32 %v575_v0, %v596_v5 }
  0xb5   : > { %v594_v7 = vpop.xlane.xlu0 %593 }
  0xb6   : > { %v597_v8 = vmul.f32 0.020833334, %v594_v7  ;;  %v600_v9 = vmul.f32 %v598_v6, %v598_v6 }
  0xb8   : > { %v599_v10 = vsub.f32 %v576_v1, %v597_v8  ;;  %v602_v11 = vsel %vm588_vm0, %v600_v9, 0.0  ;;  %v577_v9 = vlaneseq }
  0xb9   : > { %603 = vadd.xlane.f32.xlu1 %v602_v11 }
  0xba   : > { %v601_v12 = vmul.f32 %v599_v10, %v599_v10  ;;  %v581_v11 = vand.u32 127, %v577_v9 }
  0xbc   : > { %v605_v13 = vsel %vm588_vm0, %v601_v12, 0.0 }
  0xbd   : > { %606 = vadd.xlane.f32.xlu1 %v605_v13 }
 0x146   : > { %v604_v21 = vpop.xlane.xlu1 %603 }
 0x147   : > { %v608_v22 = vmul.f32 0.020833334, %v604_v21 }
 0x149   : > { %v610_v23 = vadd.f32 1e-05, %v608_v22 }
 0x14a   : > { %v607_v24 = vpop.xlane.xlu1 %606 }
 0x14b   : > { %7452 = vrsqrt.f32 %v610_v23  ;;  %v609_v25 = vmul.f32 0.020833334, %v607_v24 }
 0x14d   : > { %v611_v26 = vadd.f32 1e-05, %v609_v25 }
 0x14f   : > { %7454 = vrsqrt.f32 %v611_v26 }
 0x155   : > { %v7453_v27 = vpop.eup %7452 }
 0x156   : > { %v614_v28 = vmul.f32 %v7453_v27, %v598_v6 }
 0x158   : > { %v622_v31 = vmul.f32 %v5956_v29, %v614_v28 }
 0x159   : > { %v7455_v30 = vpop.eup %7454 }
 0x15a   : > { %v615_v32 = vmul.f32 %v7455_v30, %v599_v10  ;;  %v630_v35 = vadd.f32 %v5957_v33, %v622_v31  ;;  %v7904_v10 = vshrl.u32 %v577_v9, 7 }
 0x15c   : > { %v623_v34 = vmul.f32 %v5956_v29, %v615_v32  ;;  %v579_v12 = vadd.s32 8, %v7904_v10  ;;  %vm582_vm3 = vcmp.le.s32.totalorder %v581_v11, %v7904_v10 }
 0x15d   : > { %v7908_v15 = vsel %vm582_vm3, 0.0, %v7636_v14 }
 0x15e   : > { %v631_v36 = vadd.f32 %v5957_v33, %v623_v34  ;;  %vm583_vm4 = vcmp.le.s32.totalorder %v581_v11, %v579_v12 }
 0x15f   : > { %v7910_v20 = vsel %vm583_vm4, 0.0, %v7636_v14 }
 0x160   : > { %v7839_v39 = vpack.c.bf16 %v631_v36, %v630_v35 }
 0x162   : > { %6675 = vmatmul.mubr.msk.bf16.vlgmr.msra.gmra.mrb[0].mxu1 %vm588_vm0, %v7839_v39  ;;  %6695 = vmatmul.mubr.msk.bf16.vlgmr.msra.gmra.mrb[0].mxu0 %vm588_vm0, %v7839_v39 }
 0x163   : > { %6679 = vmatpush3.bf16.msra.mxu1 %v7305_v37  ;;  %6711 = vmatpush3.bf16.msra.mxu0 %v7306_v38 }
 0x164   : > { %6680 = vmatprep.subr.bf16.mxu1 %v7634_v16  ;;  %6712 = vmatprep.subr.bf16.mxu0 %v7634_v16 }
 0x165   : > { %6684 = vmatprep.mubr.msk.bf16.mxu1 %vm7635_vm1, %v7634_v16  ;;  %6716 = vmatprep.mubr.msk.bf16.mxu0 %vm7635_vm1, %v7634_v16 }
 0x167   : > { %6681 = vmatpush3.bf16.msra.mxu1 %v7307_v40  ;;  %6713 = vmatpush3.bf16.msra.mxu0 %v7308_v41 }
 0x168   : > { %6682 = vmatprep.subr.bf16.mxu1 %v7634_v16  ;;  %6714 = vmatprep.subr.bf16.mxu0 %v7634_v16 }
 0x16b   : > { %6683 = vmatpush3.bf16.msra.mxu1 %v7309_v42  ;;  %6715 = vmatpush3.bf16.msra.mxu0 %v7310_v43 }
 0x16c   : > { %6730 = vmatprep.subr.bf16.mxu0 %v7634_v16  ;;  %6698 = vmatprep.subr.bf16.mxu1 %v7634_v16 }
 0x16e   : > { %6685 = vmatmul.mubr.msk.bf16.vlgmr.msra.gmra.mrb[4].mxu1 %vm588_vm0, %v7839_v39  ;;  %6717 = vmatmul.mubr.msk.bf16.vlgmr.msra.gmra.mrb[4].mxu0 %vm588_vm0, %v7839_v39 }
 0x16f   : > { %6731 = vmatpush3.bf16.msra.mxu0 %v7311_v44  ;;  %6736 = vmatprep.mubr.msk.bf16.mxu0 %vm7635_vm1, %v7634_v16  ;;  %v7314_v44 = vld [vmem:[%s9042_s4 + $0x18] sm:$0xff]  }
 0x170   : > { %6732 = vmatprep.subr.bf16.mxu0 %v7634_v16  ;;  %6700 = vmatprep.mubr.msk.bf16.mxu1 %vm7635_vm1, %v7634_v16 }
 0x173   : > { %6733 = vmatpush3.bf16.msra.mxu0 %v7312_v45 }
 0x174   : > { %6734 = vmatprep.subr.bf16.mxu0 %v7634_v16 }
 0x177   : > { %6735 = vmatpush3.bf16.msra.mxu0 %v7313_v46  ;;  %v7315_v46 = vld [vmem:[%s9042_s4 + $0x20] sm:$0xff]  }
 0x178   : > { %6746 = vmatprep.subr.bf16.mxu0 %v7634_v16 }
 0x17a   : > { %6737 = vmatmul.mubr.msk.bf16.vlgmr.msra.gmra.mrb[8].mxu0 %vm588_vm0, %v7839_v39 }
 0x17b   : > { %6748 = vmatprep.mubr.msk.bf16.mxu0 %vm7635_vm1, %v7634_v16 }
 0x235   : > { %v694_v47 = vpop.f32.mrb[0].mxu1  ;;  %v824_v48 = vpop.f32.mrb[0].mxu0 }
 0x236   : > { %v6676_v49 = vpop.f32.mrb[1].mxu1  ;;  %v6696_v50 = vpop.f32.mrb[1].mxu0 }
 0x237   : > { %v697_v51 = vpop.f32.mrb[2].mxu1  ;;  %v827_v52 = vpop.f32.mrb[2].mxu0 }
 0x238   : > { %v832_v53 = vpack.c.bf16 %v697_v51, %v694_v47  ;;  %v831_v54 = vpack.c.bf16 %v827_v52, %v824_v48  ;;  %v6677_v55 = vpop.f32.mrb[3].mxu1  ;;  %v6697_v56 = vpop.f32.mrb[3].mxu0  ;;  %v7316_v47 = vld [vmem:[%s9042_s4 + $0x28] sm:$0xff]  }
 0x241   : > { %v759_v57 = vpop.f32.mrb[4].mxu1  ;;  %v7891_v58 = vpop.f32.mrb[4].mxu0 }
 0x242   : > { %v6686_v59 = vpop.f32.mrb[5].mxu1  ;;  %v6718_v60 = vpop.f32.mrb[5].mxu0 }
 0x243   : > { %v762_v61 = vpop.f32.mrb[6].mxu1  ;;  %v7893_v62 = vpop.f32.mrb[6].mxu0 }
 0x244   : > { %v833_v63 = vpack.c.bf16 %v762_v61, %v759_v57  ;;  %v1155_v0 = vpack.c.bf16 %v7893_v62, %v7891_v58  ;;  %v6687_v1 = vpop.f32.mrb[7].mxu1  ;;  %v6719_v2 = vpop.f32.mrb[7].mxu0 }
 0x246   : > { %v839_v3 = vsel %vm834_vm2, %v833_v63, 0 }
 0x247   : > { %6699 = vmatpush3.bf16.xpose.msra.mxu1 %v839_v3 }
 0x248   : > { %6704 = vmatprep.subr.bf16.mxu1 %v7634_v16 }
 0x24d   : > { %v1147_v4 = vpop.f32.mrb[8].mxu0 }
 0x24e   : > { %6701 = vmatmul.mubr.msk.bf16.vlgmr.msra.gmra.mrb[8].mxu1 %vm834_vm2, %v832_v53  ;;  %v6738_v5 = vpop.f32.mrb[9].mxu0 }
 0x24f   : > { %6705 = vmatpush3.bf16.msra.mxu1 %v831_v54  ;;  %v1150_v6 = vpop.f32.mrb[10].mxu0  ;;  %6706 = vmatprep.mubr.msk.bf16.mxu1 %vm7635_vm1, %v7634_v16 }
 0x250   : > { %v1154_v7 = vpack.c.bf16 %v1150_v6, %v1147_v4  ;;  %v6739_v8 = vpop.f32.mrb[11].mxu0  ;;  %6720 = vmatprep.subr.bf16.mxu1 %v7634_v16 }
 0x252   : > { %6747 = vmatpush3.bf16.msra.mxu0 %v1154_v7 }
 0x253   : > { %6758 = vmatprep.subr.bf16.mxu0 %v7634_v16 }
 0x321   : > { %v875_v13 = vpop.f32.mrb[8].mxu1 }
 0x322   : > { %v882_v17 = vmul.f32 0.14433756, %v875_v13  ;;  %v6702_v18 = vpop.f32.mrb[9].mxu1 }
 0x323   : > { %v878_v19 = vpop.f32.mrb[10].mxu1  ;;  %v6004_v18 = vld [vmem:[%s9044_s6 + $0x4] sm:$0xf] }
 0x324   : > { %v883_v21 = vmul.f32 0.14433756, %v878_v19  ;;  %v6703_v22 = vpop.f32.mrb[11].mxu1  ;;  %v884_v23 = vadd.f32 %v882_v17, %v7908_v15  ;;  %v1283_v19 = vsel %vm1281_vm6, %v6004_v18, 0 }
 0x326   : > { %v887_v24 = vsel %vm886_vm5, %v884_v23, -inf  ;;  %v885_v25 = vadd.f32 %v883_v21, %v7910_v20 }
 0x327   : > { %888 = vmax.xlane.f32.xlu0 %v887_v24 }
 0x328   : > { %v890_v26 = vsel %vm886_vm5, %v885_v25, -inf }
 0x329   : > { %891 = vmax.xlane.f32.xlu1 %v890_v26 }
 0x3b4   : > { %v889_v27 = vpop.xlane.xlu0 %888 }
 0x3b5   : > { %v893_v28 = vsub.f32 %v884_v23, %v889_v27 }
 0x3b6   : > { %v892_v29 = vpop.xlane.xlu1 %891 }
 0x3b7   : > { %v895_v30 = vmul.f32 1.442695, %v893_v28  ;;  %v894_v31 = vsub.f32 %v885_v25, %v892_v29  ;;  %v955_v25 = vld [vmem:[%s9044_s6] sm:$0xf] }
 0x3b8   : > { %v1330_v29 = vsel %vm1281_vm6, %v955_v25, 0 }
 0x3b9   : > { %7456 = vpow2.f32 %v895_v30  ;;  %v897_v32 = vmul.f32 1.442695, %v894_v31  ;;  %v7317_v30 = vld [vmem:[%s9042_s4 + $0x30] sm:$0xff]   ;;  %v7318_v31 = vld [vmem:[%s9042_s4 + $0x38] sm:$0xff]  }
 0x3bb   : > { %7458 = vpow2.f32 %v897_v32  ;;  %v7319_v32 = vld [vmem:[%s9042_s4 + $0x40] sm:$0xff]  }
 0x3c3   : > { %v7457_v33 = vpop.eup %7456 }
 0x3c4   : > { %v899_v34 = vsel %vm886_vm5, %v7457_v33, 0.0 }
 0x3c5   : > { %v7459_v35 = vpop.eup %7458  ;;  %900 = vadd.xlane.f32.xlu0 %v899_v34 }
 0x3c6   : > { %v902_v36 = vsel %vm886_vm5, %v7459_v35, 0.0 }
 0x3c7   : > { %903 = vadd.xlane.f32.xlu1 %v902_v36  ;;  %v7320_v36 = vld [vmem:[%s9078_s3 + $0x30] sm:$0xff]  }
 0x452   : > { %v901_v37 = vpop.xlane.xlu0 %900 }
 0x453   : > { %7460 = vrcp.f32 %v901_v37 }
 0x454   : > { %v904_v38 = vpop.xlane.xlu1 %903 }
 0x455   : > { %7462 = vrcp.f32 %v904_v38 }
 0x45d   : > { %v7461_v40 = vpop.eup %7460 }
 0x45e   : > { %v907_v42 = vmul.f32 %v7461_v40, %v7457_v33  ;;  %v7321_v40 = vld [vmem:[%s9078_s3 + $0x38] sm:$0xff]  }
 0x45f   : > { %v7463_v41 = vpop.eup %7462 }
 0x460   : > { %v908_v43 = vmul.f32 %v7463_v41, %v7459_v35 }
 0x462   : > { %v909_v45 = vpack.c.bf16 %v908_v43, %v907_v42 }
 0x464   : > { %6707 = vmatmul.mubr.msk.bf16.vlgmr.msra.gmra.mrb[12].mxu1 %vm886_vm5, %v909_v45 }
 0x465   : > { %6721 = vmatpush3.bf16.msra.mxu1 %v7314_v44  ;;  %6726 = vmatprep.mubr.msk.bf16.mxu1 %vm7635_vm1, %v7634_v16  ;;  %v7322_v44 = vld [vmem:[%s9078_s3 + $0x40] sm:$0xff]  }
 0x466   : > { %6722 = vmatprep.subr.bf16.mxu1 %v7634_v16 }
 0x469   : > { %6723 = vmatpush3.bf16.msra.mxu1 %v7315_v46  ;;  %v7323_v46 = vld [vmem:[%s9043_s5 + $0x30] sm:$0xff]  }
 0x46a   : > { %6724 = vmatprep.subr.bf16.mxu1 %v7634_v16 }
 0x46d   : > { %6725 = vmatpush3.bf16.msra.mxu1 %v7316_v47  ;;  %v7324_v47 = vld [vmem:[%s9043_s5 + $0x38] sm:$0xff]  }
 0x46e   : > { %6740 = vmatprep.subr.bf16.mxu1 %v7634_v16 }
 0x470   : > { %6727 = vmatmul.mubr.msk.bf16.vlgmr.msra.gmra.mrb[16].mxu1 %vm588_vm0, %v7839_v39 }
 0x471   : > { %6742 = vmatprep.mubr.msk.bf16.mxu1 %vm7635_vm1, %v7634_v16 }
 0x537   : > { %v7937_v48 = vpop.f32.mrb[12].mxu1 }
 0x538   : > { %v6708_v49 = vpop.f32.mrb[13].mxu1 }
 0x539   : > { %v950_v50 = vpop.f32.mrb[14].mxu1 }
 0x53a   : > { %v954_v51 = vpack.c.bf16 %v950_v50, %v7937_v48  ;;  %v6709_v52 = vpop.f32.mrb[15].mxu1 }
 0x543   : > { %v1081_v53 = vpop.f32.mrb[16].mxu1 }
 0x544   : > { %v6728_v54 = vpop.f32.mrb[17].mxu1 }
 0x545   : > { %v1084_v55 = vpop.f32.mrb[18].mxu1 }
 0x546   : > { %v1156_v56 = vpack.c.bf16 %v1084_v55, %v1081_v53  ;;  %v6729_v57 = vpop.f32.mrb[19].mxu1 }
 0x548   : > { %v1161_v59 = vsel %vm834_vm2, %v1156_v56, 0 }
 0x549   : > { %6741 = vmatpush3.bf16.xpose.msra.mxu1 %v1161_v59 }
 0x54a   : > { %6752 = vmatprep.subr.bf16.mxu1 %v7634_v16 }
 0x550   : > { %6743 = vmatmul.mubr.msk.bf16.vlgmr.msra.gmra.mrb[20].mxu1 %vm834_vm2, %v1155_v0 }
 0x551   : > { %6754 = vmatprep.mubr.msk.bf16.mxu1 %vm7635_vm1, %v7634_v16  ;;  %6753 = vmatpush3.bf16.msra.mxu1 %v1283_v19 }
 0x552   : > { %6764 = vmatprep.subr.bf16.mxu1 %v7634_v16 }
 0x623   : > { %v1197_v60 = vpop.f32.mrb[20].mxu1 }
 0x624   : > { %v1204_v61 = vmul.f32 0.14433756, %v1197_v60  ;;  %v6744_v63 = vpop.f32.mrb[21].mxu1 }
 0x625   : > { %v1200_v1 = vpop.f32.mrb[22].mxu1 }
 0x626   : > { %v1205_v2 = vmul.f32 0.14433756, %v1200_v1  ;;  %v6745_v3 = vpop.f32.mrb[23].mxu1  ;;  %v1206_v4 = vadd.f32 %v1204_v61, %v7908_v15 }
 0x628   : > { %v1208_v5 = vsel %vm886_vm5, %v1206_v4, -inf  ;;  %v1207_v6 = vadd.f32 %v1205_v2, %v7910_v20 }
 0x629   : > { %1209 = vmax.xlane.f32.xlu0 %v1208_v5 }
 0x62a   : > { %v1211_v58 = vsel %vm886_vm5, %v1207_v6, -inf }
 0x62b   : > { %1212 = vmax.xlane.f32.xlu1 %v1211_v58 }
 0x6b6   : > { %v1210_v62 = vpop.xlane.xlu0 %1209 }
 0x6b7   : > { %v1214_v0 = vsub.f32 %v1206_v4, %v1210_v62 }
 0x6b8   : > { %v1213_v7 = vpop.xlane.xlu1 %1212 }
 0x6b9   : > { %v1216_v8 = vmul.f32 1.442695, %v1214_v0  ;;  %v1215_v9 = vsub.f32 %v1207_v6, %v1213_v7 }
 0x6bb   : > { %7464 = vpow2.f32 %v1216_v8  ;;  %v1218_v11 = vmul.f32 1.442695, %v1215_v9 }
 0x6bd   : > { %7466 = vpow2.f32 %v1218_v11 }
 0x6c5   : > { %v7465_v12 = vpop.eup %7464 }
 0x6c6   : > { %v1220_v13 = vsel %vm886_vm5, %v7465_v12, 0.0 }
 0x6c7   : > { %v7467_v14 = vpop.eup %7466  ;;  %1221 = vadd.xlane.f32.xlu0 %v1220_v13 }
 0x6c8   : > { %v1223_v17 = vsel %vm886_vm5, %v7467_v14, 0.0 }
 0x6c9   : > { %1224 = vadd.xlane.f32.xlu1 %v1223_v17 }
 0x754   : > { %v1222_v21 = vpop.xlane.xlu0 %1221 }
 0x755   : > { %7468 = vrcp.f32 %v1222_v21 }
 0x756   : > { %v1225_v22 = vpop.xlane.xlu1 %1224 }
 0x757   : > { %7470 = vrcp.f32 %v1225_v22 }
 0x75f   : > { %v7469_v23 = vpop.eup %7468 }
 0x760   : > { %v1228_v26 = vmul.f32 %v7469_v23, %v7465_v12 }
 0x761   : > { %v7471_v24 = vpop.eup %7470 }
 0x762   : > { %v1229_v27 = vmul.f32 %v7471_v24, %v7467_v14 }
 0x764   : > { %v1230_v28 = vpack.c.bf16 %v1229_v27, %v1228_v26 }
 0x766   : > { %6749 = vmatmul.mubr.msk.bf16.vlgmr.msra.gmra.mrb[12].mxu0 %vm886_vm5, %v1230_v28 }
 0x767   : > { %6759 = vmatpush3.bf16.msra.mxu0 %v1330_v29  ;;  %6760 = vmatprep.mubr.msk.bf16.mxu0 %vm7635_vm1, %v7634_v16 }
 0x768   : > { %6774 = vmatprep.subr.bf16.mxu0 %v7634_v16 }
 0x76e   : > { %6761 = vmatmul.mubr.msk.bf16.vlgmr.msra.gmra.mrb[16].mxu0 %vm834_vm2, %v954_v51  ;;  %v7325_v51 = vld [vmem:[%s9043_s5 + $0x40] sm:$0xff]  }
 0x76f   : > { %6775 = vmatpush3.bf16.msra.mxu0 %v7317_v30  ;;  %6780 = vmatprep.mubr.msk.bf16.mxu0 %vm7635_vm1, %v7634_v16 }
 0x770   : > { %6776 = vmatprep.subr.bf16.mxu0 %v7634_v16 }
 0x773   : > { %6777 = vmatpush3.bf16.msra.mxu0 %v7318_v31  ;;  %v6039_v31 = vld [vmem:[%s9044_s6 + $0x8] sm:$0xf] }
 0x774   : > { %6778 = vmatprep.subr.bf16.mxu0 %v7634_v16 }
 0x777   : > { %6779 = vmatpush3.bf16.msra.mxu0 %v7319_v32  ;;  %v1699_v32 = vsel %vm1281_vm6, %v6039_v31, 0 }
 0x778   : > { %6794 = vmatprep.subr.bf16.mxu0 %v7634_v16 }
 0x77a   : > { %6781 = vmatmul.mubr.msk.bf16.vlgmr.msra.gmra.mrb[20].mxu0 %vm588_vm0, %v7839_v39 }
 0x77b   : > { %6796 = vmatprep.mubr.msk.bf16.mxu0 %vm7635_vm1, %v7634_v16 }
 0x839   : > { %v1268_v33 = vpop.f32.mrb[12].mxu0 }
 0x83a   : > { %v6750_v34 = vpop.f32.mrb[13].mxu0 }
 0x83b   : > { %v1271_v35 = vpop.f32.mrb[14].mxu0 }
 0x83c   : > { %v1275_v37 = vpack.c.bf16 %v1271_v35, %v1268_v33  ;;  %v6751_v38 = vpop.f32.mrb[15].mxu0 }
 0x83e   : > { %6755 = vmatmul.mubr.msk.bf16.vlgmr.msra.gmra.mrb[24].mxu1 %vm834_vm2, %v1275_v37 }
 0x83f   : > { %6765 = vmatpush3.bf16.msra.mxu1 %v7320_v36  ;;  %6770 = vmatprep.mubr.msk.bf16.mxu1 %vm7635_vm1, %v7634_v16 }
 0x840   : > { %6766 = vmatprep.subr.bf16.mxu1 %v7634_v16 }
 0x841   : > { %v1366_v41 = vpop.f32.mrb[16].mxu0 }
 0x842   : > { %v6762_v42 = vpop.f32.mrb[17].mxu0 }
 0x843   : > { %6767 = vmatpush3.bf16.msra.mxu1 %v7321_v40  ;;  %v1369_v43 = vpop.f32.mrb[18].mxu0  ;;  %v7326_v40 = vld [vmem:[%s9078_s3 + $0x48] sm:$0xff]   ;;  %v7327_v42 = vld [vmem:[%s9078_s3 + $0x50] sm:$0xff]  }
 0x844   : > { %v6763_v45 = vpop.f32.mrb[19].mxu0  ;;  %6768 = vmatprep.subr.bf16.mxu1 %v7634_v16 }
 0x845   : > { %v7330_v45 = vld [vmem:[%s9043_s5 + $0x50] sm:$0xff]  }
 0x847   : > { %6769 = vmatpush3.bf16.msra.mxu1 %v7322_v44  ;;  %v7329_v44 = vld [vmem:[%s9043_s5 + $0x48] sm:$0xff]  }
 0x848   : > { %6784 = vmatprep.subr.bf16.mxu1 %v7634_v16 }
 0x84a   : > { %6771 = vmatmul.mubr.msk.bf16.vlgmr.msra.gmra.mrb[28].mxu1 %vm588_vm0, %v7839_v39 }
 0x84b   : > { %6785 = vmatpush3.bf16.msra.mxu1 %v7323_v46  ;;  %6790 = vmatprep.mubr.msk.bf16.mxu1 %vm7635_vm1, %v7634_v16  ;;  %v7331_v46 = vld [vmem:[%s9043_s5 + $0x58] sm:$0xff]  }
 0x84c   : > { %6786 = vmatprep.subr.bf16.mxu1 %v7634_v16 }
 0x84d   : > { %v1498_v48 = vpop.f32.mrb[20].mxu0 }
 0x84e   : > { %v6782_v49 = vpop.f32.mrb[21].mxu0 }
 0x84f   : > { %v1501_v50 = vpop.f32.mrb[22].mxu0  ;;  %6787 = vmatpush3.bf16.msra.mxu1 %v7324_v47 }
 0x850   : > { %v1573_v52 = vpack.c.bf16 %v1501_v50, %v1498_v48  ;;  %v6783_v53 = vpop.f32.mrb[23].mxu0  ;;  %6788 = vmatprep.subr.bf16.mxu1 %v7634_v16  ;;  %v7332_v50 = vld [vmem:[%s9042_s4 + $0x48] sm:$0xff]  }
 0x851   : > { %v7333_v53 = vld [vmem:[%s9042_s4 + $0x50] sm:$0xff]  }
 0x852   : > { %v1578_v54 = vsel %vm834_vm2, %v1573_v52, 0 }
 0x853   : > { %6789 = vmatpush3.bf16.msra.mxu1 %v7325_v51  ;;  %6795 = vmatpush3.bf16.xpose.msra.mxu0 %v1578_v54  ;;  %v7334_v54 = vld [vmem:[%s9042_s4 + $0x58] sm:$0xff]  }
 0x854   : > { %6800 = vmatprep.subr.bf16.mxu1 %v7634_v16  ;;  %6806 = vmatprep.subr.bf16.mxu0 %v7634_v16 }
 0x856   : > { %6791 = vmatmul.mubr.msk.bf16.vlgmr.msra.gmra.mrb[32].mxu1 %vm588_vm0, %v7839_v39 }
 0x857   : > { %6802 = vmatprep.mubr.msk.bf16.mxu1 %vm7635_vm1, %v7634_v16 }
 0x911   : > { %v1319_v55 = vpop.f32.mrb[24].mxu1 }
 0x912   : > { %v8023_v56 = vadd.f32 %v1366_v41, %v1319_v55  ;;  %v6756_v57 = vpop.f32.mrb[25].mxu1 }
 0x913   : > { %v1322_v59 = vpop.f32.mrb[26].mxu1 }
 0x914   : > { %v8025_v60 = vadd.f32 %v1369_v43, %v1322_v59  ;;  %v6757_v61 = vpop.f32.mrb[27].mxu1  ;;  %v7328_v43 = vld [vmem:[%s9078_s3 + $0x58] sm:$0xff]  }
 0x91d   : > { %v1432_v63 = vpop.f32.mrb[28].mxu1 }
 0x91e   : > { %v6772_v1 = vpop.f32.mrb[29].mxu1 }
 0x91f   : > { %v1435_v2 = vpop.f32.mrb[30].mxu1 }
 0x920   : > { %v1572_v3 = vpack.c.bf16 %v1435_v2, %v1432_v63  ;;  %v6773_v4 = vpop.f32.mrb[31].mxu1 }
 0x922   : > { %6797 = vmatmul.mubr.msk.bf16.vlgmr.msra.gmra.mrb[24].mxu0 %vm834_vm2, %v1572_v3 }
 0x923   : > { %6808 = vmatprep.mubr.msk.bf16.mxu0 %vm7635_vm1, %v7634_v16  ;;  %6807 = vmatpush3.bf16.msra.mxu0 %v1699_v32 }
 0x924   : > { %6822 = vmatprep.subr.bf16.mxu0 %v7634_v16 }
 0x929   : > { %v1564_v5 = vpop.f32.mrb[32].mxu1 }
 0x92a   : > { %v6792_v6 = vpop.f32.mrb[33].mxu1 }
 0x92b   : > { %v1567_v58 = vpop.f32.mrb[34].mxu1 }
 0x92c   : > { %v1571_v62 = vpack.c.bf16 %v1567_v58, %v1564_v5  ;;  %v6793_v0 = vpop.f32.mrb[35].mxu1 }
 0x92e   : > { %6801 = vmatpush3.bf16.msra.mxu1 %v1571_v62 }
 0x92f   : > { %6812 = vmatprep.subr.bf16.mxu1 %v7634_v16 }
 0x9f5   : > { %v1614_v7 = vpop.f32.mrb[24].mxu0 }
 0x9f6   : > { %v1621_v8 = vmul.f32 0.14433756, %v1614_v7  ;;  %v6798_v9 = vpop.f32.mrb[25].mxu0 }
 0x9f7   : > { %v1617_v11 = vpop.f32.mrb[26].mxu0 }
 0x9f8   : > { %v1622_v12 = vmul.f32 0.14433756, %v1617_v11  ;;  %v6799_v13 = vpop.f32.mrb[27].mxu0  ;;  %v1623_v14 = vadd.f32 %v1621_v8, %v7908_v15 }
 0x9fa   : > { %v1625_v17 = vsel %vm886_vm5, %v1623_v14, -inf  ;;  %v1624_v18 = vadd.f32 %v1622_v12, %v7910_v20 }
 0x9fb   : > { %1626 = vmax.xlane.f32.xlu0 %v1625_v17 }
 0x9fc   : > { %v1628_v19 = vsel %vm886_vm5, %v1624_v18, -inf }
 0x9fd   : > { %1629 = vmax.xlane.f32.xlu1 %v1628_v19 }
 0xa88   : > { %v1627_v21 = vpop.xlane.xlu0 %1626 }
 0xa89   : > { %v1631_v22 = vsub.f32 %v1623_v14, %v1627_v21 }
 0xa8a   : > { %v1630_v23 = vpop.xlane.xlu1 %1629 }
 0xa8b   : > { %v1633_v24 = vmul.f32 1.442695, %v1631_v22  ;;  %v1632_v25 = vsub.f32 %v1624_v18, %v1630_v23 }
 0xa8d   : > { %7472 = vpow2.f32 %v1633_v24  ;;  %v1635_v26 = vmul.f32 1.442695, %v1632_v25 }
 0xa8f   : > { %7474 = vpow2.f32 %v1635_v26 }
 0xa97   : > { %v7473_v27 = vpop.eup %7472 }
 0xa98   : > { %v1637_v28 = vsel %vm886_vm5, %v7473_v27, 0.0 }
 0xa99   : > { %v7475_v29 = vpop.eup %7474  ;;  %1638 = vadd.xlane.f32.xlu0 %v1637_v28 }
 0xa9a   : > { %v1640_v30 = vsel %vm886_vm5, %v7475_v29, 0.0 }
 0xa9b   : > { %1641 = vadd.xlane.f32.xlu1 %v1640_v30 }
 0xb26   : > { %v1639_v33 = vpop.xlane.xlu0 %1638 }
 0xb27   : > { %7476 = vrcp.f32 %v1639_v33 }
 0xb28   : > { %v1642_v34 = vpop.xlane.xlu1 %1641 }
 0xb29   : > { %7478 = vrcp.f32 %v1642_v34 }
 0xb31   : > { %v7477_v35 = vpop.eup %7476 }
 0xb32   : > { %v1645_v37 = vmul.f32 %v7477_v35, %v7473_v27 }
 0xb33   : > { %v7479_v36 = vpop.eup %7478 }
 0xb34   : > { %v1646_v38 = vmul.f32 %v7479_v36, %v7475_v29 }
 0xb36   : > { %v1647_v41 = vpack.c.bf16 %v1646_v38, %v1645_v37  ;;  %v6073_v37 = vld [vmem:[%s9044_s6 + $0xc] sm:$0xf] }
 0xb37   : > { %v2070_v38 = vsel %vm1281_vm6, %v6073_v37, 0 }
 0xb38   : > { %6803 = vmatmul.mubr.msk.bf16.vlgmr.msra.gmra.mrb[36].mxu1 %vm886_vm5, %v1647_v41 }
 0xb39   : > { %6813 = vmatpush3.bf16.msra.mxu1 %v7326_v40  ;;  %6818 = vmatprep.mubr.msk.bf16.mxu1 %vm7635_vm1, %v7634_v16 }
 0xb3a   : > { %6814 = vmatprep.subr.bf16.mxu1 %v7634_v16 }
 0xb3d   : > { %6815 = vmatpush3.bf16.msra.mxu1 %v7327_v42 }
 0xb3e   : > { %6816 = vmatprep.subr.bf16.mxu1 %v7634_v16 }
 0xb41   : > { %6817 = vmatpush3.bf16.msra.mxu1 %v7328_v43 }
 0xb42   : > { %6832 = vmatprep.subr.bf16.mxu1 %v7634_v16 }
 0xb44   : > { %6819 = vmatmul.mubr.msk.bf16.vlgmr.msra.gmra.mrb[40].mxu1 %vm588_vm0, %v7839_v39 }
 0xb45   : > { %6833 = vmatpush3.bf16.msra.mxu1 %v7329_v44  ;;  %6838 = vmatprep.mubr.msk.bf16.mxu1 %vm7635_vm1, %v7634_v16 }
 0xb46   : > { %6834 = vmatprep.subr.bf16.mxu1 %v7634_v16 }
 0xb49   : > { %6835 = vmatpush3.bf16.msra.mxu1 %v7330_v45 }
 0xb4a   : > { %6836 = vmatprep.subr.bf16.mxu1 %v7634_v16 }
 0xb4d   : > { %6837 = vmatpush3.bf16.msra.mxu1 %v7331_v46  ;;  %v7335_v46 = vld [vmem:[%s9078_s3 + $0x60] sm:$0xff]  }
 0xb4e   : > { %6854 = vmatprep.subr.bf16.mxu1 %v7634_v16 }
 0xb50   : > { %6839 = vmatmul.mubr.msk.bf16.vlgmr.msra.gmra.mrb[44].mxu1 %vm588_vm0, %v7839_v39 }
 0xb51   : > { %6856 = vmatprep.mubr.msk.bf16.mxu1 %vm7635_vm1, %v7634_v16  ;;  %6855 = vmatpush3.bf16.msra.mxu1 %v2070_v38 }
 0xb52   : > { %6870 = vmatprep.subr.bf16.mxu1 %v7634_v16 }
 0xc0b   : > { %v1685_v47 = vpop.f32.mrb[36].mxu1 }
 0xc0c   : > { %v6804_v48 = vpop.f32.mrb[37].mxu1 }
 0xc0d   : > { %v1688_v49 = vpop.f32.mrb[38].mxu1  ;;  %v7336_v48 = vld [vmem:[%s9078_s3 + $0x68] sm:$0xff]  }
 0xc0e   : > { %v1692_v51 = vpack.c.bf16 %v1688_v49, %v1685_v47  ;;  %v6805_v52 = vpop.f32.mrb[39].mxu1  ;;  %v7337_v49 = vld [vmem:[%s9078_s3 + $0x70] sm:$0xff]  }
 0xc0f   : > { %v7340_v52 = vld [vmem:[%s9043_s5 + $0x70] sm:$0xff]  }
 0xc10   : > { %6809 = vmatmul.mubr.msk.bf16.vlgmr.msra.gmra.mrb[28].mxu0 %vm834_vm2, %v1692_v51  ;;  %v7339_v51 = vld [vmem:[%s9043_s5 + $0x68] sm:$0xff]  }
 0xc11   : > { %6823 = vmatpush3.bf16.msra.mxu0 %v7332_v50  ;;  %6828 = vmatprep.mubr.msk.bf16.mxu0 %vm7635_vm1, %v7634_v16  ;;  %v7338_v50 = vld [vmem:[%s9043_s5 + $0x60] sm:$0xff]  }
 0xc12   : > { %6824 = vmatprep.subr.bf16.mxu0 %v7634_v16 }
 0xc15   : > { %6825 = vmatpush3.bf16.msra.mxu0 %v7333_v53 }
 0xc16   : > { %6826 = vmatprep.subr.bf16.mxu0 %v7634_v16 }
 0xc17   : > { %v1803_v55 = vpop.f32.mrb[40].mxu1 }
 0xc18   : > { %v6820_v57 = vpop.f32.mrb[41].mxu1 }
 0xc19   : > { %v1806_v59 = vpop.f32.mrb[42].mxu1  ;;  %6827 = vmatpush3.bf16.msra.mxu0 %v7334_v54  ;;  %v7341_v57 = vld [vmem:[%s9042_s4 + $0x60] sm:$0xff]  }
 0xc1a   : > { %v1943_v61 = vpack.c.bf16 %v1806_v59, %v1803_v55  ;;  %v6821_v63 = vpop.f32.mrb[43].mxu1  ;;  %6842 = vmatprep.subr.bf16.mxu0 %v7634_v16 }
 0xc1b   : > { %v7342_v63 = vld [vmem:[%s9042_s4 + $0x68] sm:$0xff]  }
 0xc1c   : > { %6829 = vmatmul.mubr.msk.bf16.vlgmr.msra.gmra.mrb[32].mxu0 %vm588_vm0, %v7839_v39 }
 0xc1d   : > { %6844 = vmatprep.mubr.msk.bf16.mxu0 %vm7635_vm1, %v7634_v16 }
 0xc23   : > { %v1935_v1 = vpop.f32.mrb[44].mxu1 }
 0xc24   : > { %v6840_v2 = vpop.f32.mrb[45].mxu1 }
 0xc25   : > { %v1938_v3 = vpop.f32.mrb[46].mxu1 }
 0xc26   : > { %v1942_v4 = vpack.c.bf16 %v1938_v3, %v1935_v1  ;;  %v6841_v5 = vpop.f32.mrb[47].mxu1  ;;  %v7343_v1 = vld [vmem:[%s9042_s4 + $0x70] sm:$0xff]  }
 0xce3   : > { %v1735_v6 = vpop.f32.mrb[28].mxu0 }
 0xce4   : > { %v8097_v58 = vadd.f32 %v1735_v6, %v8023_v56  ;;  %v6810_v62 = vpop.f32.mrb[29].mxu0 }
 0xce5   : > { %v1738_v0 = vpop.f32.mrb[30].mxu0 }
 0xce6   : > { %v8100_v7 = vadd.f32 %v1738_v0, %v8025_v60  ;;  %v6811_v8 = vpop.f32.mrb[31].mxu0 }
 0xcef   : > { %v1869_v9 = vpop.f32.mrb[32].mxu0 }
 0xcf0   : > { %v6830_v11 = vpop.f32.mrb[33].mxu0 }
 0xcf1   : > { %v1872_v12 = vpop.f32.mrb[34].mxu0 }
 0xcf2   : > { %v1944_v13 = vpack.c.bf16 %v1872_v12, %v1869_v9  ;;  %v6831_v14 = vpop.f32.mrb[35].mxu0 }
 0xcf4   : > { %v1949_v17 = vsel %vm834_vm2, %v1944_v13, 0 }
 0xcf5   : > { %6843 = vmatpush3.bf16.xpose.msra.mxu0 %v1949_v17 }
 0xcf6   : > { %6848 = vmatprep.subr.bf16.mxu0 %v7634_v16 }
 0xcfc   : > { %6845 = vmatmul.mubr.msk.bf16.vlgmr.msra.gmra.mrb[36].mxu0 %vm834_vm2, %v1943_v61 }
 0xcfd   : > { %6849 = vmatpush3.bf16.msra.mxu0 %v1942_v4  ;;  %6850 = vmatprep.mubr.msk.bf16.mxu0 %vm7635_vm1, %v7634_v16 }
 0xcfe   : > { %6860 = vmatprep.subr.bf16.mxu0 %v7634_v16 }
 0xdcf   : > { %v1985_v56 = vpop.f32.mrb[36].mxu0 }
 0xdd0   : > { %v1992_v60 = vmul.f32 0.14433756, %v1985_v56  ;;  %v6846_v18 = vpop.f32.mrb[37].mxu0 }
 0xdd1   : > { %v1988_v19 = vpop.f32.mrb[38].mxu0 }
 0xdd2   : > { %v1993_v21 = vmul.f32 0.14433756, %v1988_v19  ;;  %v6847_v22 = vpop.f32.mrb[39].mxu0  ;;  %v1994_v23 = vadd.f32 %v1992_v60, %v7908_v15 }
 0xdd4   : > { %v1996_v24 = vsel %vm886_vm5, %v1994_v23, -inf  ;;  %v1995_v25 = vadd.f32 %v1993_v21, %v7910_v20 }
 0xdd5   : > { %1997 = vmax.xlane.f32.xlu0 %v1996_v24 }
 0xdd6   : > { %v1999_v26 = vsel %vm886_vm5, %v1995_v25, -inf }
 0xdd7   : > { %2000 = vmax.xlane.f32.xlu1 %v1999_v26 }
 0xe62   : > { %v1998_v27 = vpop.xlane.xlu0 %1997 }
 0xe63   : > { %v2002_v28 = vsub.f32 %v1994_v23, %v1998_v27 }
 0xe64   : > { %v2001_v29 = vpop.xlane.xlu1 %2000 }
 0xe65   : > { %v2004_v30 = vmul.f32 1.442695, %v2002_v28  ;;  %v2003_v31 = vsub.f32 %v1995_v25, %v2001_v29 }
 0xe67   : > { %7480 = vpow2.f32 %v2004_v30  ;;  %v2006_v32 = vmul.f32 1.442695, %v2003_v31 }
 0xe69   : > { %7482 = vpow2.f32 %v2006_v32 }
 0xe71   : > { %v7481_v33 = vpop.eup %7480 }
 0xe72   : > { %v2008_v34 = vsel %vm886_vm5, %v7481_v33, 0.0 }
 0xe73   : > { %v7483_v35 = vpop.eup %7482  ;;  %2009 = vadd.xlane.f32.xlu0 %v2008_v34 }
 0xe74   : > { %v2011_v36 = vsel %vm886_vm5, %v7483_v35, 0.0 }
 0xe75   : > { %2012 = vadd.xlane.f32.xlu1 %v2011_v36 }
 0xf00   : > { %v2010_v40 = vpop.xlane.xlu0 %2009 }
 0xf01   : > { %7484 = vrcp.f32 %v2010_v40 }
 0xf02   : > { %v2013_v41 = vpop.xlane.xlu1 %2012 }
 0xf03   : > { %7486 = vrcp.f32 %v2013_v41 }
 0xf0b   : > { %v7485_v42 = vpop.eup %7484 }
 0xf0c   : > { %v2016_v44 = vmul.f32 %v7485_v42, %v7481_v33 }
 0xf0d   : > { %v7487_v43 = vpop.eup %7486 }
 0xf0e   : > { %v2017_v45 = vmul.f32 %v7487_v43, %v7483_v35 }
 0xf10   : > { %v2018_v47 = vpack.c.bf16 %v2017_v45, %v2016_v44  ;;  %v6107_v44 = vld [vmem:[%s9044_s6 + $0x10] sm:$0xf] }
 0xf11   : > { %v2441_v45 = vsel %vm1281_vm6, %v6107_v44, 0 }
 0xf12   : > { %6851 = vmatmul.mubr.msk.bf16.vlgmr.msra.gmra.mrb[40].mxu0 %vm886_vm5, %v2018_v47 }
 0xf13   : > { %6861 = vmatpush3.bf16.msra.mxu0 %v7335_v46  ;;  %6866 = vmatprep.mubr.msk.bf16.mxu0 %vm7635_vm1, %v7634_v16 }
 0xf14   : > { %6862 = vmatprep.subr.bf16.mxu0 %v7634_v16 }
 0xf17   : > { %6863 = vmatpush3.bf16.msra.mxu0 %v7336_v48 }
 0xf18   : > { %6864 = vmatprep.subr.bf16.mxu0 %v7634_v16 }
 0xf1b   : > { %6865 = vmatpush3.bf16.msra.mxu0 %v7337_v49 }
 0xf1c   : > { %6880 = vmatprep.subr.bf16.mxu0 %v7634_v16 }
 0xf1e   : > { %6867 = vmatmul.mubr.msk.bf16.vlgmr.msra.gmra.mrb[44].mxu0 %vm588_vm0, %v7839_v39 }
 0xf1f   : > { %6881 = vmatpush3.bf16.msra.mxu0 %v7338_v50  ;;  %6886 = vmatprep.mubr.msk.bf16.mxu0 %vm7635_vm1, %v7634_v16 }
 0xf20   : > { %6882 = vmatprep.subr.bf16.mxu0 %v7634_v16 }
 0xf23   : > { %6883 = vmatpush3.bf16.msra.mxu0 %v7339_v51 }
 0xf24   : > { %6884 = vmatprep.subr.bf16.mxu0 %v7634_v16 }
 0xf27   : > { %6885 = vmatpush3.bf16.msra.mxu0 %v7340_v52  ;;  %v7344_v52 = vld [vmem:[%s9078_s3 + $0x78] sm:$0xff]  }
 0xf28   : > { %6902 = vmatprep.subr.bf16.mxu0 %v7634_v16 }
 0xf2a   : > { %6887 = vmatmul.mubr.msk.bf16.vlgmr.msra.gmra.mrb[48].mxu0 %vm588_vm0, %v7839_v39 }
 0xf2b   : > { %6904 = vmatprep.mubr.msk.bf16.mxu0 %vm7635_vm1, %v7634_v16  ;;  %6903 = vmatpush3.bf16.msra.mxu0 %v2441_v45 }
 0xf2c   : > { %6918 = vmatprep.subr.bf16.mxu0 %v7634_v16 }
 0xfe5   : > { %v2056_v53 = vpop.f32.mrb[40].mxu0 }
 0xfe6   : > { %v6852_v54 = vpop.f32.mrb[41].mxu0 }
 0xfe7   : > { %v2059_v55 = vpop.f32.mrb[42].mxu0  ;;  %v7345_v54 = vld [vmem:[%s9078_s3 + $0x80] sm:$0xff]  }
 0xfe8   : > { %v2063_v59 = vpack.c.bf16 %v2059_v55, %v2056_v53  ;;  %v6853_v61 = vpop.f32.mrb[43].mxu0  ;;  %v7346_v55 = vld [vmem:[%s9078_s3 + $0x88] sm:$0xff]  }
 0xfe9   : > { %v7349_v61 = vld [vmem:[%s9043_s5 + $0x88] sm:$0xff]  }
 0xfea   : > { %6857 = vmatmul.mubr.msk.bf16.vlgmr.msra.gmra.mrb[48].mxu1 %vm834_vm2, %v2063_v59  ;;  %v7348_v59 = vld [vmem:[%s9043_s5 + $0x80] sm:$0xff]  }
 0xfeb   : > { %6871 = vmatpush3.bf16.msra.mxu1 %v7341_v57  ;;  %6876 = vmatprep.mubr.msk.bf16.mxu1 %vm7635_vm1, %v7634_v16  ;;  %v7347_v57 = vld [vmem:[%s9043_s5 + $0x78] sm:$0xff]  }
 0xfec   : > { %6872 = vmatprep.subr.bf16.mxu1 %v7634_v16 }
 0xfef   : > { %6873 = vmatpush3.bf16.msra.mxu1 %v7342_v63 }
 0xff0   : > { %6874 = vmatprep.subr.bf16.mxu1 %v7634_v16 }
 0xff1   : > { %v2174_v2 = vpop.f32.mrb[44].mxu0 }
 0xff2   : > { %v6868_v3 = vpop.f32.mrb[45].mxu0 }
 0xff3   : > { %v2177_v4 = vpop.f32.mrb[46].mxu0  ;;  %6875 = vmatpush3.bf16.msra.mxu1 %v7343_v1  ;;  %v7350_v3 = vld [vmem:[%s9042_s4 + $0x78] sm:$0xff]  }
 0xff4   : > { %v2314_v5 = vpack.c.bf16 %v2177_v4, %v2174_v2  ;;  %v6869_v6 = vpop.f32.mrb[47].mxu0  ;;  %6890 = vmatprep.subr.bf16.mxu1 %v7634_v16 }
 0xff5   : > { %v7351_v6 = vld [vmem:[%s9042_s4 + $0x80] sm:$0xff]  }
 0xff6   : > { %6877 = vmatmul.mubr.msk.bf16.vlgmr.msra.gmra.mrb[52].mxu1 %vm588_vm0, %v7839_v39 }
 0xff7   : > { %6892 = vmatprep.mubr.msk.bf16.mxu1 %vm7635_vm1, %v7634_v16 }
 0xffd   : > { %v2306_v62 = vpop.f32.mrb[48].mxu0 }
 0xffe   : > { %v6888_v0 = vpop.f32.mrb[49].mxu0 }
 0xfff   : > { %v2309_v8 = vpop.f32.mrb[50].mxu0 }
0x1000   : > { %v2313_v9 = vpack.c.bf16 %v2309_v8, %v2306_v62  ;;  %v6889_v11 = vpop.f32.mrb[51].mxu0  ;;  %v7352_v62 = vld [vmem:[%s9042_s4 + $0x88] sm:$0xff]  }
0x10bd   : > { %v2106_v12 = vpop.f32.mrb[48].mxu1 }
0x10be   : > { %v8174_v13 = vadd.f32 %v2106_v12, %v8097_v58  ;;  %v6858_v14 = vpop.f32.mrb[49].mxu1 }
0x10bf   : > { %v2109_v17 = vpop.f32.mrb[50].mxu1 }
0x10c0   : > { %v8177_v56 = vadd.f32 %v2109_v17, %v8100_v7  ;;  %v6859_v60 = vpop.f32.mrb[51].mxu1 }
0x10c9   : > { %v2240_v18 = vpop.f32.mrb[52].mxu1 }
0x10ca   : > { %v6878_v19 = vpop.f32.mrb[53].mxu1 }
0x10cb   : > { %v2243_v21 = vpop.f32.mrb[54].mxu1 }
0x10cc   : > { %v2315_v22 = vpack.c.bf16 %v2243_v21, %v2240_v18  ;;  %v6879_v23 = vpop.f32.mrb[55].mxu1 }
0x10ce   : > { %v2320_v24 = vsel %vm834_vm2, %v2315_v22, 0 }
0x10cf   : > { %6891 = vmatpush3.bf16.xpose.msra.mxu1 %v2320_v24 }
0x10d0   : > { %6896 = vmatprep.subr.bf16.mxu1 %v7634_v16 }
0x10d6   : > { %6893 = vmatmul.mubr.msk.bf16.vlgmr.msra.gmra.mrb[56].mxu1 %vm834_vm2, %v2314_v5 }
0x10d7   : > { %6897 = vmatpush3.bf16.msra.mxu1 %v2313_v9  ;;  %6898 = vmatprep.mubr.msk.bf16.mxu1 %vm7635_vm1, %v7634_v16 }
0x10d8   : > { %6908 = vmatprep.subr.bf16.mxu1 %v7634_v16 }
0x11a9   : > { %v2356_v58 = vpop.f32.mrb[56].mxu1 }
0x11aa   : > { %v2363_v7 = vmul.f32 0.14433756, %v2356_v58  ;;  %v6894_v25 = vpop.f32.mrb[57].mxu1 }
0x11ab   : > { %v2359_v26 = vpop.f32.mrb[58].mxu1 }
0x11ac   : > { %v2364_v27 = vmul.f32 0.14433756, %v2359_v26  ;;  %v6895_v28 = vpop.f32.mrb[59].mxu1  ;;  %v2365_v29 = vadd.f32 %v2363_v7, %v7908_v15 }
0x11ae   : > { %v2367_v30 = vsel %vm886_vm5, %v2365_v29, -inf  ;;  %v2366_v31 = vadd.f32 %v2364_v27, %v7910_v20 }
0x11af   : > { %2368 = vmax.xlane.f32.xlu0 %v2367_v30 }
0x11b0   : > { %v2370_v32 = vsel %vm886_vm5, %v2366_v31, -inf }
0x11b1   : > { %2371 = vmax.xlane.f32.xlu1 %v2370_v32 }
0x123c   : > { %v2369_v33 = vpop.xlane.xlu0 %2368 }
0x123d   : > { %v2373_v34 = vsub.f32 %v2365_v29, %v2369_v33 }
0x123e   : > { %v2372_v35 = vpop.xlane.xlu1 %2371 }
0x123f   : > { %v2375_v36 = vmul.f32 1.442695, %v2373_v34  ;;  %v2374_v37 = vsub.f32 %v2366_v31, %v2372_v35 }
0x1241   : > { %7488 = vpow2.f32 %v2375_v36  ;;  %v2377_v38 = vmul.f32 1.442695, %v2374_v37 }
0x1243   : > { %7490 = vpow2.f32 %v2377_v38 }
0x124b   : > { %v7489_v40 = vpop.eup %7488 }
0x124c   : > { %v2379_v41 = vsel %vm886_vm5, %v7489_v40, 0.0 }
0x124d   : > { %v7491_v42 = vpop.eup %7490  ;;  %2380 = vadd.xlane.f32.xlu0 %v2379_v41 }
0x124e   : > { %v2382_v43 = vsel %vm886_vm5, %v7491_v42, 0.0 }
0x124f   : > { %2383 = vadd.xlane.f32.xlu1 %v2382_v43 }
0x12da   : > { %v2381_v46 = vpop.xlane.xlu0 %2380 }
0x12db   : > { %7492 = vrcp.f32 %v2381_v46 }
0x12dc   : > { %v2384_v47 = vpop.xlane.xlu1 %2383 }
0x12dd   : > { %7494 = vrcp.f32 %v2384_v47 }
0x12e5   : > { %v7493_v48 = vpop.eup %7492 }
0x12e6   : > { %v2387_v50 = vmul.f32 %v7493_v48, %v7489_v40 }
0x12e7   : > { %v7495_v49 = vpop.eup %7494 }
0x12e8   : > { %v2388_v51 = vmul.f32 %v7495_v49, %v7491_v42  ;;  %v6141_v49 = vld [vmem:[%s9044_s6 + $0x14] sm:$0xf] }
0x12ea   : > { %v2389_v53 = vpack.c.bf16 %v2388_v51, %v2387_v50  ;;  %v2812_v50 = vsel %vm1281_vm6, %v6141_v49, 0 }
0x12ec   : > { %6899 = vmatmul.mubr.msk.bf16.vlgmr.msra.gmra.mrb[60].mxu1 %vm886_vm5, %v2389_v53 }
0x12ed   : > { %6909 = vmatpush3.bf16.msra.mxu1 %v7344_v52  ;;  %6914 = vmatprep.mubr.msk.bf16.mxu1 %vm7635_vm1, %v7634_v16 }
0x12ee   : > { %6910 = vmatprep.subr.bf16.mxu1 %v7634_v16 }
0x12f1   : > { %6911 = vmatpush3.bf16.msra.mxu1 %v7345_v54 }
0x12f2   : > { %6912 = vmatprep.subr.bf16.mxu1 %v7634_v16 }
0x12f5   : > { %6913 = vmatpush3.bf16.msra.mxu1 %v7346_v55 }
0x12f6   : > { %6928 = vmatprep.subr.bf16.mxu1 %v7634_v16 }
0x12f8   : > { %6915 = vmatmul.mubr.msk.bf16.vlgmr.msra.gmra.mrb[64].mxu1 %vm588_vm0, %v7839_v39 }
0x12f9   : > { %6929 = vmatpush3.bf16.msra.mxu1 %v7347_v57  ;;  %6934 = vmatprep.mubr.msk.bf16.mxu1 %vm7635_vm1, %v7634_v16 }
0x12fa   : > { %6930 = vmatprep.subr.bf16.mxu1 %v7634_v16 }
0x12fd   : > { %6931 = vmatpush3.bf16.msra.mxu1 %v7348_v59 }
0x12fe   : > { %6932 = vmatprep.subr.bf16.mxu1 %v7634_v16 }
0x1301   : > { %6933 = vmatpush3.bf16.msra.mxu1 %v7349_v61 }
0x1302   : > { %6950 = vmatprep.subr.bf16.mxu1 %v7634_v16 }
0x1304   : > { %6935 = vmatmul.mubr.msk.bf16.vlgmr.msra.gmra.mrb[68].mxu1 %vm588_vm0, %v7839_v39 }
0x1305   : > { %6952 = vmatprep.mubr.msk.bf16.mxu1 %vm7635_vm1, %v7634_v16  ;;  %6951 = vmatpush3.bf16.msra.mxu1 %v2812_v50 }
0x13bf   : > { %v2427_v63 = vpop.f32.mrb[60].mxu1 }
0x13c0   : > { %v6900_v1 = vpop.f32.mrb[61].mxu1 }
0x13c1   : > { %v2430_v2 = vpop.f32.mrb[62].mxu1 }
0x13c2   : > { %v2434_v4 = vpack.c.bf16 %v2430_v2, %v2427_v63  ;;  %v6901_v5 = vpop.f32.mrb[63].mxu1 }
0x13c4   : > { %6905 = vmatmul.mubr.msk.bf16.vlgmr.msra.gmra.mrb[52].mxu0 %vm834_vm2, %v2434_v4 }
0x13c5   : > { %6919 = vmatpush3.bf16.msra.mxu0 %v7350_v3  ;;  %6924 = vmatprep.mubr.msk.bf16.mxu0 %vm7635_vm1, %v7634_v16 }
0x13c6   : > { %6920 = vmatprep.subr.bf16.mxu0 %v7634_v16 }
0x13c9   : > { %6921 = vmatpush3.bf16.msra.mxu0 %v7351_v6 }
0x13ca   : > { %6922 = vmatprep.subr.bf16.mxu0 %v7634_v16 }
0x13cb   : > { %v2545_v0 = vpop.f32.mrb[64].mxu1 }
0x13cc   : > { %v6916_v8 = vpop.f32.mrb[65].mxu1 }
0x13cd   : > { %v2548_v9 = vpop.f32.mrb[66].mxu1  ;;  %6923 = vmatpush3.bf16.msra.mxu0 %v7352_v62  ;;  %v6143_v62 = vld [vmem:[%s9045_s7] ss:$0 sm:$0xff] }
0x13ce   : > { %v2685_v11 = vpack.c.bf16 %v2548_v9, %v2545_v0  ;;  %v6917_v12 = vpop.f32.mrb[67].mxu1  ;;  %6938 = vmatprep.subr.bf16.mxu0 %v7634_v16  ;;  %v7568_v8 = vld [vmem:[%s7789_s21] sm:$0xff] }
0x13d0   : > { %6925 = vmatmul.mubr.msk.bf16.vlgmr.msra.gmra.mrb[56].mxu0 %vm588_vm0, %v7839_v39 }
0x13d1   : > { %6940 = vmatprep.mubr.msk.bf16.mxu0 %vm7635_vm1, %v7634_v16 }
0x13d7   : > { %v2677_v14 = vpop.f32.mrb[68].mxu1 }
0x13d8   : > { %v6936_v17 = vpop.f32.mrb[69].mxu1 }
0x13d9   : > { %v2680_v60 = vpop.f32.mrb[70].mxu1  ;;  %v7569_v17 = vld [vmem:[%s7789_s21 + $0x8] sm:$0xff]  ;;  %s6447_s21 = sshll.u32 %s7757_s0, 8  ;;  %s7570_s0 = scalar_lea.vmem %s8990_s1, 256 }
0x13da   : > { %v2684_v18 = vpack.c.bf16 %v2680_v60, %v2677_v14  ;;  %v6937_v19 = vpop.f32.mrb[71].mxu1  ;;  %s8995_s27 = scalar_lea.hbm %s9056_s18, %s6447_s21  ;;  %p7571_p11 = scmp.ne.s32.totalorder %s8990_s1, %s7570_s0 }
0x13dc   : > { %p7572_p12 = pnand %p7571_p11, %p7774_p5 }
0x13de   : > { %p7573_p13 = pneg %p7572_p12 }
0x1497   : > { %v2477_v21 = vpop.f32.mrb[52].mxu0 }
0x1498   : > { %v2484_v22 = vadd.f32 %v2477_v21, %v8174_v13  ;;  %v6906_v23 = vpop.f32.mrb[53].mxu0 }
0x1499   : > { %v2480_v24 = vpop.f32.mrb[54].mxu0 }
0x149a   : > { %v8252_v58 = vadd.f32 %v2480_v24, %v8177_v56  ;;  %v6907_v7 = vpop.f32.mrb[55].mxu0 }
0x14a3   : > { %v2611_v25 = vpop.f32.mrb[56].mxu0 }
0x14a4   : > { %v6926_v26 = vpop.f32.mrb[57].mxu0 }
0x14a5   : > { %v2614_v39 = vpop.f32.mrb[58].mxu0 }
0x14a6   : > { %v2686_v27 = vpack.c.bf16 %v2614_v39, %v2611_v25  ;;  %v6927_v28 = vpop.f32.mrb[59].mxu0 }
0x14a8   : > { %v2691_v29 = vsel %vm834_vm2, %v2686_v27, 0 }
0x14a9   : > { %6939 = vmatpush3.bf16.xpose.msra.mxu0 %v2691_v29  ;;  %v7355_v29 = vld [vmem:[%s9048_s10 + $0x4] ss:$8 sps:$4 sm:$0xff]  }
0x14aa   : > { %6944 = vmatprep.subr.bf16.mxu0 %v7634_v16 }
0x14b0   : > { %6941 = vmatmul.mubr.msk.bf16.vlgmr.msra.gmra.mrb[60].mxu0 %vm834_vm2, %v2685_v11 }
0x14b1   : > { %6945 = vmatpush3.bf16.msra.mxu0 %v2684_v18  ;;  %6946 = vmatprep.mubr.msk.bf16.mxu0 %vm7635_vm1, %v7634_v16 }
0x14b2   : > { %2964 = vmatprep.subr.bf16.mxu0 %v7355_v29 }
0x1583   : > { %v2727_v13 = vpop.f32.mrb[60].mxu0 }
0x1584   : > { %v2734_v56 = vmul.f32 0.14433756, %v2727_v13  ;;  %v6942_v30 = vpop.f32.mrb[61].mxu0  ;;  %v7353_v13 = vld [vmem:[%s9048_s10] ss:$8 sps:$4 sm:$0xff]  }
0x1585   : > { %v2730_v31 = vpop.f32.mrb[62].mxu0  ;;  %v7356_v30 = vld [vmem:[%s9048_s10 + $0x10] ss:$8 sps:$4 sm:$0xff]  }
0x1586   : > { %v2735_v32 = vmul.f32 0.14433756, %v2730_v31  ;;  %v6943_v33 = vpop.f32.mrb[63].mxu0  ;;  %v2736_v34 = vadd.f32 %v2734_v56, %v7908_v15  ;;  %v7358_v56 = vld [vmem:[%s9048_s10 + $0x14] ss:$8 sps:$4 sm:$0xff]  }
0x1587   : > { %v7359_v31 = vld [vmem:[%s9048_s10 + $0x20] ss:$8 sps:$4 sm:$0xff]   ;;  %v7637_v33 = vmov 0  }
0x1588   : > { %v2738_v35 = vsel %vm886_vm5, %v2736_v34, -inf  ;;  %v2737_v36 = vadd.f32 %v2735_v32, %v7910_v20  ;;  %v7361_v32 = vld [vmem:[%s9048_s10 + $0x24] ss:$8 sps:$4 sm:$0xff]   ;;  %3113 = vmatprep.subr.bf16.mxu1 %v7637_v33 }
0x1589   : > { %2739 = vmax.xlane.f32.xlu0 %v2738_v35  ;;  %v7363_v35 = vld [vmem:[%s9050_s12 + $0x8] sm:$0xff]  }
0x158a   : > { %v2741_v37 = vsel %vm886_vm5, %v2737_v36, -inf }
0x158b   : > { %2742 = vmax.xlane.f32.xlu1 %v2741_v37  ;;  %v7365_v37 = vld [vmem:[%s9050_s12 + $0x18] sm:$0xff]  }
0x1616   : > { %v2740_v38 = vpop.xlane.xlu0 %2739 }
0x1617   : > { %v2744_v40 = vsub.f32 %v2736_v34, %v2740_v38  ;;  %v7362_v34 = vld [vmem:[%s9050_s12] sm:$0xff]  }
0x1618   : > { %v2743_v41 = vpop.xlane.xlu1 %2742  ;;  %v7366_v38 = vld [vmem:[%s9050_s12 + $0x20] sm:$0xff]  }
0x1619   : > { %v2746_v42 = vmul.f32 1.442695, %v2744_v40  ;;  %v2745_v43 = vsub.f32 %v2737_v36, %v2743_v41  ;;  %v7364_v36 = vld [vmem:[%s9050_s12 + $0x10] sm:$0xff]   ;;  %v7367_v40 = vld [vmem:[%s9050_s12 + $0x28] sm:$0xff]  }
0x161a   : > { %v7368_v41 = vld [vmem:[%s9050_s12 + $0x30] sm:$0xff]  }
0x161b   : > { %7496 = vpow2.f32 %v2746_v42  ;;  %v2748_v44 = vmul.f32 1.442695, %v2745_v43  ;;  %v7369_v42 = vld [vmem:[%s9050_s12 + $0x38] sm:$0xff]   ;;  %v7370_v43 = vld [vmem:[%s9050_s12 + $0x40] sm:$0xff]  }
0x161d   : > { %7498 = vpow2.f32 %v2748_v44 }
0x1625   : > { %v7497_v45 = vpop.eup %7496 }
0x1626   : > { %v2750_v46 = vsel %vm886_vm5, %v7497_v45, 0.0 }
0x1627   : > { %v7499_v47 = vpop.eup %7498  ;;  %2751 = vadd.xlane.f32.xlu0 %v2750_v46 }
0x1628   : > { %v2753_v48 = vsel %vm886_vm5, %v7499_v47, 0.0 }
0x1629   : > { %2754 = vadd.xlane.f32.xlu1 %v2753_v48 }
0x16b4   : > { %v2752_v51 = vpop.xlane.xlu0 %2751 }
0x16b5   : > { %7500 = vrcp.f32 %v2752_v51  ;;  %v6144_v51 = vld [vmem:[%s9046_s8] ss:$0 sm:$0xff] }
0x16b6   : > { %v2755_v52 = vpop.xlane.xlu1 %2754 }
0x16b7   : > { %7502 = vrcp.f32 %v2755_v52 }
0x16bf   : > { %v7501_v53 = vpop.eup %7500 }
0x16c0   : > { %v2758_v55 = vmul.f32 %v7501_v53, %v7497_v45 }
0x16c1   : > { %v7503_v54 = vpop.eup %7502 }
0x16c2   : > { %v2759_v57 = vmul.f32 %v7503_v54, %v7499_v47 }
0x16c4   : > { %v2760_v59 = vpack.c.bf16 %v2759_v57, %v2758_v55  ;;  %v6145_v57 = vld [vmem:[%s9047_s9] ss:$0 sm:$0xff] }
0x16c6   : > { %6947 = vmatmul.mubr.msk.bf16.vlgmr.msra.gmra.mrb[64].mxu0 %vm886_vm5, %v2760_v59 }
0x16c7   : > { %2965 = vmatpush1.bf16.msra.mxu0 %v7353_v13  ;;  %2996 = vmatprep.mubr.bf16.mxu0 %v7637_v33 }
0x16c8   : > { %2966 = vmatprep.subr.bf16.mxu0 %v7358_v56 }
0x16cb   : > { %2967 = vmatpush1.bf16.msra.mxu0 %v7356_v30 }
0x16cc   : > { %2968 = vmatprep.subr.bf16.mxu0 %v7361_v32 }
0x16cf   : > { %2969 = vmatpush1.bf16.msra.mxu0 %v7359_v31 }
0x16d0   : > { %6956 = vmatprep.subr.bf16.mxu0 %v7634_v16 }
0x1799   : > { %v2798_v61 = vpop.f32.mrb[64].mxu0 }
0x179a   : > { %v6948_v63 = vpop.f32.mrb[65].mxu0 }
0x179b   : > { %v2801_v1 = vpop.f32.mrb[66].mxu0 }
0x179c   : > { %v2805_v2 = vpack.c.bf16 %v2801_v1, %v2798_v61  ;;  %v6949_v3 = vpop.f32.mrb[67].mxu0 }
0x179d   : > { %v7372_v3 = vld [vmem:[%s9050_s12 + $0x50] sm:$0xff]  }
0x179e   : > { %6953 = vmatmul.mubr.msk.bf16.vlgmr.msra.gmra.mrb[72].mxu1 %vm834_vm2, %v2805_v2  ;;  %v7371_v2 = vld [vmem:[%s9050_s12 + $0x48] sm:$0xff]  }
0x179f   : > { %3114 = vmatpush1.bf16.msra.mxu1 %v7362_v34 }
0x17a0   : > { %3115 = vmatprep.subr.bf16.mxu1 %v7637_v33 }
0x17a3   : > { %3116 = vmatpush1.bf16.msra.mxu1 %v7363_v35 }
0x17a4   : > { %3117 = vmatprep.subr.bf16.mxu1 %v7637_v33 }
0x17a7   : > { %3118 = vmatpush1.bf16.msra.mxu1 %v7364_v36 }
0x17a8   : > { %3119 = vmatprep.subr.bf16.mxu1 %v7637_v33 }
0x17ab   : > { %3120 = vmatpush1.bf16.msra.mxu1 %v7365_v37 }
0x17ac   : > { %3121 = vmatprep.subr.bf16.mxu1 %v7637_v33 }
0x17af   : > { %3122 = vmatpush1.bf16.msra.mxu1 %v7366_v38 }
0x17b0   : > { %3123 = vmatprep.subr.bf16.mxu1 %v7637_v33 }
0x17b3   : > { %3124 = vmatpush1.bf16.msra.mxu1 %v7367_v40 }
0x17b4   : > { %3125 = vmatprep.subr.bf16.mxu1 %v7637_v33 }
0x17b7   : > { %3126 = vmatpush1.bf16.msra.mxu1 %v7368_v41 }
0x17b8   : > { %3127 = vmatprep.subr.bf16.mxu1 %v7637_v33 }
0x17bb   : > { %3128 = vmatpush1.bf16.msra.mxu1 %v7369_v42 }
0x17bc   : > { %3129 = vmatprep.subr.bf16.mxu1 %v7637_v33 }
0x17bf   : > { %3130 = vmatpush1.bf16.msra.mxu1 %v7370_v43 }
0x17c0   : > { %3131 = vmatprep.subr.bf16.mxu1 %v7637_v33 }
0x17c3   : > { %3132 = vmatpush1.bf16.msra.mxu1 %v7371_v2 }
0x17c4   : > { %3133 = vmatprep.subr.bf16.mxu1 %v7637_v33 }
0x17c7   : > { %3134 = vmatpush1.bf16.msra.mxu1 %v7372_v3 }
0x17c8   : > { %3135 = vmatprep.subr.bf16.mxu1 %v7637_v33 }
0x1871   : > { %v2848_v4 = vpop.f32.mrb[72].mxu1 }
0x1872   : > { %v2855_v5 = vadd.f32 %v2848_v4, %v2484_v22  ;;  %v6954_v6 = vpop.f32.mrb[73].mxu1  ;;  %v7373_v4 = vld [vmem:[%s9050_s12 + $0x58] sm:$0xff]  }
0x1873   : > { %v2851_v0 = vpop.f32.mrb[74].mxu1  ;;  %3136 = vmatpush1.bf16.msra.mxu1 %v7373_v4  ;;  %v2919_v6 = vld [vmem:[%s9049_s11] sm:$0x3] }
0x1874   : > { %v2857_v9 = vadd.f32 %v7568_v8, %v2855_v5  ;;  %v2856_v11 = vadd.f32 %v2851_v0, %v8252_v58  ;;  %v6955_v12 = vpop.f32.mrb[75].mxu1  ;;  %6992 = vmatprep.subr.bf16.mxu1 %v7634_v16  ;;  %v2923_v5 = vsub.s32 0, %v7904_v10 }
0x1876   : > { %v8276_v14 = vadd.f32 %v6143_v62, %v2857_v9  ;;  %v2858_v60 = vadd.f32 %v7569_v17, %v2856_v11  ;;  %v2924_v0 = vrot.slane %v2919_v6, %v2923_v5 }
0x1878   : > { %v8279_v18 = vadd.f32 %v6143_v62, %v2858_v60  ;;  %v2870_v19 = vsel %vm588_vm0, %v8276_v14, 0.0  ;;  %v2927_v62 = vsub.s32 1, %v7904_v10  ;;  %v6433_v10 = vld [vmem:[%s9051_s13 + $0x1] ss:$0 sm:$0xff] }
0x1879   : > { %2871 = vadd.xlane.f32.xlu0 %v2870_v19 }
0x187a   : > { %v2873_v21 = vsel %vm588_vm0, %v8279_v18, 0.0  ;;  %v2928_v8 = vrot.slane %v2919_v6, %v2927_v62  ;;  %v7377_v6 = vld [vmem:[%s9042_s4 + $0x90] sm:$0xff]  }
0x187b   : > { %2874 = vadd.xlane.f32.xlu1 %v2873_v21 }
0x1906   : > { %v2872_v22 = vpop.xlane.xlu0 %2871 }
0x1907   : > { %v2876_v23 = vmul.f32 0.020833334, %v2872_v22 }
0x1908   : > { %v2875_v24 = vpop.xlane.xlu1 %2874 }
0x1909   : > { %v2878_v58 = vsub.f32 %v8276_v14, %v2876_v23  ;;  %v2877_v7 = vmul.f32 0.020833334, %v2875_v24 }
0x190b   : > { %v8287_v25 = vsub.f32 %v8279_v18, %v2877_v7  ;;  %v2880_v26 = vmul.f32 %v2878_v58, %v2878_v58 }
0x190d   : > { %v2882_v39 = vsel %vm588_vm0, %v2880_v26, 0.0  ;;  %v2881_v27 = vmul.f32 %v8287_v25, %v8287_v25 }
0x190e   : > { %2883 = vadd.xlane.f32.xlu0 %v2882_v39 }
0x190f   : > { %v2885_v28 = vsel %vm588_vm0, %v2881_v27, 0.0  ;;  %v6166_v27 = vld [vmem:[%s9051_s13] ss:$0 sm:$0xff] }
0x1910   : > { %2886 = vadd.xlane.f32.xlu1 %v2885_v28 }
0x199b   : > { %v2884_v44 = vpop.xlane.xlu0 %2883 }
0x199c   : > { %v2888_v45 = vmul.f32 0.020833334, %v2884_v44 }
0x199d   : > { %v2887_v46 = vpop.xlane.xlu1 %2886 }
0x199e   : > { %v2890_v47 = vadd.f32 1e-05, %v2888_v45  ;;  %v2889_v48 = vmul.f32 0.020833334, %v2887_v46  ;;  %v7374_v45 = vld [vmem:[%s9078_s3 + $0x90] sm:$0xff]   ;;  %v7375_v46 = vld [vmem:[%s9078_s3 + $0x98] sm:$0xff]  }
0x19a0   : > { %7504 = vrsqrt.f32 %v2890_v47  ;;  %v2891_v49 = vadd.f32 1e-05, %v2889_v48  ;;  %v7376_v47 = vld [vmem:[%s9078_s3 + $0xa0] sm:$0xff]  }
0x19a2   : > { %7506 = vrsqrt.f32 %v2891_v49 }
0x19aa   : > { %v7505_v50 = vpop.eup %7504 }
0x19ab   : > { %v2894_v52 = vmul.f32 %v7505_v50, %v2878_v58 }
0x19ac   : > { %v7507_v53 = vpop.eup %7506 }
0x19ad   : > { %v2902_v54 = vmul.f32 %v6144_v51, %v2894_v52  ;;  %v2895_v55 = vmul.f32 %v7507_v53, %v8287_v25 }
0x19af   : > { %v2903_v59 = vmul.f32 %v6144_v51, %v2895_v55  ;;  %v2910_v61 = vadd.f32 %v6145_v57, %v2902_v54  ;;  %v6169_v55 = vld [vmem:[%s9079_s22 + $0x1] ss:$0 sm:$0xff] }
0x19b1   : > { %v2911_v63 = vadd.f32 %v6145_v57, %v2903_v59 }
0x19b3   : > { %v2912_v1 = vpack.c.bf16 %v2911_v63, %v2910_v61 }
0x19b5   : > { %6152 = vmatmul.mubr.msk.bf16.vlgmr.msra.gmra.mrb[68].mxu0 %vm588_vm0, %v2912_v1  ;;  %v6170_v1 = vld [vmem:[%s9080_s25 + $0x1] ss:$0 sm:$0xff] }
0x19b6   : > { %6962 = vmatprep.mubr.msk.bf16.mxu0 %vm7635_vm1, %v7634_v16  ;;  %6957 = vmatpush3.bf16.msra.mxu0 %v7374_v45 }
0x19b7   : > { %6958 = vmatprep.subr.bf16.mxu0 %v7634_v16 }
0x19ba   : > { %6959 = vmatpush3.bf16.msra.mxu0 %v7375_v46 }
0x19bb   : > { %6960 = vmatprep.subr.bf16.mxu0 %v7634_v16 }
0x19be   : > { %6961 = vmatpush3.bf16.msra.mxu0 %v7376_v47 }
0x19bf   : > { %6966 = vmatprep.subr.bf16.mxu0 %v7634_v16 }
0x1a88   : > { %v2998_v9 = vpop.f32.mrb[68].mxu0 }
0x1a89   : > { %v2999_v11 = vadd.f32 %v2998_v9, %v2924_v0  ;;  %v3000_v12 = vpop.f32.mrb[69].mxu0  ;;  %v7379_v9 = vld [vmem:[%s9042_s4 + $0xa0] sm:$0xff]  }
0x1a8a   : > { %v3001_v17 = vadd.f32 %v3000_v12, %v2928_v8  ;;  %v3002_v60 = vpop.f32.mrb[70].mxu0  ;;  %v7381_v12 = vld [vmem:[%s9043_s5 + $0x98] sm:$0xff]  }
0x1a8b   : > { %v3003_v19 = vadd.f32 %v3002_v60, %v2924_v0  ;;  %v3004_v21 = vpop.f32.mrb[71].mxu0  ;;  %v3007_v23 = vmax.f32 %v2999_v11, 0.0  ;;  %v7380_v11 = vld [vmem:[%s9043_s5 + $0x90] sm:$0xff]  }
0x1a8c   : > { %v3005_v22 = vadd.f32 %v3004_v21, %v2928_v8  ;;  %v3008_v58 = vmax.f32 %v3001_v17, 0.0  ;;  %v7378_v8 = vld [vmem:[%s9042_s4 + $0x98] sm:$0xff]   ;;  %v7382_v17 = vld [vmem:[%s9043_s5 + $0xa0] sm:$0xff]  }
0x1a8d   : > { %v3009_v24 = vmax.f32 %v3003_v19, 0.0 }
0x1a8e   : > { %v3010_v7 = vmax.f32 %v3005_v22, 0.0 }
0x1a8f   : > { %v3011_v25 = vpack.c.bf16 %v3009_v24, %v3007_v23 }
0x1a90   : > { %v3012_v26 = vpack.c.bf16 %v3010_v7, %v3008_v58 }
0x1a92   : > { %6165 = vmatprep.mubr.msk.bf16.mxu1 %vm3109_vm7, %v3012_v26 }
0x1a93   : > { %3146 = vmatmul.mubr.bf16.vlgmr.msra.gmra.mrb[76].mxu1 %v3011_v25 }
0x1a94   : > { %6994 = vmatprep.mubr.msk.bf16.mxu1 %vm7635_vm1, %v7634_v16 }
0x1b66   : > { %v3147_v39 = vpop.f32.mrb[76].mxu1 }
0x1b67   : > { %v3154_v28 = vadd.f32 %v3147_v39, %v8276_v14  ;;  %v3149_v29 = vpop.f32.mrb[77].mxu1 }
0x1b68   : > { %v3150_v13 = vpop.f32.mrb[78].mxu1 }
0x1b69   : > { %v8388_v56 = vadd.f32 %v6166_v27, %v3154_v28  ;;  %v3155_v30 = vadd.f32 %v3150_v13, %v8279_v18  ;;  %v3152_v31 = vpop.f32.mrb[79].mxu1 }
0x1b6b   : > { %v8391_v32 = vadd.f32 %v6166_v27, %v3155_v30  ;;  %v3169_v34 = vsel %vm588_vm0, %v8388_v56, 0.0  ;;  %v7383_v27 = vld [vmem:[%s9078_s3 + $0xa8] sm:$0xff]   ;;  %v7384_v30 = vld [vmem:[%s9078_s3 + $0xb0] sm:$0xff]  }
0x1b6c   : > { %3170 = vadd.xlane.f32.xlu0 %v3169_v34 }
0x1b6d   : > { %v3172_v35 = vsel %vm588_vm0, %v8391_v32, 0.0 }
0x1b6e   : > { %3173 = vadd.xlane.f32.xlu1 %v3172_v35  ;;  %v7385_v35 = vld [vmem:[%s9078_s3 + $0xb8] sm:$0xff]  }
0x1bf9   : > { %v3171_v36 = vpop.xlane.xlu0 %3170 }
0x1bfa   : > { %v3175_v37 = vmul.f32 0.020833334, %v3171_v36  ;;  %v7386_v36 = vld [vmem:[%s9043_s5 + $0xa8] sm:$0xff]  }
0x1bfb   : > { %v3174_v14 = vpop.xlane.xlu1 %3173 }
0x1bfc   : > { %v3177_v38 = vsub.f32 %v8388_v56, %v3175_v37  ;;  %v3176_v40 = vmul.f32 0.020833334, %v3174_v14  ;;  %v7387_v37 = vld [vmem:[%s9043_s5 + $0xb0] sm:$0xff]   ;;  %v7388_v14 = vld [vmem:[%s9043_s5 + $0xb8] sm:$0xff]  }
0x1bfe   : > { %v3178_v41 = vsub.f32 %v8391_v32, %v3176_v40  ;;  %v3179_v18 = vmul.f32 %v3177_v38, %v3177_v38 }
0x1c00   : > { %v3181_v42 = vsel %vm588_vm0, %v3179_v18, 0.0  ;;  %v3180_v43 = vmul.f32 %v3178_v41, %v3178_v41 }
0x1c01   : > { %3182 = vadd.xlane.f32.xlu0 %v3181_v42 }
0x1c02   : > { %v3184_v44 = vsel %vm588_vm0, %v3180_v43, 0.0 }
0x1c03   : > { %3185 = vadd.xlane.f32.xlu1 %v3184_v44 }
0x1c8e   : > { %v3183_v48 = vpop.xlane.xlu0 %3182 }
0x1c8f   : > { %v3187_v49 = vmul.f32 0.020833334, %v3183_v48 }
0x1c90   : > { %v3186_v50 = vpop.xlane.xlu1 %3185 }
0x1c91   : > { %v3189_v51 = vadd.f32 1e-05, %v3187_v49  ;;  %v3188_v52 = vmul.f32 0.020833334, %v3186_v50 }
0x1c93   : > { %7508 = vrsqrt.f32 %v3189_v51  ;;  %v3190_v53 = vadd.f32 1e-05, %v3188_v52 }
0x1c95   : > { %7510 = vrsqrt.f32 %v3190_v53 }
0x1c9d   : > { %v7509_v54 = vpop.eup %7508 }
0x1c9e   : > { %v3193_v57 = vmul.f32 %v7509_v54, %v3177_v38 }
0x1c9f   : > { %v7511_v59 = vpop.eup %7510 }
0x1ca0   : > { %v3201_v61 = vmul.f32 %v6169_v55, %v3193_v57  ;;  %v3194_v63 = vmul.f32 %v7511_v59, %v3178_v41 }
0x1ca2   : > { %v3202_v2 = vmul.f32 %v6169_v55, %v3194_v63  ;;  %v3209_v3 = vadd.f32 %v6170_v1, %v3201_v61 }
0x1ca4   : > { %v3210_v4 = vadd.f32 %v6170_v1, %v3202_v2 }
0x1ca6   : > { %v8422_v0 = vpack.c.bf16 %v3210_v4, %v3209_v3 }
0x1ca8   : > { %6963 = vmatmul.mubr.msk.bf16.vlgmr.msra.gmra.mrb[72].mxu0 %vm588_vm0, %v8422_v0 }
0x1ca9   : > { %6967 = vmatpush3.bf16.msra.mxu0 %v7377_v6  ;;  %6972 = vmatprep.mubr.msk.bf16.mxu0 %vm7635_vm1, %v7634_v16 }
0x1caa   : > { %6968 = vmatprep.subr.bf16.mxu0 %v7634_v16 }
0x1cad   : > { %6969 = vmatpush3.bf16.msra.mxu0 %v7378_v8 }
0x1cae   : > { %6970 = vmatprep.subr.bf16.mxu0 %v7634_v16 }
0x1cb1   : > { %6971 = vmatpush3.bf16.msra.mxu0 %v7379_v9 }
0x1cb2   : > { %6976 = vmatprep.subr.bf16.mxu0 %v7634_v16 }
0x1cb4   : > { %6973 = vmatmul.mubr.msk.bf16.vlgmr.msra.gmra.mrb[76].mxu0 %vm588_vm0, %v8422_v0 }
0x1cb5   : > { %6977 = vmatpush3.bf16.msra.mxu0 %v7380_v11  ;;  %6982 = vmatprep.mubr.msk.bf16.mxu0 %vm7635_vm1, %v7634_v16 }
0x1cb6   : > { %6978 = vmatprep.subr.bf16.mxu0 %v7634_v16 }
0x1cb9   : > { %6979 = vmatpush3.bf16.msra.mxu0 %v7381_v12 }
0x1cba   : > { %6980 = vmatprep.subr.bf16.mxu0 %v7634_v16 }
0x1cbd   : > { %6981 = vmatpush3.bf16.msra.mxu0 %v7382_v17 }
0x1cbe   : > { %6986 = vmatprep.subr.bf16.mxu0 %v7634_v16 }
0x1cc0   : > { %6983 = vmatmul.mubr.msk.bf16.vlgmr.msra.gmra.mrb[80].mxu0 %vm588_vm0, %v8422_v0 }
0x1cc1   : > { %6988 = vmatprep.mubr.msk.bf16.mxu0 %vm7635_vm1, %v7634_v16 }
0x1d7b   : > { %v3274_v60 = vpop.f32.mrb[72].mxu0 }
0x1d7c   : > { %v6964_v19 = vpop.f32.mrb[73].mxu0 }
0x1d7d   : > { %v3277_v21 = vpop.f32.mrb[74].mxu0 }
0x1d7e   : > { %v3414_v22 = vpack.c.bf16 %v3277_v21, %v3274_v60  ;;  %v6965_v23 = vpop.f32.mrb[75].mxu0 }
0x1d7f   : > { %v7389_v23 = vld [vmem:[%s9042_s4 + $0xa8] sm:$0xff]  }
0x1d87   : > { %v3340_v24 = vpop.f32.mrb[76].mxu0 }
0x1d88   : > { %v6974_v58 = vpop.f32.mrb[77].mxu0 }
0x1d89   : > { %v3343_v7 = vpop.f32.mrb[78].mxu0  ;;  %v7390_v58 = vld [vmem:[%s9042_s4 + $0xb0] sm:$0xff]  }
0x1d8a   : > { %v3415_v25 = vpack.c.bf16 %v3343_v7, %v3340_v24  ;;  %v6975_v26 = vpop.f32.mrb[79].mxu0  ;;  %v7391_v7 = vld [vmem:[%s9042_s4 + $0xb8] sm:$0xff]  }
0x1d8c   : > { %v3420_v39 = vsel %vm834_vm2, %v3415_v25, 0 }
0x1d8d   : > { %6987 = vmatpush3.bf16.xpose.msra.mxu0 %v3420_v39 }
0x1d8e   : > { %6998 = vmatprep.subr.bf16.mxu0 %v7634_v16 }
0x1d93   : > { %v3406_v28 = vpop.f32.mrb[80].mxu0 }
0x1d94   : > { %v6984_v29 = vpop.f32.mrb[81].mxu0  ;;  %6989 = vmatmul.mubr.msk.bf16.vlgmr.msra.gmra.mrb[84].mxu0 %vm834_vm2, %v3414_v22 }
0x1d95   : > { %v3409_v13 = vpop.f32.mrb[82].mxu0  ;;  %6999 = vmatpush3.bf16.msra.mxu0 %v7383_v27  ;;  %7004 = vmatprep.mubr.msk.bf16.mxu0 %vm7635_vm1, %v7634_v16 }
0x1d96   : > { %v3413_v31 = vpack.c.bf16 %v3409_v13, %v3406_v28  ;;  %v6985_v34 = vpop.f32.mrb[83].mxu0  ;;  %7000 = vmatprep.subr.bf16.mxu0 %v7634_v16 }
0x1d98   : > { %6993 = vmatpush3.bf16.msra.mxu1 %v3413_v31 }
0x1d99   : > { %7001 = vmatpush3.bf16.msra.mxu0 %v7384_v30  ;;  %7008 = vmatprep.subr.bf16.mxu1 %v7634_v16 }
0x1d9a   : > { %7002 = vmatprep.subr.bf16.mxu0 %v7634_v16 }
0x1d9d   : > { %7003 = vmatpush3.bf16.msra.mxu0 %v7385_v35 }
0x1d9e   : > { %7018 = vmatprep.subr.bf16.mxu0 %v7634_v16 }
0x1da0   : > { %7005 = vmatmul.mubr.msk.bf16.vlgmr.msra.gmra.mrb[88].mxu0 %vm588_vm0, %v8422_v0 }
0x1da1   : > { %7019 = vmatpush3.bf16.msra.mxu0 %v7386_v36  ;;  %7024 = vmatprep.mubr.msk.bf16.mxu0 %vm7635_vm1, %v7634_v16 }
0x1da2   : > { %7020 = vmatprep.subr.bf16.mxu0 %v7634_v16 }
0x1da5   : > { %7021 = vmatpush3.bf16.msra.mxu0 %v7387_v37 }
0x1da6   : > { %7022 = vmatprep.subr.bf16.mxu0 %v7634_v16 }
0x1da9   : > { %7023 = vmatpush3.bf16.msra.mxu0 %v7388_v14 }
0x1daa   : > { %7040 = vmatprep.subr.bf16.mxu0 %v7634_v16 }
0x1dac   : > { %7025 = vmatmul.mubr.msk.bf16.vlgmr.msra.gmra.mrb[92].mxu0 %vm588_vm0, %v8422_v0 }
0x1dad   : > { %7042 = vmatprep.mubr.msk.bf16.mxu0 %vm7635_vm1, %v7634_v16 }
0x1e67   : > { %v3456_v38 = vpop.f32.mrb[84].mxu0 }
0x1e68   : > { %v3463_v40 = vmul.f32 0.14433756, %v3456_v38  ;;  %v6990_v41 = vpop.f32.mrb[85].mxu0 }
0x1e69   : > { %v3459_v18 = vpop.f32.mrb[86].mxu0 }
0x1e6a   : > { %v3464_v42 = vmul.f32 0.14433756, %v3459_v18  ;;  %v6991_v43 = vpop.f32.mrb[87].mxu0  ;;  %v3465_v44 = vadd.f32 %v3463_v40, %v7908_v15 }
0x1e6c   : > { %v3467_v45 = vsel %vm886_vm5, %v3465_v44, -inf  ;;  %v3466_v46 = vadd.f32 %v3464_v42, %v7910_v20 }
0x1e6d   : > { %3468 = vmax.xlane.f32.xlu0 %v3467_v45 }
0x1e6e   : > { %v3470_v47 = vsel %vm886_vm5, %v3466_v46, -inf }
0x1e6f   : > { %3471 = vmax.xlane.f32.xlu1 %v3470_v47 }
0x1e73   : > { %v3596_v48 = vpop.f32.mrb[88].mxu0 }
0x1e74   : > { %v7006_v49 = vpop.f32.mrb[89].mxu0 }
0x1e75   : > { %v3599_v50 = vpop.f32.mrb[90].mxu0 }
0x1e76   : > { %v3736_v51 = vpack.c.bf16 %v3599_v50, %v3596_v48  ;;  %v7007_v52 = vpop.f32.mrb[91].mxu0 }
0x1e7f   : > { %v3728_v53 = vpop.f32.mrb[92].mxu0 }
0x1e80   : > { %v7026_v54 = vpop.f32.mrb[93].mxu0 }
0x1e81   : > { %v3731_v55 = vpop.f32.mrb[94].mxu0 }
0x1e82   : > { %v3735_v57 = vpack.c.bf16 %v3731_v55, %v3728_v53  ;;  %v7027_v59 = vpop.f32.mrb[95].mxu0  ;;  %v6236_v55 = vld [vmem:[%s9044_s6 + $0x1c] sm:$0xf] }
0x1efa   : > { %v3469_v61 = vpop.xlane.xlu0 %3468 }
0x1efb   : > { %v3473_v63 = vsub.f32 %v3465_v44, %v3469_v61 }
0x1efc   : > { %v3472_v1 = vpop.xlane.xlu1 %3471 }
0x1efd   : > { %v3475_v2 = vmul.f32 1.442695, %v3473_v63  ;;  %v3474_v3 = vsub.f32 %v3466_v46, %v3472_v1 }
0x1eff   : > { %7512 = vpow2.f32 %v3475_v2  ;;  %v3477_v4 = vmul.f32 1.442695, %v3474_v3  ;;  %v6203_v2 = vld [vmem:[%s9044_s6 + $0x18] sm:$0xf] }
0x1f01   : > { %7514 = vpow2.f32 %v3477_v4 }
0x1f09   : > { %v7513_v6 = vpop.eup %7512 }
0x1f0a   : > { %v3479_v8 = vsel %vm886_vm5, %v7513_v6, 0.0 }
0x1f0b   : > { %v7515_v9 = vpop.eup %7514  ;;  %3480 = vadd.xlane.f32.xlu0 %v3479_v8  ;;  %v3910_v8 = vsel %vm1281_vm6, %v6203_v2, 0 }
0x1f0c   : > { %v3482_v11 = vsel %vm886_vm5, %v7515_v9, 0.0 }
0x1f0d   : > { %3483 = vadd.xlane.f32.xlu1 %v3482_v11  ;;  %v7393_v11 = vld [vmem:[%s9042_s4 + $0xc8] sm:$0xff]  }
0x1f98   : > { %v3481_v12 = vpop.xlane.xlu0 %3480 }
0x1f99   : > { %7516 = vrcp.f32 %v3481_v12  ;;  %v7394_v12 = vld [vmem:[%s9042_s4 + $0xd0] sm:$0xff]  }
0x1f9a   : > { %v3484_v17 = vpop.xlane.xlu1 %3483 }
0x1f9b   : > { %7518 = vrcp.f32 %v3484_v17 }
0x1fa3   : > { %v7517_v60 = vpop.eup %7516 }
0x1fa4   : > { %v3487_v21 = vmul.f32 %v7517_v60, %v7513_v6 }
0x1fa5   : > { %v7519_v19 = vpop.eup %7518 }
0x1fa6   : > { %v3488_v22 = vmul.f32 %v7519_v19, %v7515_v9  ;;  %v7392_v9 = vld [vmem:[%s9042_s4 + $0xc0] sm:$0xff]  }
0x1fa8   : > { %v3489_v24 = vpack.c.bf16 %v3488_v22, %v3487_v21  ;;  %v7395_v21 = vld [vmem:[%s9078_s3 + $0xc0] sm:$0xff]  }
0x1faa   : > { %6995 = vmatmul.mubr.msk.bf16.vlgmr.msra.gmra.mrb[80].mxu1 %vm886_vm5, %v3489_v24  ;;  %v7396_v24 = vld [vmem:[%s9078_s3 + $0xc8] sm:$0xff]  }
0x1fab   : > { %7009 = vmatpush3.bf16.msra.mxu1 %v7389_v23  ;;  %7014 = vmatprep.mubr.msk.bf16.mxu1 %vm7635_vm1, %v7634_v16 }
0x1fac   : > { %7010 = vmatprep.subr.bf16.mxu1 %v7634_v16 }
0x1faf   : > { %7011 = vmatpush3.bf16.msra.mxu1 %v7390_v58 }
0x1fb0   : > { %7012 = vmatprep.subr.bf16.mxu1 %v7634_v16 }
0x1fb3   : > { %7013 = vmatpush3.bf16.msra.mxu1 %v7391_v7 }
0x1fb4   : > { %7028 = vmatprep.subr.bf16.mxu1 %v7634_v16 }
0x1fb6   : > { %7015 = vmatmul.mubr.msk.bf16.vlgmr.msra.gmra.mrb[84].mxu1 %vm588_vm0, %v8422_v0 }
0x1fb7   : > { %7030 = vmatprep.mubr.msk.bf16.mxu1 %vm7635_vm1, %v7634_v16 }
0x207d   : > { %v8520_v25 = vpop.f32.mrb[80].mxu1 }
0x207e   : > { %v6996_v26 = vpop.f32.mrb[81].mxu1 }
0x207f   : > { %v3530_v39 = vpop.f32.mrb[82].mxu1  ;;  %v7397_v26 = vld [vmem:[%s9078_s3 + $0xd0] sm:$0xff]  }
0x2080   : > { %v3534_v27 = vpack.c.bf16 %v3530_v39, %v8520_v25  ;;  %v6997_v28 = vpop.f32.mrb[83].mxu1 }
0x2081   : > { %v7399_v28 = vld [vmem:[%s9043_s5 + $0xc8] sm:$0xff]  }
0x2089   : > { %v3662_v29 = vpop.f32.mrb[84].mxu1 }
0x208a   : > { %v7016_v13 = vpop.f32.mrb[85].mxu1 }
0x208b   : > { %v3665_v30 = vpop.f32.mrb[86].mxu1 }
0x208c   : > { %v3737_v31 = vpack.c.bf16 %v3665_v30, %v3662_v29  ;;  %v7017_v34 = vpop.f32.mrb[87].mxu1 }
0x208e   : > { %v3742_v35 = vsel %vm834_vm2, %v3737_v31, 0  ;;  %v7400_v31 = vld [vmem:[%s9043_s5 + $0xd0] sm:$0xff]  }
0x208f   : > { %7029 = vmatpush3.bf16.xpose.msra.mxu1 %v3742_v35 }
0x2090   : > { %7034 = vmatprep.subr.bf16.mxu1 %v7634_v16 }
0x2096   : > { %7031 = vmatmul.mubr.msk.bf16.vlgmr.msra.gmra.mrb[88].mxu1 %vm834_vm2, %v3736_v51 }
0x2097   : > { %7035 = vmatpush3.bf16.msra.mxu1 %v3735_v57  ;;  %7036 = vmatprep.mubr.msk.bf16.mxu1 %vm7635_vm1, %v7634_v16  ;;  %v3863_v57 = vsel %vm1281_vm6, %v6236_v55, 0 }
0x2098   : > { %7046 = vmatprep.subr.bf16.mxu1 %v7634_v16  ;;  %7041 = vmatpush3.bf16.msra.mxu0 %v3863_v57 }
0x2099   : > { %7052 = vmatprep.subr.bf16.mxu0 %v7634_v16 }
0x2169   : > { %v3778_v36 = vpop.f32.mrb[88].mxu1 }
0x216a   : > { %v3785_v37 = vmul.f32 0.14433756, %v3778_v36  ;;  %v7032_v14 = vpop.f32.mrb[89].mxu1 }
0x216b   : > { %v3781_v38 = vpop.f32.mrb[90].mxu1 }
0x216c   : > { %v3786_v40 = vmul.f32 0.14433756, %v3781_v38  ;;  %v7033_v41 = vpop.f32.mrb[91].mxu1  ;;  %v3787_v18 = vadd.f32 %v3785_v37, %v7908_v15 }
0x216e   : > { %v3789_v42 = vsel %vm886_vm5, %v3787_v18, -inf  ;;  %v3788_v43 = vadd.f32 %v3786_v40, %v7910_v20 }
0x216f   : > { %3790 = vmax.xlane.f32.xlu0 %v3789_v42 }
0x2170   : > { %v3792_v44 = vsel %vm886_vm5, %v3788_v43, -inf }
0x2171   : > { %3793 = vmax.xlane.f32.xlu1 %v3792_v44 }
0x21fc   : > { %v3791_v45 = vpop.xlane.xlu0 %3790 }
0x21fd   : > { %v3795_v46 = vsub.f32 %v3787_v18, %v3791_v45 }
0x21fe   : > { %v3794_v47 = vpop.xlane.xlu1 %3793 }
0x21ff   : > { %v3797_v48 = vmul.f32 1.442695, %v3795_v46  ;;  %v3796_v49 = vsub.f32 %v3788_v43, %v3794_v47 }
0x2201   : > { %7520 = vpow2.f32 %v3797_v48  ;;  %v3799_v50 = vmul.f32 1.442695, %v3796_v49 }
0x2203   : > { %7522 = vpow2.f32 %v3799_v50 }
0x220b   : > { %v7521_v51 = vpop.eup %7520 }
0x220c   : > { %v3801_v52 = vsel %vm886_vm5, %v7521_v51, 0.0 }
0x220d   : > { %v7523_v53 = vpop.eup %7522  ;;  %3802 = vadd.xlane.f32.xlu0 %v3801_v52 }
0x220e   : > { %v3804_v54 = vsel %vm886_vm5, %v7523_v53, 0.0 }
0x220f   : > { %3805 = vadd.xlane.f32.xlu1 %v3804_v54 }
0x229a   : > { %v3803_v59 = vpop.xlane.xlu0 %3802 }
0x229b   : > { %7524 = vrcp.f32 %v3803_v59 }
0x229c   : > { %v3806_v61 = vpop.xlane.xlu1 %3805 }
0x229d   : > { %7526 = vrcp.f32 %v3806_v61 }
0x22a5   : > { %v7525_v63 = vpop.eup %7524 }
0x22a6   : > { %v3809_v3 = vmul.f32 %v7525_v63, %v7521_v51 }
0x22a7   : > { %v7527_v1 = vpop.eup %7526 }
0x22a8   : > { %v3810_v4 = vmul.f32 %v7527_v1, %v7523_v53 }
0x22aa   : > { %v3811_v6 = vpack.c.bf16 %v3810_v4, %v3809_v3 }
0x22ac   : > { %7037 = vmatmul.mubr.msk.bf16.vlgmr.msra.gmra.mrb[92].mxu1 %vm886_vm5, %v3811_v6 }
0x22ad   : > { %7047 = vmatpush3.bf16.msra.mxu1 %v3910_v8  ;;  %7048 = vmatprep.mubr.msk.bf16.mxu1 %vm7635_vm1, %v7634_v16 }
0x22ae   : > { %7062 = vmatprep.subr.bf16.mxu1 %v7634_v16 }
0x22b4   : > { %7049 = vmatmul.mubr.msk.bf16.vlgmr.msra.gmra.mrb[96].mxu1 %vm834_vm2, %v3534_v27  ;;  %v7398_v27 = vld [vmem:[%s9043_s5 + $0xc0] sm:$0xff]  }
0x22b5   : > { %7063 = vmatpush3.bf16.msra.mxu1 %v7392_v9  ;;  %7068 = vmatprep.mubr.msk.bf16.mxu1 %vm7635_vm1, %v7634_v16 }
0x22b6   : > { %7064 = vmatprep.subr.bf16.mxu1 %v7634_v16 }
0x22b9   : > { %7065 = vmatpush3.bf16.msra.mxu1 %v7393_v11 }
0x22ba   : > { %7066 = vmatprep.subr.bf16.mxu1 %v7634_v16 }
0x22bd   : > { %7067 = vmatpush3.bf16.msra.mxu1 %v7394_v12 }
0x22be   : > { %7082 = vmatprep.subr.bf16.mxu1 %v7634_v16 }
0x22c0   : > { %7069 = vmatmul.mubr.msk.bf16.vlgmr.msra.gmra.mrb[100].mxu1 %vm588_vm0, %v8422_v0 }
0x22c1   : > { %7084 = vmatprep.mubr.msk.bf16.mxu1 %vm7635_vm1, %v7634_v16 }
0x237f   : > { %v3849_v17 = vpop.f32.mrb[92].mxu1 }
0x2380   : > { %v7038_v60 = vpop.f32.mrb[93].mxu1 }
0x2381   : > { %v3852_v19 = vpop.f32.mrb[94].mxu1 }
0x2382   : > { %v3856_v22 = vpack.c.bf16 %v3852_v19, %v3849_v17  ;;  %v7039_v23 = vpop.f32.mrb[95].mxu1 }
0x2384   : > { %7043 = vmatmul.mubr.msk.bf16.vlgmr.msra.gmra.mrb[96].mxu0 %vm834_vm2, %v3856_v22 }
0x2385   : > { %7053 = vmatpush3.bf16.msra.mxu0 %v7395_v21  ;;  %7058 = vmatprep.mubr.msk.bf16.mxu0 %vm7635_vm1, %v7634_v16  ;;  %v6271_v21 = vld [vmem:[%s9044_s6 + $0x20] sm:$0xf] }
0x2386   : > { %7054 = vmatprep.subr.bf16.mxu0 %v7634_v16  ;;  %v4279_v22 = vsel %vm1281_vm6, %v6271_v21, 0 }
0x2387   : > { %v3946_v58 = vpop.f32.mrb[96].mxu1 }
0x2388   : > { %v7050_v7 = vpop.f32.mrb[97].mxu1 }
0x2389   : > { %7055 = vmatpush3.bf16.msra.mxu0 %v7396_v24  ;;  %v3949_v25 = vpop.f32.mrb[98].mxu1 }
0x238a   : > { %v7051_v39 = vpop.f32.mrb[99].mxu1  ;;  %7056 = vmatprep.subr.bf16.mxu0 %v7634_v16 }
0x238b   : > { %v7401_v39 = vld [vmem:[%s9078_s3 + $0xd8] sm:$0xff]  }
0x238d   : > { %7057 = vmatpush3.bf16.msra.mxu0 %v7397_v26 }
0x238e   : > { %7072 = vmatprep.subr.bf16.mxu0 %v7634_v16 }
0x2390   : > { %7059 = vmatmul.mubr.msk.bf16.vlgmr.msra.gmra.mrb[100].mxu0 %vm588_vm0, %v8422_v0 }
0x2391   : > { %7073 = vmatpush3.bf16.msra.mxu0 %v7398_v27  ;;  %7078 = vmatprep.mubr.msk.bf16.mxu0 %vm7635_vm1, %v7634_v16 }
0x2392   : > { %7074 = vmatprep.subr.bf16.mxu0 %v7634_v16 }
0x2393   : > { %v4078_v29 = vpop.f32.mrb[100].mxu1 }
0x2394   : > { %v7070_v13 = vpop.f32.mrb[101].mxu1 }
0x2395   : > { %v4081_v30 = vpop.f32.mrb[102].mxu1  ;;  %7075 = vmatpush3.bf16.msra.mxu0 %v7399_v28  ;;  %v7402_v28 = vld [vmem:[%s9078_s3 + $0xe0] sm:$0xff]   ;;  %v7404_v13 = vld [vmem:[%s9043_s5 + $0xd8] sm:$0xff]  }
0x2396   : > { %v4153_v34 = vpack.c.bf16 %v4081_v30, %v4078_v29  ;;  %v7071_v35 = vpop.f32.mrb[103].mxu1  ;;  %7076 = vmatprep.subr.bf16.mxu0 %v7634_v16  ;;  %v7403_v29 = vld [vmem:[%s9078_s3 + $0xe8] sm:$0xff]   ;;  %v7405_v30 = vld [vmem:[%s9043_s5 + $0xe0] sm:$0xff]  }
0x2398   : > { %v4158_v36 = vsel %vm834_vm2, %v4153_v34, 0 }
0x2399   : > { %7077 = vmatpush3.bf16.msra.mxu0 %v7400_v31  ;;  %7083 = vmatpush3.bf16.xpose.msra.mxu1 %v4158_v36  ;;  %v7406_v31 = vld [vmem:[%s9043_s5 + $0xe8] sm:$0xff]  }
0x239a   : > { %7088 = vmatprep.subr.bf16.mxu0 %v7634_v16  ;;  %7094 = vmatprep.subr.bf16.mxu1 %v7634_v16 }
0x239c   : > { %7079 = vmatmul.mubr.msk.bf16.vlgmr.msra.gmra.mrb[104].mxu0 %vm588_vm0, %v8422_v0 }
0x239d   : > { %7090 = vmatprep.mubr.msk.bf16.mxu0 %vm7635_vm1, %v7634_v16 }
0x2457   : > { %v3899_v37 = vpop.f32.mrb[96].mxu0 }
0x2458   : > { %v8604_v14 = vadd.f32 %v3946_v58, %v3899_v37  ;;  %v7044_v38 = vpop.f32.mrb[97].mxu0  ;;  %v7407_v37 = vld [vmem:[%s9042_s4 + $0xd8] sm:$0xff]  }
0x2459   : > { %v3902_v40 = vpop.f32.mrb[98].mxu0 }
0x245a   : > { %v8606_v41 = vadd.f32 %v3949_v25, %v3902_v40  ;;  %v7045_v18 = vpop.f32.mrb[99].mxu0 }
0x245b   : > { %v7408_v18 = vld [vmem:[%s9042_s4 + $0xe0] sm:$0xff]  }
0x2463   : > { %v4012_v42 = vpop.f32.mrb[100].mxu0 }
0x2464   : > { %v7060_v43 = vpop.f32.mrb[101].mxu0 }
0x2465   : > { %v4015_v44 = vpop.f32.mrb[102].mxu0 }
0x2466   : > { %v4152_v45 = vpack.c.bf16 %v4015_v44, %v4012_v42  ;;  %v7061_v46 = vpop.f32.mrb[103].mxu0  ;;  %v7409_v42 = vld [vmem:[%s9042_s4 + $0xe8] sm:$0xff]  }
0x2468   : > { %7085 = vmatmul.mubr.msk.bf16.vlgmr.msra.gmra.mrb[104].mxu1 %vm834_vm2, %v4152_v45 }
0x2469   : > { %7096 = vmatprep.mubr.msk.bf16.mxu1 %vm7635_vm1, %v7634_v16  ;;  %7095 = vmatpush3.bf16.msra.mxu1 %v4279_v22 }
0x246a   : > { %7110 = vmatprep.subr.bf16.mxu1 %v7634_v16 }
0x246f   : > { %v4144_v47 = vpop.f32.mrb[104].mxu0 }
0x2470   : > { %v7080_v48 = vpop.f32.mrb[105].mxu0 }
0x2471   : > { %v4147_v49 = vpop.f32.mrb[106].mxu0 }
0x2472   : > { %v4151_v50 = vpack.c.bf16 %v4147_v49, %v4144_v47  ;;  %v7081_v51 = vpop.f32.mrb[107].mxu0 }
0x2474   : > { %7089 = vmatpush3.bf16.msra.mxu0 %v4151_v50 }
0x2475   : > { %7100 = vmatprep.subr.bf16.mxu0 %v7634_v16 }
0x253b   : > { %v4194_v52 = vpop.f32.mrb[104].mxu1 }
0x253c   : > { %v4201_v53 = vmul.f32 0.14433756, %v4194_v52  ;;  %v7086_v54 = vpop.f32.mrb[105].mxu1 }
0x253d   : > { %v4197_v55 = vpop.f32.mrb[106].mxu1 }
0x253e   : > { %v4202_v57 = vmul.f32 0.14433756, %v4197_v55  ;;  %v7087_v59 = vpop.f32.mrb[107].mxu1  ;;  %v4203_v61 = vadd.f32 %v4201_v53, %v7908_v15 }
0x2540   : > { %v4205_v63 = vsel %vm886_vm5, %v4203_v61, -inf  ;;  %v4204_v1 = vadd.f32 %v4202_v57, %v7910_v20 }
0x2541   : > { %4206 = vmax.xlane.f32.xlu0 %v4205_v63 }
0x2542   : > { %v4208_v2 = vsel %vm886_vm5, %v4204_v1, -inf }
0x2543   : > { %4209 = vmax.xlane.f32.xlu1 %v4208_v2 }
0x25ce   : > { %v4207_v3 = vpop.xlane.xlu0 %4206 }
0x25cf   : > { %v4211_v4 = vsub.f32 %v4203_v61, %v4207_v3 }
0x25d0   : > { %v4210_v6 = vpop.xlane.xlu1 %4209 }
0x25d1   : > { %v4213_v8 = vmul.f32 1.442695, %v4211_v4  ;;  %v4212_v9 = vsub.f32 %v4204_v1, %v4210_v6 }
0x25d3   : > { %7528 = vpow2.f32 %v4213_v8  ;;  %v4215_v11 = vmul.f32 1.442695, %v4212_v9 }
0x25d5   : > { %7530 = vpow2.f32 %v4215_v11 }
0x25dd   : > { %v7529_v12 = vpop.eup %7528 }
0x25de   : > { %v4217_v17 = vsel %vm886_vm5, %v7529_v12, 0.0 }
0x25df   : > { %v7531_v60 = vpop.eup %7530  ;;  %4218 = vadd.xlane.f32.xlu0 %v4217_v17 }
0x25e0   : > { %v4220_v19 = vsel %vm886_vm5, %v7531_v60, 0.0 }
0x25e1   : > { %4221 = vadd.xlane.f32.xlu1 %v4220_v19 }
0x266c   : > { %v4219_v23 = vpop.xlane.xlu0 %4218 }
0x266d   : > { %7532 = vrcp.f32 %v4219_v23 }
0x266e   : > { %v4222_v24 = vpop.xlane.xlu1 %4221 }
0x266f   : > { %7534 = vrcp.f32 %v4222_v24 }
0x2677   : > { %v7533_v58 = vpop.eup %7532 }
0x2678   : > { %v4225_v25 = vmul.f32 %v7533_v58, %v7529_v12 }
0x2679   : > { %v7535_v7 = vpop.eup %7534 }
0x267a   : > { %v4226_v26 = vmul.f32 %v7535_v7, %v7531_v60 }
0x267c   : > { %v4227_v27 = vpack.c.bf16 %v4226_v26, %v4225_v25 }
0x267e   : > { %7091 = vmatmul.mubr.msk.bf16.vlgmr.msra.gmra.mrb[108].mxu0 %vm886_vm5, %v4227_v27 }
0x267f   : > { %7101 = vmatpush3.bf16.msra.mxu0 %v7401_v39  ;;  %7106 = vmatprep.mubr.msk.bf16.mxu0 %vm7635_vm1, %v7634_v16 }
0x2680   : > { %7102 = vmatprep.subr.bf16.mxu0 %v7634_v16 }
0x2683   : > { %7103 = vmatpush3.bf16.msra.mxu0 %v7402_v28 }
0x2684   : > { %7104 = vmatprep.subr.bf16.mxu0 %v7634_v16 }
0x2687   : > { %7105 = vmatpush3.bf16.msra.mxu0 %v7403_v29  ;;  %v6305_v29 = vld [vmem:[%s9044_s6 + $0x24] sm:$0xf] }
0x2688   : > { %7120 = vmatprep.subr.bf16.mxu0 %v7634_v16 }
0x268a   : > { %7107 = vmatmul.mubr.msk.bf16.vlgmr.msra.gmra.mrb[112].mxu0 %vm588_vm0, %v8422_v0 }
0x268b   : > { %7121 = vmatpush3.bf16.msra.mxu0 %v7404_v13  ;;  %7126 = vmatprep.mubr.msk.bf16.mxu0 %vm7635_vm1, %v7634_v16  ;;  %v4650_v13 = vsel %vm1281_vm6, %v6305_v29, 0 }
0x268c   : > { %7122 = vmatprep.subr.bf16.mxu0 %v7634_v16 }
0x268f   : > { %7123 = vmatpush3.bf16.msra.mxu0 %v7405_v30 }
0x2690   : > { %7124 = vmatprep.subr.bf16.mxu0 %v7634_v16 }
0x2693   : > { %7125 = vmatpush3.bf16.msra.mxu0 %v7406_v31 }
0x2694   : > { %7142 = vmatprep.subr.bf16.mxu0 %v7634_v16 }
0x2696   : > { %7127 = vmatmul.mubr.msk.bf16.vlgmr.msra.gmra.mrb[116].mxu0 %vm588_vm0, %v8422_v0 }
0x2697   : > { %7144 = vmatprep.mubr.msk.bf16.mxu0 %vm7635_vm1, %v7634_v16  ;;  %7143 = vmatpush3.bf16.msra.mxu0 %v4650_v13 }
0x2698   : > { %7158 = vmatprep.subr.bf16.mxu0 %v7634_v16 }
0x2751   : > { %v4265_v34 = vpop.f32.mrb[108].mxu0 }
0x2752   : > { %v7092_v35 = vpop.f32.mrb[109].mxu0 }
0x2753   : > { %v4268_v36 = vpop.f32.mrb[110].mxu0 }
0x2754   : > { %v4272_v38 = vpack.c.bf16 %v4268_v36, %v4265_v34  ;;  %v7093_v40 = vpop.f32.mrb[111].mxu0 }
0x2756   : > { %7097 = vmatmul.mubr.msk.bf16.vlgmr.msra.gmra.mrb[108].mxu1 %vm834_vm2, %v4272_v38  ;;  %v7410_v38 = vld [vmem:[%s9078_s3 + $0xf0] sm:$0xff]  }
0x2757   : > { %7111 = vmatpush3.bf16.msra.mxu1 %v7407_v37  ;;  %7116 = vmatprep.mubr.msk.bf16.mxu1 %vm7635_vm1, %v7634_v16 }
0x2758   : > { %7112 = vmatprep.subr.bf16.mxu1 %v7634_v16 }
0x275b   : > { %7113 = vmatpush3.bf16.msra.mxu1 %v7408_v18  ;;  %v7411_v18 = vld [vmem:[%s9078_s3 + $0xf8] sm:$0xff]  }
0x275c   : > { %7114 = vmatprep.subr.bf16.mxu1 %v7634_v16 }
0x275d   : > { %v4383_v43 = vpop.f32.mrb[112].mxu0 }
0x275e   : > { %v7108_v44 = vpop.f32.mrb[113].mxu0 }
0x275f   : > { %v4386_v45 = vpop.f32.mrb[114].mxu0  ;;  %7115 = vmatpush3.bf16.msra.mxu1 %v7409_v42  ;;  %v7412_v42 = vld [vmem:[%s9078_s3 + $0x100] sm:$0xff]   ;;  %v7414_v44 = vld [vmem:[%s9043_s5 + $0xf8] sm:$0xff]  }
0x2760   : > { %v4523_v46 = vpack.c.bf16 %v4386_v45, %v4383_v43  ;;  %v7109_v47 = vpop.f32.mrb[115].mxu0  ;;  %7130 = vmatprep.subr.bf16.mxu1 %v7634_v16  ;;  %v7413_v43 = vld [vmem:[%s9043_s5 + $0xf0] sm:$0xff]   ;;  %v7415_v45 = vld [vmem:[%s9043_s5 + $0x100] sm:$0xff]  }
0x2762   : > { %7117 = vmatmul.mubr.msk.bf16.vlgmr.msra.gmra.mrb[112].mxu1 %vm588_vm0, %v8422_v0 }
0x2763   : > { %7132 = vmatprep.mubr.msk.bf16.mxu1 %vm7635_vm1, %v7634_v16 }
0x2769   : > { %v4515_v48 = vpop.f32.mrb[116].mxu0 }
0x276a   : > { %v7128_v49 = vpop.f32.mrb[117].mxu0 }
0x276b   : > { %v4518_v50 = vpop.f32.mrb[118].mxu0  ;;  %v7416_v49 = vld [vmem:[%s9042_s4 + $0xf0] sm:$0xff]  }
0x276c   : > { %v4522_v51 = vpack.c.bf16 %v4518_v50, %v4515_v48  ;;  %v7129_v52 = vpop.f32.mrb[119].mxu0 }
0x276d   : > { %v7417_v52 = vld [vmem:[%s9042_s4 + $0xf8] sm:$0xff]  }
0x2829   : > { %v4315_v53 = vpop.f32.mrb[108].mxu1 }
0x282a   : > { %v8678_v54 = vadd.f32 %v4315_v53, %v8604_v14  ;;  %v7098_v55 = vpop.f32.mrb[109].mxu1  ;;  %v7418_v53 = vld [vmem:[%s9042_s4 + $0x100] sm:$0xff]  }
0x282b   : > { %v4318_v57 = vpop.f32.mrb[110].mxu1 }
0x282c   : > { %v8681_v59 = vadd.f32 %v4318_v57, %v8606_v41  ;;  %v7099_v61 = vpop.f32.mrb[111].mxu1 }
0x2835   : > { %v4449_v63 = vpop.f32.mrb[112].mxu1 }
0x2836   : > { %v7118_v1 = vpop.f32.mrb[113].mxu1 }
0x2837   : > { %v4452_v2 = vpop.f32.mrb[114].mxu1 }
0x2838   : > { %v4524_v3 = vpack.c.bf16 %v4452_v2, %v4449_v63  ;;  %v7119_v4 = vpop.f32.mrb[115].mxu1 }
0x283a   : > { %v4529_v6 = vsel %vm834_vm2, %v4524_v3, 0 }
0x283b   : > { %7131 = vmatpush3.bf16.xpose.msra.mxu1 %v4529_v6 }
0x283c   : > { %7136 = vmatprep.subr.bf16.mxu1 %v7634_v16 }
0x2842   : > { %7133 = vmatmul.mubr.msk.bf16.vlgmr.msra.gmra.mrb[116].mxu1 %vm834_vm2, %v4523_v46 }
0x2843   : > { %7137 = vmatpush3.bf16.msra.mxu1 %v4522_v51  ;;  %7138 = vmatprep.mubr.msk.bf16.mxu1 %vm7635_vm1, %v7634_v16 }
0x2844   : > { %7148 = vmatprep.subr.bf16.mxu1 %v7634_v16 }
0x2915   : > { %v4565_v14 = vpop.f32.mrb[116].mxu1 }
0x2916   : > { %v4572_v41 = vmul.f32 0.14433756, %v4565_v14  ;;  %v7134_v8 = vpop.f32.mrb[117].mxu1 }
0x2917   : > { %v4568_v9 = vpop.f32.mrb[118].mxu1 }
0x2918   : > { %v4573_v11 = vmul.f32 0.14433756, %v4568_v9  ;;  %v7135_v12 = vpop.f32.mrb[119].mxu1  ;;  %v4574_v17 = vadd.f32 %v4572_v41, %v7908_v15 }
0x291a   : > { %v4576_v60 = vsel %vm886_vm5, %v4574_v17, -inf  ;;  %v4575_v19 = vadd.f32 %v4573_v11, %v7910_v20 }
0x291b   : > { %4577 = vmax.xlane.f32.xlu0 %v4576_v60 }
0x291c   : > { %v4579_v21 = vsel %vm886_vm5, %v4575_v19, -inf }
0x291d   : > { %4580 = vmax.xlane.f32.xlu1 %v4579_v21 }
0x29a8   : > { %v4578_v22 = vpop.xlane.xlu0 %4577 }
0x29a9   : > { %v4582_v23 = vsub.f32 %v4574_v17, %v4578_v22 }
0x29aa   : > { %v4581_v24 = vpop.xlane.xlu1 %4580 }
0x29ab   : > { %v4584_v58 = vmul.f32 1.442695, %v4582_v23  ;;  %v4583_v7 = vsub.f32 %v4575_v19, %v4581_v24 }
0x29ad   : > { %7536 = vpow2.f32 %v4584_v58  ;;  %v4586_v25 = vmul.f32 1.442695, %v4583_v7 }
0x29af   : > { %7538 = vpow2.f32 %v4586_v25 }
0x29b7   : > { %v7537_v26 = vpop.eup %7536 }
0x29b8   : > { %v4588_v39 = vsel %vm886_vm5, %v7537_v26, 0.0 }
0x29b9   : > { %v7539_v27 = vpop.eup %7538  ;;  %4589 = vadd.xlane.f32.xlu0 %v4588_v39 }
0x29ba   : > { %v4591_v28 = vsel %vm886_vm5, %v7539_v27, 0.0 }
0x29bb   : > { %4592 = vadd.xlane.f32.xlu1 %v4591_v28 }
0x2a46   : > { %v4590_v30 = vpop.xlane.xlu0 %4589 }
0x2a47   : > { %7540 = vrcp.f32 %v4590_v30 }
0x2a48   : > { %v4593_v31 = vpop.xlane.xlu1 %4592 }
0x2a49   : > { %7542 = vrcp.f32 %v4593_v31 }
0x2a51   : > { %v7541_v34 = vpop.eup %7540 }
0x2a52   : > { %v4596_v36 = vmul.f32 %v7541_v34, %v7537_v26 }
0x2a53   : > { %v7543_v35 = vpop.eup %7542 }
0x2a54   : > { %v4597_v37 = vmul.f32 %v7543_v35, %v7539_v27 }
0x2a56   : > { %v4598_v40 = vpack.c.bf16 %v4597_v37, %v4596_v36 }
0x2a58   : > { %7139 = vmatmul.mubr.msk.bf16.vlgmr.msra.gmra.mrb[120].mxu1 %vm886_vm5, %v4598_v40 }
0x2a59   : > { %7149 = vmatpush3.bf16.msra.mxu1 %v7410_v38  ;;  %7154 = vmatprep.mubr.msk.bf16.mxu1 %vm7635_vm1, %v7634_v16 }
0x2a5a   : > { %7150 = vmatprep.subr.bf16.mxu1 %v7634_v16 }
0x2a5d   : > { %7151 = vmatpush3.bf16.msra.mxu1 %v7411_v18 }
0x2a5e   : > { %7152 = vmatprep.subr.bf16.mxu1 %v7634_v16 }
0x2a61   : > { %7153 = vmatpush3.bf16.msra.mxu1 %v7412_v42  ;;  %v6339_v42 = vld [vmem:[%s9044_s6 + $0x28] sm:$0xf] }
0x2a62   : > { %7168 = vmatprep.subr.bf16.mxu1 %v7634_v16 }
0x2a64   : > { %7155 = vmatmul.mubr.msk.bf16.vlgmr.msra.gmra.mrb[124].mxu1 %vm588_vm0, %v8422_v0 }
0x2a65   : > { %7169 = vmatpush3.bf16.msra.mxu1 %v7413_v43  ;;  %7174 = vmatprep.mubr.msk.bf16.mxu1 %vm7635_vm1, %v7634_v16  ;;  %v5021_v43 = vsel %vm1281_vm6, %v6339_v42, 0 }
0x2a66   : > { %7170 = vmatprep.subr.bf16.mxu1 %v7634_v16 }
0x2a69   : > { %7171 = vmatpush3.bf16.msra.mxu1 %v7414_v44 }
0x2a6a   : > { %7172 = vmatprep.subr.bf16.mxu1 %v7634_v16 }
0x2a6d   : > { %7173 = vmatpush3.bf16.msra.mxu1 %v7415_v45 }
0x2a6e   : > { %7190 = vmatprep.subr.bf16.mxu1 %v7634_v16 }
0x2a70   : > { %7175 = vmatmul.mubr.msk.bf16.vlgmr.msra.gmra.mrb[128].mxu1 %vm588_vm0, %v8422_v0 }
0x2a71   : > { %7192 = vmatprep.mubr.msk.bf16.mxu1 %vm7635_vm1, %v7634_v16  ;;  %7191 = vmatpush3.bf16.msra.mxu1 %v5021_v43 }
0x2a72   : > { %7206 = vmatprep.subr.bf16.mxu1 %v7634_v16 }
0x2b2b   : > { %v4636_v46 = vpop.f32.mrb[120].mxu1 }
0x2b2c   : > { %v7140_v47 = vpop.f32.mrb[121].mxu1 }
0x2b2d   : > { %v4639_v48 = vpop.f32.mrb[122].mxu1 }
0x2b2e   : > { %v4643_v50 = vpack.c.bf16 %v4639_v48, %v4636_v46  ;;  %v7141_v51 = vpop.f32.mrb[123].mxu1 }
0x2b30   : > { %7145 = vmatmul.mubr.msk.bf16.vlgmr.msra.gmra.mrb[120].mxu0 %vm834_vm2, %v4643_v50  ;;  %v7419_v50 = vld [vmem:[%s9078_s3 + $0x108] sm:$0xff]  }
0x2b31   : > { %7159 = vmatpush3.bf16.msra.mxu0 %v7416_v49  ;;  %7164 = vmatprep.mubr.msk.bf16.mxu0 %vm7635_vm1, %v7634_v16 }
0x2b32   : > { %7160 = vmatprep.subr.bf16.mxu0 %v7634_v16 }
0x2b35   : > { %7161 = vmatpush3.bf16.msra.mxu0 %v7417_v52  ;;  %v7420_v52 = vld [vmem:[%s9078_s3 + $0x110] sm:$0xff]  }
0x2b36   : > { %7162 = vmatprep.subr.bf16.mxu0 %v7634_v16 }
0x2b37   : > { %v4754_v55 = vpop.f32.mrb[124].mxu1 }
0x2b38   : > { %v7156_v57 = vpop.f32.mrb[125].mxu1 }
0x2b39   : > { %v4757_v61 = vpop.f32.mrb[126].mxu1  ;;  %7163 = vmatpush3.bf16.msra.mxu0 %v7418_v53  ;;  %v7421_v53 = vld [vmem:[%s9078_s3 + $0x118] sm:$0xff]   ;;  %v7423_v57 = vld [vmem:[%s9043_s5 + $0x110] sm:$0xff]   ;;  %s7576_s3 = scalar_lea.vmem %s7575_s19, 512 }
0x2b3a   : > { %v4894_v63 = vpack.c.bf16 %v4757_v61, %v4754_v55  ;;  %v7157_v1 = vpop.f32.mrb[127].mxu1  ;;  %7178 = vmatprep.subr.bf16.mxu0 %v7634_v16  ;;  %v7422_v55 = vld [vmem:[%s9043_s5 + $0x108] sm:$0xff]   ;;  %v7424_v61 = vld [vmem:[%s9043_s5 + $0x118] sm:$0xff]   ;;  %p7578_p1 = scmp.lt.s32.totalorder %s7576_s3, %s7570_s0 }
0x2b3c   : > { %7165 = vmatmul.mubr.msk.bf16.vlgmr.msra.gmra.mrb[124].mxu0 %vm588_vm0, %v8422_v0  ;;  %p7579_p2 = por %p7578_p1, %p7577_p0 }
0x2b3d   : > { %7180 = vmatprep.mubr.msk.bf16.mxu0 %vm7635_vm1, %v7634_v16 }
0x2b3e   : > { %p7580_p3 = pnand %p7579_p2, %p7573_p13 }
0x2b43   : > { %v4886_v2 = vpop.f32.mrb[128].mxu1 }
0x2b44   : > { %v7176_v3 = vpop.f32.mrb[129].mxu1 }
0x2b45   : > { %v4889_v4 = vpop.f32.mrb[130].mxu1  ;;  %v7425_v3 = vld [vmem:[%s9042_s4 + $0x108] sm:$0xff]  }
0x2b46   : > { %v4893_v6 = vpack.c.bf16 %v4889_v4, %v4886_v2  ;;  %v7177_v14 = vpop.f32.mrb[131].mxu1 }
0x2b47   : > { %v7426_v14 = vld [vmem:[%s9042_s4 + $0x110] sm:$0xff]  }
0x2c03   : > { %v4686_v41 = vpop.f32.mrb[120].mxu0 }
0x2c04   : > { %v8755_v8 = vadd.f32 %v4686_v41, %v8678_v54  ;;  %v7146_v9 = vpop.f32.mrb[121].mxu0  ;;  %v7427_v41 = vld [vmem:[%s9042_s4 + $0x118] sm:$0xff]  }
0x2c05   : > { %v4689_v11 = vpop.f32.mrb[122].mxu0 }
0x2c06   : > { %v8758_v12 = vadd.f32 %v4689_v11, %v8681_v59  ;;  %v7147_v17 = vpop.f32.mrb[123].mxu0 }
0x2c0f   : > { %v4820_v60 = vpop.f32.mrb[124].mxu0 }
0x2c10   : > { %v7166_v19 = vpop.f32.mrb[125].mxu0 }
0x2c11   : > { %v4823_v21 = vpop.f32.mrb[126].mxu0 }
0x2c12   : > { %v4895_v22 = vpack.c.bf16 %v4823_v21, %v4820_v60  ;;  %v7167_v23 = vpop.f32.mrb[127].mxu0 }
0x2c14   : > { %v4900_v24 = vsel %vm834_vm2, %v4895_v22, 0 }
0x2c15   : > { %7179 = vmatpush3.bf16.xpose.msra.mxu0 %v4900_v24 }
0x2c16   : > { %7184 = vmatprep.subr.bf16.mxu0 %v7634_v16 }
0x2c1c   : > { %7181 = vmatmul.mubr.msk.bf16.vlgmr.msra.gmra.mrb[128].mxu0 %vm834_vm2, %v4894_v63 }
0x2c1d   : > { %7185 = vmatpush3.bf16.msra.mxu0 %v4893_v6  ;;  %7186 = vmatprep.mubr.msk.bf16.mxu0 %vm7635_vm1, %v7634_v16 }
0x2c1e   : > { %7196 = vmatprep.subr.bf16.mxu0 %v7634_v16 }
0x2cef   : > { %v4936_v54 = vpop.f32.mrb[128].mxu0 }
0x2cf0   : > { %v4943_v59 = vmul.f32 0.14433756, %v4936_v54  ;;  %v7182_v58 = vpop.f32.mrb[129].mxu0 }
0x2cf1   : > { %v4939_v7 = vpop.f32.mrb[130].mxu0 }
0x2cf2   : > { %v4944_v25 = vmul.f32 0.14433756, %v4939_v7  ;;  %v7183_v26 = vpop.f32.mrb[131].mxu0  ;;  %v4945_v39 = vadd.f32 %v4943_v59, %v7908_v15 }
0x2cf4   : > { %v4947_v27 = vsel %vm886_vm5, %v4945_v39, -inf  ;;  %v4946_v28 = vadd.f32 %v4944_v25, %v7910_v20 }
0x2cf5   : > { %4948 = vmax.xlane.f32.xlu0 %v4947_v27 }
0x2cf6   : > { %v4950_v29 = vsel %vm886_vm5, %v4946_v28, -inf }
0x2cf7   : > { %4951 = vmax.xlane.f32.xlu1 %v4950_v29 }
0x2d82   : > { %v4949_v13 = vpop.xlane.xlu0 %4948 }
0x2d83   : > { %v4953_v30 = vsub.f32 %v4945_v39, %v4949_v13 }
0x2d84   : > { %v4952_v31 = vpop.xlane.xlu1 %4951 }
0x2d85   : > { %v4955_v34 = vmul.f32 1.442695, %v4953_v30  ;;  %v4954_v35 = vsub.f32 %v4946_v28, %v4952_v31 }
0x2d87   : > { %7544 = vpow2.f32 %v4955_v34  ;;  %v4957_v36 = vmul.f32 1.442695, %v4954_v35 }
0x2d89   : > { %7546 = vpow2.f32 %v4957_v36 }
0x2d91   : > { %v7545_v37 = vpop.eup %7544 }
0x2d92   : > { %v4959_v38 = vsel %vm886_vm5, %v7545_v37, 0.0 }
0x2d93   : > { %v7547_v40 = vpop.eup %7546  ;;  %4960 = vadd.xlane.f32.xlu0 %v4959_v38 }
0x2d94   : > { %v4962_v18 = vsel %vm886_vm5, %v7547_v40, 0.0 }
0x2d95   : > { %4963 = vadd.xlane.f32.xlu1 %v4962_v18 }
0x2e20   : > { %v4961_v44 = vpop.xlane.xlu0 %4960 }
0x2e21   : > { %7548 = vrcp.f32 %v4961_v44 }
0x2e22   : > { %v4964_v45 = vpop.xlane.xlu1 %4963 }
0x2e23   : > { %7550 = vrcp.f32 %v4964_v45 }
0x2e2b   : > { %v7549_v46 = vpop.eup %7548 }
0x2e2c   : > { %v4967_v48 = vmul.f32 %v7549_v46, %v7545_v37 }
0x2e2d   : > { %v7551_v47 = vpop.eup %7550 }
0x2e2e   : > { %v4968_v49 = vmul.f32 %v7551_v47, %v7547_v40 }
0x2e30   : > { %v4969_v51 = vpack.c.bf16 %v4968_v49, %v4967_v48 }
0x2e32   : > { %7187 = vmatmul.mubr.msk.bf16.vlgmr.msra.gmra.mrb[132].mxu0 %vm886_vm5, %v4969_v51 }
0x2e33   : > { %7197 = vmatpush3.bf16.msra.mxu0 %v7419_v50  ;;  %7202 = vmatprep.mubr.msk.bf16.mxu0 %vm7635_vm1, %v7634_v16 }
0x2e34   : > { %7198 = vmatprep.subr.bf16.mxu0 %v7634_v16 }
0x2e37   : > { %7199 = vmatpush3.bf16.msra.mxu0 %v7420_v52 }
0x2e38   : > { %7200 = vmatprep.subr.bf16.mxu0 %v7634_v16 }
0x2e3b   : > { %7201 = vmatpush3.bf16.msra.mxu0 %v7421_v53 }
0x2e3c   : > { %7216 = vmatprep.subr.bf16.mxu0 %v7634_v16 }
0x2e3e   : > { %7203 = vmatmul.mubr.msk.bf16.vlgmr.msra.gmra.mrb[136].mxu0 %vm588_vm0, %v8422_v0 }
0x2e3f   : > { %7217 = vmatpush3.bf16.msra.mxu0 %v7422_v55  ;;  %7222 = vmatprep.mubr.msk.bf16.mxu0 %vm7635_vm1, %v7634_v16 }
0x2e40   : > { %7218 = vmatprep.subr.bf16.mxu0 %v7634_v16 }
0x2e43   : > { %7219 = vmatpush3.bf16.msra.mxu0 %v7423_v57 }
0x2e44   : > { %7220 = vmatprep.subr.bf16.mxu0 %v7634_v16 }
0x2e47   : > { %7221 = vmatpush3.bf16.msra.mxu0 %v7424_v61 }
0x2e48   : > { %7238 = vmatprep.subr.bf16.mxu0 %v7634_v16 }
0x2e4a   : > { %7223 = vmatmul.mubr.msk.bf16.vlgmr.msra.gmra.mrb[140].mxu0 %vm588_vm0, %v8422_v0 }
0x2e4b   : > { %7240 = vmatprep.mubr.msk.bf16.mxu0 %vm7635_vm1, %v7634_v16 }
0x2f05   : > { %v5007_v63 = vpop.f32.mrb[132].mxu0 }
0x2f06   : > { %v7188_v1 = vpop.f32.mrb[133].mxu0 }
0x2f07   : > { %v5010_v2 = vpop.f32.mrb[134].mxu0 }
0x2f08   : > { %v5014_v4 = vpack.c.bf16 %v5010_v2, %v5007_v63  ;;  %v7189_v6 = vpop.f32.mrb[135].mxu0 }
0x2f0a   : > { %7193 = vmatmul.mubr.msk.bf16.vlgmr.msra.gmra.mrb[132].mxu1 %vm834_vm2, %v5014_v4 }
0x2f0b   : > { %7207 = vmatpush3.bf16.msra.mxu1 %v7425_v3  ;;  %7212 = vmatprep.mubr.msk.bf16.mxu1 %vm7635_vm1, %v7634_v16 }
0x2f0c   : > { %7208 = vmatprep.subr.bf16.mxu1 %v7634_v16 }
0x2f0f   : > { %7209 = vmatpush3.bf16.msra.mxu1 %v7426_v14 }
0x2f10   : > { %7210 = vmatprep.subr.bf16.mxu1 %v7634_v16 }
0x2f11   : > { %v5125_v9 = vpop.f32.mrb[136].mxu0 }
0x2f12   : > { %v7204_v11 = vpop.f32.mrb[137].mxu0 }
0x2f13   : > { %v5128_v17 = vpop.f32.mrb[138].mxu0  ;;  %7211 = vmatpush3.bf16.msra.mxu1 %v7427_v41 }
0x2f14   : > { %v5265_v60 = vpack.c.bf16 %v5128_v17, %v5125_v9  ;;  %v7205_v19 = vpop.f32.mrb[139].mxu0  ;;  %7226 = vmatprep.subr.bf16.mxu1 %v7634_v16  ;;  %v6376_v17 = vld [vmem:[%s9045_s7 + $0x1] ss:$0 sm:$0xff] }
0x2f16   : > { %7213 = vmatmul.mubr.msk.bf16.vlgmr.msra.gmra.mrb[136].mxu1 %vm588_vm0, %v8422_v0 }
0x2f17   : > { %7228 = vmatprep.mubr.msk.bf16.mxu1 %vm7635_vm1, %v7634_v16 }
0x2f1d   : > { %v5257_v21 = vpop.f32.mrb[140].mxu0 }
0x2f1e   : > { %v7224_v22 = vpop.f32.mrb[141].mxu0 }
0x2f1f   : > { %v5260_v23 = vpop.f32.mrb[142].mxu0 }
0x2f20   : > { %v5264_v24 = vpack.c.bf16 %v5260_v23, %v5257_v21  ;;  %v7225_v54 = vpop.f32.mrb[143].mxu0 }
0x2fdd   : > { %v5057_v59 = vpop.f32.mrb[132].mxu1 }
0x2fde   : > { %v8832_v58 = vadd.f32 %v5057_v59, %v8755_v8  ;;  %v7194_v7 = vpop.f32.mrb[133].mxu1 }
0x2fdf   : > { %v5060_v25 = vpop.f32.mrb[134].mxu1 }
0x2fe0   : > { %v8835_v26 = vadd.f32 %v5060_v25, %v8758_v12  ;;  %v7195_v39 = vpop.f32.mrb[135].mxu1 }
0x2fe9   : > { %v5191_v27 = vpop.f32.mrb[136].mxu1 }
0x2fea   : > { %v7214_v0 = vpop.f32.mrb[137].mxu1 }
0x2feb   : > { %v5194_v28 = vpop.f32.mrb[138].mxu1 }
0x2fec   : > { %v5266_v29 = vpack.c.bf16 %v5194_v28, %v5191_v27  ;;  %v7215_v13 = vpop.f32.mrb[139].mxu1 }
0x2fed   : > { %v7430_v13 = vld [vmem:[%s9048_s10 + $0x34] ss:$8 sps:$4 sm:$0xff]  }
0x2fee   : > { %v5271_v30 = vsel %vm834_vm2, %v5266_v29, 0 }
0x2fef   : > { %7227 = vmatpush3.bf16.xpose.msra.mxu1 %v5271_v30  ;;  %v7428_v30 = vld [vmem:[%s9048_s10 + $0x30] ss:$8 sps:$4 sm:$0xff]  }
0x2ff0   : > { %7232 = vmatprep.subr.bf16.mxu1 %v7634_v16 }
0x2ff6   : > { %7229 = vmatmul.mubr.msk.bf16.vlgmr.msra.gmra.mrb[140].mxu1 %vm834_vm2, %v5265_v60 }
0x2ff7   : > { %7233 = vmatpush3.bf16.msra.mxu1 %v5264_v24  ;;  %7234 = vmatprep.mubr.msk.bf16.mxu1 %vm7635_vm1, %v7634_v16 }
0x2ff8   : > { %5549 = vmatprep.subr.bf16.mxu1 %v7430_v13 }
0x30c9   : > { %v5307_v8 = vpop.f32.mrb[140].mxu1 }
0x30ca   : > { %v5314_v12 = vmul.f32 0.14433756, %v5307_v8  ;;  %v7230_v31 = vpop.f32.mrb[141].mxu1  ;;  %v7433_v8 = vld [vmem:[%s9048_s10 + $0x44] ss:$8 sps:$4 sm:$0xff]  }
0x30cb   : > { %v5310_v34 = vpop.f32.mrb[142].mxu1  ;;  %v7434_v31 = vld [vmem:[%s9048_s10 + $0x50] ss:$8 sps:$4 sm:$0xff]  }
0x30cc   : > { %v5315_v35 = vmul.f32 0.14433756, %v5310_v34  ;;  %v7231_v36 = vpop.f32.mrb[143].mxu1  ;;  %v5316_v37 = vadd.f32 %v5314_v12, %v7908_v15  ;;  %v7431_v12 = vld [vmem:[%s9048_s10 + $0x40] ss:$8 sps:$4 sm:$0xff]  }
0x30cd   : > { %v7436_v34 = vld [vmem:[%s9048_s10 + $0x54] ss:$8 sps:$4 sm:$0xff]   ;;  %v7438_v36 = vld [vmem:[%s9050_s12 + $0x68] sm:$0xff]  }
0x30ce   : > { %v5318_v38 = vsel %vm886_vm5, %v5316_v37, -inf  ;;  %v5317_v40 = vadd.f32 %v5315_v35, %v7910_v20  ;;  %v6373_v20 = vld [vmem:[%s9044_s6 + $0x2c] sm:$0xf]  ;;  %v7437_v35 = vld [vmem:[%s9050_s12 + $0x60] sm:$0xff]  }
0x30cf   : > { %5319 = vmax.xlane.f32.xlu0 %v5318_v38  ;;  %v5392_v51 = vsel %vm1281_vm6, %v6373_v20, 0  ;;  %v7440_v38 = vld [vmem:[%s9050_s12 + $0x78] sm:$0xff]   ;;  %v6379_v20 = vld [vmem:[%s9046_s8 + $0x1] ss:$0 sm:$0xff] }
0x30d0   : > { %v5321_v18 = vsel %vm886_vm5, %v5317_v40, -inf  ;;  %7239 = vmatpush3.bf16.msra.mxu0 %v5392_v51 }
0x30d1   : > { %5322 = vmax.xlane.f32.xlu1 %v5321_v18  ;;  %5698 = vmatprep.subr.bf16.mxu0 %v7637_v33  ;;  %v7442_v18 = vld [vmem:[%s9050_s12 + $0x88] sm:$0xff]  }
0x315c   : > { %v5320_v42 = vpop.xlane.xlu0 %5319 }
0x315d   : > { %v5324_v43 = vsub.f32 %v5316_v37, %v5320_v42  ;;  %v7439_v37 = vld [vmem:[%s9050_s12 + $0x70] sm:$0xff]  }
0x315e   : > { %v5323_v44 = vpop.xlane.xlu1 %5322  ;;  %v7443_v42 = vld [vmem:[%s9050_s12 + $0x90] sm:$0xff]  }
0x315f   : > { %v5326_v45 = vmul.f32 1.442695, %v5324_v43  ;;  %v5325_v46 = vsub.f32 %v5317_v40, %v5323_v44  ;;  %v7441_v40 = vld [vmem:[%s9050_s12 + $0x80] sm:$0xff]   ;;  %v7444_v43 = vld [vmem:[%s9050_s12 + $0x98] sm:$0xff]  }
0x3160   : > { %v7445_v44 = vld [vmem:[%s9050_s12 + $0xa0] sm:$0xff]  }
0x3161   : > { %7552 = vpow2.f32 %v5326_v45  ;;  %v5328_v47 = vmul.f32 1.442695, %v5325_v46 }
0x3163   : > { %7554 = vpow2.f32 %v5328_v47 }
0x316b   : > { %v7553_v48 = vpop.eup %7552 }
0x316c   : > { %v5330_v49 = vsel %vm886_vm5, %v7553_v48, 0.0 }
0x316d   : > { %v7555_v15 = vpop.eup %7554  ;;  %5331 = vadd.xlane.f32.xlu0 %v5330_v49 }
0x316e   : > { %v5333_v50 = vsel %vm886_vm5, %v7555_v15, 0.0 }
0x316f   : > { %5334 = vadd.xlane.f32.xlu1 %v5333_v50 }
0x31fa   : > { %v5332_v52 = vpop.xlane.xlu0 %5331 }
0x31fb   : > { %7556 = vrcp.f32 %v5332_v52 }
0x31fc   : > { %v5335_v53 = vpop.xlane.xlu1 %5334 }
0x31fd   : > { %7558 = vrcp.f32 %v5335_v53 }
0x3205   : > { %v7557_v55 = vpop.eup %7556 }
0x3206   : > { %v5338_v61 = vmul.f32 %v7557_v55, %v7553_v48 }
0x3207   : > { %v7559_v57 = vpop.eup %7558 }
0x3208   : > { %v5339_v63 = vmul.f32 %v7559_v57, %v7555_v15  ;;  %v6380_v57 = vld [vmem:[%s9047_s9 + $0x1] ss:$0 sm:$0xff] }
0x320a   : > { %v5340_v1 = vpack.c.bf16 %v5339_v63, %v5338_v61 }
0x320c   : > { %7235 = vmatmul.mubr.msk.bf16.vlgmr.msra.gmra.mrb[144].mxu1 %vm886_vm5, %v5340_v1 }
0x320d   : > { %5581 = vmatprep.mubr.bf16.mxu1 %v7637_v33  ;;  %5550 = vmatpush1.bf16.msra.mxu1 %v7428_v30 }
0x320e   : > { %5551 = vmatprep.subr.bf16.mxu1 %v7433_v8 }
0x3211   : > { %5552 = vmatpush1.bf16.msra.mxu1 %v7431_v12 }
0x3212   : > { %5553 = vmatprep.subr.bf16.mxu1 %v7436_v34 }
0x3215   : > { %5554 = vmatpush1.bf16.msra.mxu1 %v7434_v31 }
0x3216   : > { %7244 = vmatprep.subr.bf16.mxu1 %v7634_v16 }
0x32df   : > { %v5378_v2 = vpop.f32.mrb[144].mxu1 }
0x32e0   : > { %v7236_v3 = vpop.f32.mrb[145].mxu1 }
0x32e1   : > { %v5381_v4 = vpop.f32.mrb[146].mxu1  ;;  %v7446_v3 = vld [vmem:[%s9050_s12 + $0xa8] sm:$0xff]  }
0x32e2   : > { %v5385_v6 = vpack.c.bf16 %v5381_v4, %v5378_v2  ;;  %v7237_v14 = vpop.f32.mrb[147].mxu1  ;;  %v7447_v4 = vld [vmem:[%s9050_s12 + $0xb0] sm:$0xff]  }
0x32e3   : > { %v6387_v14 = vld [vmem:[%s9049_s11 + $0x2] sm:$0x3] }
0x32e4   : > { %7241 = vmatmul.mubr.msk.bf16.vlgmr.msra.gmra.mrb[144].mxu0 %vm834_vm2, %v5385_v6  ;;  %v7448_v6 = vld [vmem:[%s9050_s12 + $0xb8] sm:$0xff]  }
0x32e5   : > { %5699 = vmatpush1.bf16.msra.mxu0 %v7437_v35 }
0x32e6   : > { %5700 = vmatprep.subr.bf16.mxu0 %v7637_v33 }
0x32e9   : > { %5701 = vmatpush1.bf16.msra.mxu0 %v7438_v36 }
0x32ea   : > { %5702 = vmatprep.subr.bf16.mxu0 %v7637_v33 }
0x32ed   : > { %5703 = vmatpush1.bf16.msra.mxu0 %v7439_v37 }
0x32ee   : > { %5704 = vmatprep.subr.bf16.mxu0 %v7637_v33 }
0x32f1   : > { %5705 = vmatpush1.bf16.msra.mxu0 %v7440_v38 }
0x32f2   : > { %5706 = vmatprep.subr.bf16.mxu0 %v7637_v33 }
0x32f5   : > { %5707 = vmatpush1.bf16.msra.mxu0 %v7441_v40  ;;  %v7449_v40 = vld [vmem:[%s9054_s16] sm:$0xff]  }
0x32f6   : > { %5708 = vmatprep.subr.bf16.mxu0 %v7637_v33 }
0x32f9   : > { %5709 = vmatpush1.bf16.msra.mxu0 %v7442_v18  ;;  %v7450_v18 = vld [vmem:[%s9054_s16 + $0x8] sm:$0xff]  }
0x32fa   : > { %5710 = vmatprep.subr.bf16.mxu0 %v7637_v33 }
0x32fd   : > { %5711 = vmatpush1.bf16.msra.mxu0 %v7443_v42  ;;  %v7451_v42 = vld [vmem:[%s9054_s16 + $0x10] sm:$0xff]  }
0x32fe   : > { %5712 = vmatprep.subr.bf16.mxu0 %v7637_v33 }
0x3301   : > { %5713 = vmatpush1.bf16.msra.mxu0 %v7444_v43 }
0x3302   : > { %5714 = vmatprep.subr.bf16.mxu0 %v7637_v33 }
0x3305   : > { %5715 = vmatpush1.bf16.msra.mxu0 %v7445_v44 }
0x3306   : > { %5716 = vmatprep.subr.bf16.mxu0 %v7637_v33 }
0x3309   : > { %5717 = vmatpush1.bf16.msra.mxu0 %v7446_v3 }
0x330a   : > { %5718 = vmatprep.subr.bf16.mxu0 %v7637_v33 }
0x330d   : > { %5719 = vmatpush1.bf16.msra.mxu0 %v7447_v4 }
0x330e   : > { %5720 = vmatprep.subr.bf16.mxu0 %v7637_v33 }
0x3311   : > { %5721 = vmatpush1.bf16.msra.mxu0 %v7448_v6 }
0x33b7   : > { %v5428_v41 = vpop.f32.mrb[144].mxu0 }
0x33b8   : > { %v5435_v9 = vadd.f32 %v5428_v41, %v8832_v58  ;;  %v7242_v11 = vpop.f32.mrb[145].mxu0  ;;  %v5509_v41 = vrot.slane %v6387_v14, %v2923_v5 }
0x33b9   : > { %v5431_v60 = vpop.f32.mrb[146].mxu0 }
0x33ba   : > { %v5437_v19 = vadd.f32 %v5435_v9, %v8388_v56  ;;  %v5436_v21 = vadd.f32 %v5431_v60, %v8835_v26  ;;  %v7243_v22 = vpop.f32.mrb[147].mxu0  ;;  %v5513_v9 = vrot.slane %v6387_v14, %v2927_v62 }
0x33bc   : > { %v8862_v23 = vadd.f32 %v6376_v17, %v5437_v19  ;;  %v5438_v24 = vadd.f32 %v5436_v21, %v8391_v32 }
0x33be   : > { %v8865_v54 = vadd.f32 %v6376_v17, %v5438_v24  ;;  %v5453_v59 = vsel %vm588_vm0, %v8862_v23, 0.0 }
0x33bf   : > { %5454 = vadd.xlane.f32.xlu0 %v5453_v59 }
0x33c0   : > { %v5456_v58 = vsel %vm588_vm0, %v8865_v54, 0.0 }
0x33c1   : > { %5457 = vadd.xlane.f32.xlu1 %v5456_v58 }
0x344c   : > { %v5455_v7 = vpop.xlane.xlu0 %5454 }
0x344d   : > { %v5459_v25 = vmul.f32 0.020833334, %v5455_v7 }
0x344e   : > { %v5458_v56 = vpop.xlane.xlu1 %5457 }
0x344f   : > { %v5461_v26 = vsub.f32 %v8862_v23, %v5459_v25  ;;  %v5460_v39 = vmul.f32 0.020833334, %v5458_v56 }
0x3451   : > { %v5462_v27 = vsub.f32 %v8865_v54, %v5460_v39  ;;  %v5463_v0 = vmul.f32 %v5461_v26, %v5461_v26 }
0x3453   : > { %v5465_v32 = vsel %vm588_vm0, %v5463_v0, 0.0  ;;  %v5464_v28 = vmul.f32 %v5462_v27, %v5462_v27 }
0x3454   : > { %5466 = vadd.xlane.f32.xlu0 %v5465_v32 }
0x3455   : > { %v5468_v29 = vsel %vm588_vm0, %v5464_v28, 0.0 }
0x3456   : > { %5469 = vadd.xlane.f32.xlu1 %v5468_v29 }
0x34e1   : > { %v5467_v45 = vpop.xlane.xlu0 %5466 }
0x34e2   : > { %v5471_v46 = vmul.f32 0.020833334, %v5467_v45 }
0x34e3   : > { %v5470_v47 = vpop.xlane.xlu1 %5469 }
0x34e4   : > { %v5473_v48 = vadd.f32 1e-05, %v5471_v46  ;;  %v5472_v49 = vmul.f32 0.020833334, %v5470_v47 }
0x34e6   : > { %7560 = vrsqrt.f32 %v5473_v48  ;;  %v5474_v15 = vadd.f32 1e-05, %v5472_v49 }
0x34e8   : > { %7562 = vrsqrt.f32 %v5474_v15  ;;  %v6434_v15 = vld [vmem:[%s9052_s14] ss:$0 sm:$0xff] }
0x34f0   : > { %v7561_v50 = vpop.eup %7560 }
0x34f1   : > { %v5477_v51 = vmul.f32 %v7561_v50, %v5461_v26 }
0x34f2   : > { %v7563_v52 = vpop.eup %7562 }
0x34f3   : > { %v5485_v53 = vmul.f32 %v6379_v20, %v5477_v51  ;;  %v5478_v55 = vmul.f32 %v7563_v52, %v5462_v27  ;;  %v6435_v52 = vld [vmem:[%s9053_s15] ss:$0 sm:$0xff] }
0x34f5   : > { %v5486_v61 = vmul.f32 %v6379_v20, %v5478_v55  ;;  %v5493_v63 = vadd.f32 %v6380_v57, %v5485_v53 }
0x34f7   : > { %v5494_v1 = vadd.f32 %v6380_v57, %v5486_v61 }
0x34f9   : > { %v5495_v2 = vpack.c.bf16 %v5494_v1, %v5493_v63  ;;  %v6436_v63 = vld [vmem:[%s9055_s17] ss:$0 sm:$0xff] }
0x34fb   : > { %6394 = vmatmul.mubr.msk.bf16.vlgmr.msra.gmra.mrb[148].mxu1 %vm588_vm0, %v5495_v2 }
0x34fc   : > { %7250 = vmatprep.mubr.msk.bf16.mxu1 %vm7635_vm1, %v7634_v16  ;;  %7245 = vmatpush3.bf16.msra.mxu1 %v7449_v40 }
0x34fd   : > { %7246 = vmatprep.subr.bf16.mxu1 %v7634_v16 }
0x3500   : > { %7247 = vmatpush3.bf16.msra.mxu1 %v7450_v18 }
0x3501   : > { %7248 = vmatprep.subr.bf16.mxu1 %v7634_v16 }
0x3504   : > { %7249 = vmatpush3.bf16.msra.mxu1 %v7451_v42 }
0x35ce   : > { %v5583_v11 = vpop.f32.mrb[148].mxu1 }
0x35cf   : > { %v5584_v17 = vadd.f32 %v5583_v11, %v5509_v41  ;;  %v5585_v60 = vpop.f32.mrb[149].mxu1 }
0x35d0   : > { %v5586_v19 = vadd.f32 %v5585_v60, %v5513_v9  ;;  %v5587_v33 = vpop.f32.mrb[150].mxu1 }
0x35d1   : > { %v5588_v21 = vadd.f32 %v5587_v33, %v5509_v41  ;;  %v5589_v22 = vpop.f32.mrb[151].mxu1  ;;  %v5592_v59 = vmax.f32 %v5584_v17, 0.0 }
0x35d2   : > { %v5590_v24 = vadd.f32 %v5589_v22, %v5513_v9  ;;  %v5593_v7 = vmax.f32 %v5586_v19, 0.0 }
0x35d3   : > { %v5594_v58 = vmax.f32 %v5588_v21, 0.0 }
0x35d4   : > { %v5595_v25 = vmax.f32 %v5590_v24, 0.0 }
0x35d5   : > { %v5596_v56 = vpack.c.bf16 %v5594_v58, %v5592_v59 }
0x35d6   : > { %v5597_v26 = vpack.c.bf16 %v5595_v25, %v5593_v7 }
0x35d8   : > { %6431 = vmatprep.mubr.msk.bf16.mxu0 %vm3109_vm7, %v5597_v26 }
0x35d9   : > { %5731 = vmatmul.mubr.bf16.vlgmr.msra.gmra.mrb[148].mxu0 %v5596_v56 }
0x36ac   : > { %v5732_v5 = vpop.f32.mrb[148].mxu0 }
0x36ad   : > { %v5739_v62 = vadd.f32 %v5732_v5, %v8862_v23  ;;  %v5734_v39 = vpop.f32.mrb[149].mxu0 }
0x36ae   : > { %v5735_v27 = vpop.f32.mrb[150].mxu0 }
0x36af   : > { %v5740_v0 = vadd.f32 %v5735_v27, %v8865_v54  ;;  %v5737_v32 = vpop.f32.mrb[151].mxu0  ;;  %v5749_v28 = vadd.f32 %v6433_v10, %v5739_v62 }
0x36b1   : > { %v5753_v29 = vsel %vm588_vm0, %v5749_v28, 0.0  ;;  %v5750_v13 = vadd.f32 %v6433_v10, %v5740_v0 }
0x36b2   : > { %5754 = vadd.xlane.f32.xlu0 %v5753_v29 }
0x36b3   : > { %v5756_v30 = vsel %vm588_vm0, %v5750_v13, 0.0 }
0x36b4   : > { %5757 = vadd.xlane.f32.xlu1 %v5756_v30 }
0x373f   : > { %v5755_v8 = vpop.xlane.xlu0 %5754 }
0x3740   : > { %v5759_v12 = vmul.f32 0.020833334, %v5755_v8 }
0x3741   : > { %v5758_v31 = vpop.xlane.xlu1 %5757 }
0x3742   : > { %v5761_v34 = vsub.f32 %v5749_v28, %v5759_v12  ;;  %v5760_v35 = vmul.f32 0.020833334, %v5758_v31 }
0x3744   : > { %v5762_v36 = vsub.f32 %v5750_v13, %v5760_v35  ;;  %v5763_v23 = vmul.f32 %v5761_v34, %v5761_v34 }
0x3746   : > { %v5765_v37 = vsel %vm588_vm0, %v5763_v23, 0.0  ;;  %v5764_v38 = vmul.f32 %v5762_v36, %v5762_v36 }
0x3747   : > { %5766 = vadd.xlane.f32.xlu0 %v5765_v37 }
0x3748   : > { %v5768_v54 = vsel %vm588_vm0, %v5764_v38, 0.0 }
0x3749   : > { %5769 = vadd.xlane.f32.xlu1 %v5768_v54 }
0x37d4   : > { %v5767_v43 = vpop.xlane.xlu0 %5766 }
0x37d5   : > { %v5771_v44 = vmul.f32 0.020833334, %v5767_v43 }
0x37d6   : > { %v5770_v45 = vpop.xlane.xlu1 %5769 }
0x37d7   : > { %v5773_v46 = vadd.f32 1e-05, %v5771_v44  ;;  %v5772_v47 = vmul.f32 0.020833334, %v5770_v45 }
0x37d9   : > { %7564 = vrsqrt.f32 %v5773_v46  ;;  %v5774_v48 = vadd.f32 1e-05, %v5772_v47 }
0x37db   : > { %7566 = vrsqrt.f32 %v5774_v48 }
0x37e3   : > { %v7565_v49 = vpop.eup %7564 }
0x37e4   : > { %v5777_v16 = vmul.f32 %v7565_v49, %v5761_v34 }
0x37e5   : > { %v7567_v50 = vpop.eup %7566 }
0x37e6   : > { %v5785_v20 = vmul.f32 %v6434_v15, %v5777_v16  ;;  %v5778_v51 = vmul.f32 %v7567_v50, %v5762_v36 }
0x37e8   : > { %v5786_v53 = vmul.f32 %v6434_v15, %v5778_v51  ;;  %v5793_v55 = vadd.f32 %v6435_v52, %v5785_v20 }
0x37ea   : > { %v5794_v57 = vadd.f32 %v6435_v52, %v5786_v53 }
0x37ec   : > { %v5795_v61 = vpack.c.bf16 %v5794_v57, %v5793_v55 }
0x37ee   : > { %7251 = vmatmul.mubr.msk.bf16.vlgmr.msra.gmra.mrb[152].mxu1 %vm588_vm0, %v5795_v61 }
0x38c1   : > { %v5864_v1 = vpop.f32.mrb[152].mxu1 }
0x38c2   : > { %v5865_v2 = vadd.f32 %v6436_v63, %v5864_v1  ;;  %v7252_v3 = vpop.f32.mrb[153].mxu1 }
0x38c3   : > { %v5867_v4 = vpop.f32.mrb[154].mxu1 }
0x38c4   : > { %5871 = vst [vmem:[%s568_s29] sm:$0xff] %v5865_v2  ;;  %v5868_v6 = vadd.f32 %v6436_v63, %v5867_v4  ;;  %v7253_v14 = vpop.f32.mrb[155].mxu1 }
0x38c6   : > { %5872 = vst [vmem:[%s568_s29 + $0x8] sm:$0xff] %v5868_v6 }
0x38c7   : > { %7583 = shalt.err (!%p7580_p3)
}
0x38c8   : > { %s7584_s30 = scalar_lea.hbm %s8995_s27, 256  ;;  %s7588_s20 = scalar_lea.hbm %s9056_s18, 512 }
0x38c9   : > { %p7585_p4 = scmp.ne.s32.totalorder %s8995_s27, %s7584_s30  ;;  %p7589_p9 = scmp.lt.u32.totalorder %s8995_s27, %s9056_s18 }
0x38ca   : > { %p7590_p10 = scmp.lt.u32.totalorder %s7588_s20, %s7584_s30  ;;  %p7592_p12 = scmp.lt.u32.totalorder %s7584_s30, %s8995_s27 }
0x38cb   : > { %p7586_p7 = pnand %p7585_p4, %p7774_p5 }
0x38cc   : > { %p7591_p11 = por %p7590_p10, %p7589_p9 }
0x38cd   : > { %p7587_p8 = pneg %p7586_p7 }
0x38ce   : > { %p7593_p13 = por %p7592_p12, %p7591_p11 }
0x38d0   : > { %p7594_p0 = pnand %p7593_p13, %p7587_p8 }
0x38d2   : > { %7597 = shalt.err (!%p7594_p0)
}
0x38d3   : > { %s7639_s3 = smov 128   ;;  %s7640_s0 = smov 8  }
0x38d4   : > { %7254 = dma.vmem_to_hbm [thread:$0]  (%p7774_p5), %s8990_s1, 256, %s8995_s27, %s8997_s23, %s7639_s3, %s7639_s3, %s7640_s0  }
0x38d5 PF: > { %s9081_s19 = sld [smem:[#allocation7_spill]]  ;;  %s9082_s29 = sld [smem:[#allocation5_spill]] }
0x38db   : > { %p7260_p1 = scmp.ge.s32.totalorder %s9081_s19, 2  ;;  %s5902_s24 = sand.u32 1, %s9082_s29  }
0x38dc   : > { %s5903_s30 = scalar_lea.sflag [#allocation3], %s5902_s24 }
0x38dd   : > { %p7257_p2 = pnand %p7260_p1, %p7778_p6 }
0x38df   : > { %7615 = dma.done.wait (!%p7257_p2), %s5903_s30, 256  }
0x38e0   : > { %7617 = vsyncadd (!%p7257_p2), %s5903_s30, 4294967040  ;;  %s9084_s30 = sld [smem:[#allocation8_spill]]  ;;  %s9085_s20 = sld [smem:[#allocation6_spill]] }
0x38e1   : > { %s9086_s29 = sld [smem:[#allocation9_spill]]  ;;  %s9087_s27 = smov %s7624_s28 }
0x38e6   : > { %p28_p3 = scmp.ge.s32.totalorder %s9084_s30, 4   ;;  %s9088_s28 = smov %s9085_s20 }
0x38e8   :  { %30 = sbr.rel (!%p28_p3) target bundleno = 8 (0x8), region = 180 }
0x38ef   :  { %5908 = vsyncpa [#allocation3], 1 }
0x38f0   :  { %5910 = vsyncpa [#allocation3 + $0x1], 1 }

</bundles_post_ra>
